<compile_context>
chip_gen: v7x
topology: tpu7x:2x2x1
jax: 0.10.0
libtpu: 0.0.40
codegen_flags: <defaults>
</compile_context>

<pallas_src>
import jax
import jax.numpy as jnp
from jax.experimental import pallas as pl
from jax.experimental.pallas import tpu as pltpu

_VMEM_LIMIT = 48 * 1024 * 1024  # headroom below v7x's 64 MiB per-TC VMEM


def _round_up(x, m):
    return ((x + m - 1) // m) * m


# ------------------------------ Pallas kernels ------------------------------

def _make_fused_conv_kernel(kh, kw, cin, cout_p, tr, wo_p, packed):
    """Fused (im2col-in-VMEM) conv + folded BN + ReLU for stride-1 convs."""
    kk = kh * kw
    m = tr * wo_p

    def kernel(x_ref, w_ref, sc_ref, sh_ref, o_ref):
        r0 = pl.program_id(1) * tr

        def tap(i, j):
            # (1, tr, wo_p, cin) window of the padded image, already in VMEM.
            t = x_ref[:, pl.ds(r0 + i, tr), pl.ds(j, wo_p), :]
            return t.reshape(m, cin)

        if packed:
            # Taps packed into the contraction dim: one MXU matmul with
            # K = kh*kw*cin.  w_ref is (kk*cin, cout_p).
            patch = jnp.concatenate(
                [tap(i, j) for i in range(kh) for j in range(kw)], axis=-1)
            acc = jnp.dot(patch, w_ref[...],
                          preferred_element_type=jnp.float32)
        else:
            # Cin not lane-aligned: accumulate one dot per tap (K = cin).
            # w_ref is (kk, cin, cout_p).
            acc = jnp.dot(tap(0, 0), w_ref[0],
                          preferred_element_type=jnp.float32)
            for k in range(1, kk):
                i, j = divmod(k, kw)
                acc = acc + jnp.dot(tap(i, j), w_ref[k],
                                    preferred_element_type=jnp.float32)

        y = jnp.maximum(acc * sc_ref[...] + sh_ref[...], 0.0)
        o_ref[...] = y.reshape(1, tr, wo_p, cout_p)

    return kernel


def _gemm_bn_relu_kernel(x_ref, w_ref, sc_ref, sh_ref, o_ref):
    """K-packed im2col GEMM + folded BN + ReLU (fallback for strided convs)."""
    acc = jnp.dot(x_ref[...], w_ref[...], preferred_element_type=jnp.float32)
    o_ref[...] = jnp.maximum(acc * sc_ref[...] + sh_ref[...], 0.0)


# --------------------------------- wrappers ---------------------------------

def _fused_conv(x_nhwc, w_bf16, scale_p, shift_p, *, kh, kw, padding, ho, wo):
    """Stride-1 path: no HBM im2col, taps are generated in VMEM."""
    n, h, w, cin = x_nhwc.shape
    kk, _, cout_p = w_bf16.shape

    # Output tile: tr rows x wo_p cols (wo padded to a multiple of 8 so the
    # in-kernel reshapes stay sublane-aligned).
    wo_p = _round_up(wo, 8)
    tr = max(1, min(ho, 1024 // wo_p))
    n_t = pl.cdiv(ho, tr)
    ho_pad = n_t * tr

    # Spatial zero padding (conv padding + tile alignment).  This is the only
    # HBM-side copy of the activation; bf16 halves the HBM->VMEM DMA bytes.
    xp = jnp.pad(x_nhwc,
                 ((0, 0),
                  (padding, padding + (ho_pad - ho)),
                  (padding, padding + (wo_p - wo)),
                  (0, 0))).astype(jnp.bfloat16)
    hp, wp = xp.shape[1], xp.shape[2]

    packed = (cin % 128 == 0)
    if packed:
        w_arg = w_bf16.reshape(kk * cin, cout_p)
        w_spec = pl.BlockSpec((kk * cin, cout_p), lambda b, t: (0, 0))
    else:
        w_arg = w_bf16
        w_spec = pl.BlockSpec((kk, cin, cout_p), lambda b, t: (0, 0, 0))

    kernel = _make_fused_conv_kernel(kh, kw, cin, cout_p, tr, wo_p, packed)
    out = pl.pallas_call(
        kernel,
        out_shape=jax.ShapeDtypeStruct((n, ho_pad, wo_p, cout_p), jnp.float32),
        grid=(n, n_t),
        in_specs=[
            # Whole padded image per batch element; re-DMA'd only when the
            # batch index changes (index map ignores the row-tile index).
            pl.BlockSpec((1, hp, wp, cin), lambda b, t: (b, 0, 0, 0)),
            w_spec,
            pl.BlockSpec((1, cout_p), lambda b, t: (0, 0)),
            pl.BlockSpec((1, cout_p), lambda b, t: (0, 0)),
        ],
        out_specs=pl.BlockSpec((1, tr, wo_p, cout_p),
                               lambda b, t: (b, t, 0, 0)),
        compiler_params=pltpu.CompilerParams(
            dimension_semantics=("parallel", "parallel"),
            vmem_limit_bytes=_VMEM_LIMIT),
    )(xp, w_arg, scale_p, shift_p)
    return out[:, :ho, :wo, :]


def _im2col_gemm(x_nhwc, w_bf16, scale_p, shift_p, *, kh, kw, stride, padding,
                 ho, wo):
    """Strided convs: wrapper-side K-packed im2col + a single-dot GEMM kernel."""
    # TODO(synk): this path still materializes the im2col matrix in HBM; only
    # the stride-1 path avoids it.
    n, h, w, cin = x_nhwc.shape
    kk, _, cout_p = w_bf16.shape
    xp = jnp.pad(x_nhwc, ((0, 0), (padding, padding), (padding, padding),
                          (0, 0))).astype(jnp.bfloat16)
    taps = [xp[:, i:i + stride * ho:stride, j:j + stride * wo:stride, :]
            for i in range(kh) for j in range(kw)]
    patches = jnp.concatenate(taps, axis=-1).reshape(n * ho * wo, kk * cin)

    m, k = patches.shape
    tm = min(512, _round_up(m, 8))
    mp = _round_up(m, tm)
    if mp != m:
        patches = jnp.pad(patches, ((0, mp - m), (0, 0)))
    w2 = w_bf16.reshape(k, cout_p)

    out = pl.pallas_call(
        _gemm_bn_relu_kernel,
        out_shape=jax.ShapeDtypeStruct((mp, cout_p), jnp.float32),
        grid=(mp // tm,),
        in_specs=[pl.BlockSpec((tm, k), lambda i: (i, 0)),
                  pl.BlockSpec((k, cout_p), lambda i: (0, 0)),
                  pl.BlockSpec((1, cout_p), lambda i: (0, 0)),
                  pl.BlockSpec((1, cout_p), lambda i: (0, 0))],
        out_specs=pl.BlockSpec((tm, cout_p), lambda i: (i, 0)),
        compiler_params=pltpu.CompilerParams(
            dimension_semantics=("parallel",),
            vmem_limit_bytes=_VMEM_LIMIT),
    )(patches, w2, scale_p, shift_p)
    return out[:m].reshape(n, ho, wo, cout_p)


def conv_bn_relu(x_nchw, weight, gamma, beta, mean, var, *,
                 stride=1, padding=0, eps=1e-5):
    """ConvolutionalLayer forward.

    x_nchw: (N, Cin, H, W);  weight: (Cout, Cin, KH, KW)  (PyTorch layouts).
    Returns (N, Cout, Ho, Wo) float32, matching nn.Sequential(Conv2d(bias=False),
    BatchNorm2d (inference stats), ReLU).
    """
    n, cin, h, w = x_nchw.shape
    cout, _, kh, kw = weight.shape
    kk = kh * kw
    ho = (h + 2 * padding - kh) // stride + 1
    wo = (w + 2 * padding - kw) // stride + 1

    # Fold BatchNorm (inference mode) into per-channel scale/shift.
    scale = (gamma / jnp.sqrt(var + eps)).astype(jnp.float32)
    shift = (beta - mean * scale).astype(jnp.float32)

    # Keep the contraction minor dim sublane-friendly.
    cin_p = _round_up(cin, 8)
    if cin_p != cin:
        weight = jnp.pad(weight, ((0, 0), (0, cin_p - cin), (0, 0), (0, 0)))

    # Lane-dense output channels: pad Cout to a multiple of 128.
    cout_p = _round_up(cout, 128)
    w_hwio = jnp.transpose(weight, (2, 3, 1, 0)).reshape(kk, cin_p, cout)
    w_hwio = jnp.pad(w_hwio, ((0, 0), (0, 0), (0, cout_p - cout)))
    w_bf16 = w_hwio.astype(jnp.bfloat16)
    scale_p = jnp.pad(scale, (0, cout_p - cout)).reshape(1, cout_p)
    shift_p = jnp.pad(shift, (0, cout_p - cout)).reshape(1, cout_p)

    # NCHW -> NHWC internal layout.
    x_nhwc = jnp.transpose(x_nchw, (0, 2, 3, 1)).astype(jnp.float32)
    if cin_p != cin:
        x_nhwc = jnp.pad(x_nhwc, ((0, 0), (0, 0), (0, 0), (0, cin_p - cin)))

    if stride == 1:
        y = _fused_conv(x_nhwc, w_bf16, scale_p, shift_p,
                        kh=kh, kw=kw, padding=padding, ho=ho, wo=wo)
    else:
        y = _im2col_gemm(x_nhwc, w_bf16, scale_p, shift_p,
                         kh=kh, kw=kw, stride=stride, padding=padding,
                         ho=ho, wo=wo)
    y = y[..., :cout]                         # drop Cout padding
    return jnp.transpose(y, (0, 3, 1, 2))     # back to NCHW


# ------------------------------ reference & demo -----------------------------

def _reference(x_nchw, weight, gamma, beta, mean, var, *, stride, padding,
               eps=1e-5):
    y = jax.lax.conv_general_dilated(
        x_nchw.astype(jnp.float32), weight.astype(jnp.float32),
        window_strides=(stride, stride),
        padding=[(padding, padding), (padding, padding)],
        dimension_numbers=("NCHW", "OIHW", "NCHW"),
        precision=jax.lax.Precision.HIGHEST)
    scale = gamma / jnp.sqrt(var + eps)
    shift = beta - mean * scale
    y = y * scale[None, :, None, None] + shift[None, :, None, None]
    return jnp.maximum(y, 0.0)


def _init_layer(key, cin, cout, k):
    kw_, kg, kb, km, kv = jax.random.split(key, 5)
    fan_in = cin * k * k
    weight = jax.random.normal(kw_, (cout, cin, k, k), jnp.float32) * jnp.sqrt(
        2.0 / fan_in)
    gamma = 1.0 + 0.1 * jax.random.normal(kg, (cout,), jnp.float32)
    beta = 0.1 * jax.random.normal(kb, (cout,), jnp.float32)
    mean = 0.1 * jax.random.normal(km, (cout,), jnp.float32)
    var = 1.0 + 0.5 * jax.random.uniform(kv, (cout,), jnp.float32)
    return weight, gamma, beta, mean, var


if __name__ == "__main__":
    root = jax.random.PRNGKey(0)
    cases = [
        # (cin, cout, k, stride, padding, H, W)
        (4, 32, 3, 1, 1, 16, 16),     # fused path, per-tap dots
        (128, 64, 3, 1, 1, 16, 16),   # fused path, K-packed single MXU matmul
        (16, 32, 3, 2, 1, 16, 16),    # strided conv -> im2col GEMM path
    ]
    fwd = jax.jit(conv_bn_relu, static_argnames=("stride", "padding", "eps"))
    for idx, (cin, cout, k, s, p, h, w) in enumerate(cases):
        key = jax.random.fold_in(root, idx)
        kx, kp = jax.random.split(key)
        x = jax.random.normal(kx, (2, cin, h, w), jnp.float32)
        weight, gamma, beta, mean, var = _init_layer(kp, cin, cout, k)

        out = jax.block_until_ready(
            fwd(x, weight, gamma, beta, mean, var, stride=s, padding=p))
        ref = _reference(x, weight, gamma, beta, mean, var, stride=s,
                         padding=p)

        assert out.shape == ref.shape, (out.shape, ref.shape)
        assert bool(jnp.all(jnp.isfinite(out)))
        max_err = float(jnp.max(jnp.abs(out - ref)))
        rel = max_err / (float(jnp.max(jnp.abs(ref))) + 1e-6)
        assert rel < 0.05, (idx, max_err, rel)   # bf16-MXU tolerance

    print("KERNEL_OK")
</pallas_src>

<mosaic_0001>
module attributes {stable_mosaic.version = 11 : i64} {
  func.func @kernel(%arg0: i32, %arg1: i32, %arg2: memref<1x18x18x8xbf16, #tpu.memory_space<vmem>>, %arg3: memref<9x8x128xbf16, #tpu.memory_space<vmem>>, %arg4: memref<1x128xf32, #tpu.memory_space<vmem>>, %arg5: memref<1x128xf32, #tpu.memory_space<vmem>>, %arg6: memref<1x16x16x128xf32, #tpu.memory_space<vmem>>) attributes {dimension_semantics = [#tpu.dimension_semantics<parallel>, #tpu.dimension_semantics<parallel>], iteration_bounds = array<i64: 2, 1>, scalar_prefetch = 0 : i64, scratch_operands = 0 : i64, tpu.core_type = #tpu.core_type<tc>, window_params = [{transform_indices = @transform_0, window_bounds = array<i64: 1, 18, 18, 8>}, {pipeline_mode = #tpu.pipeline_mode<synchronous>, transform_indices = @transform_1, window_bounds = array<i64: 9, 8, 128>}, {pipeline_mode = #tpu.pipeline_mode<synchronous>, transform_indices = @transform_2, window_bounds = array<i64: 1, 128>}, {pipeline_mode = #tpu.pipeline_mode<synchronous>, transform_indices = @transform_3, window_bounds = array<i64: 1, 128>}, {transform_indices = @transform_4, window_bounds = array<i64: 1, 16, 16, 128>}]} {
    %c16_i32 = arith.constant 16 : i32
    %0 = arith.muli %arg1, %c16_i32 : i32
    %c0_i32 = arith.constant 0 : i32
    %1 = arith.addi %0, %c0_i32 : i32
    %c0 = arith.constant 0 : index
    %2 = arith.index_cast %1 : i32 to index
    %c0_0 = arith.constant 0 : index
    %c0_1 = arith.constant 0 : index
    %3 = vector.load %arg2[%c0, %2, %c0_0, %c0_1] : memref<1x18x18x8xbf16, #tpu.memory_space<vmem>>, vector<1x16x16x8xbf16>
    %4 = vector.shape_cast %3 : vector<1x16x16x8xbf16> to vector<256x8xbf16>
    %c0_2 = arith.constant 0 : index
    %c0_3 = arith.constant 0 : index
    %c0_4 = arith.constant 0 : index
    %5 = vector.load %arg3[%c0_2, %c0_3, %c0_4] : memref<9x8x128xbf16, #tpu.memory_space<vmem>>, vector<1x8x128xbf16>
    %6 = vector.shape_cast %5 : vector<1x8x128xbf16> to vector<8x128xbf16>
    %cst = arith.constant dense<0.000000e+00> : vector<256x128xf32>
    %7 = tpu.matmul %4, %6, %cst {dimension_numbers = #tpu.dot_dimension_numbers<[1], [0], [0], [1], [0, 0, 1, 1], [], []>} : vector<256x8xbf16>, vector<8x128xbf16>, vector<256x128xf32> -> vector<256x128xf32>
    %c0_i32_5 = arith.constant 0 : i32
    %8 = arith.addi %0, %c0_i32_5 : i32
    %c0_6 = arith.constant 0 : index
    %9 = arith.index_cast %8 : i32 to index
    %c1 = arith.constant 1 : index
    %c0_7 = arith.constant 0 : index
    %10 = vector.load %arg2[%c0_6, %9, %c1, %c0_7] : memref<1x18x18x8xbf16, #tpu.memory_space<vmem>>, vector<1x16x16x8xbf16>
    %11 = vector.shape_cast %10 : vector<1x16x16x8xbf16> to vector<256x8xbf16>
    %c1_8 = arith.constant 1 : index
    %c0_9 = arith.constant 0 : index
    %c0_10 = arith.constant 0 : index
    %12 = vector.load %arg3[%c1_8, %c0_9, %c0_10] : memref<9x8x128xbf16, #tpu.memory_space<vmem>>, vector<1x8x128xbf16>
    %13 = vector.shape_cast %12 : vector<1x8x128xbf16> to vector<8x128xbf16>
    %cst_11 = arith.constant dense<0.000000e+00> : vector<256x128xf32>
    %14 = tpu.matmul %11, %13, %cst_11 {dimension_numbers = #tpu.dot_dimension_numbers<[1], [0], [0], [1], [0, 0, 1, 1], [], []>} : vector<256x8xbf16>, vector<8x128xbf16>, vector<256x128xf32> -> vector<256x128xf32>
    %15 = arith.addf %7, %14 : vector<256x128xf32>
    %c0_i32_12 = arith.constant 0 : i32
    %16 = arith.addi %0, %c0_i32_12 : i32
    %c0_13 = arith.constant 0 : index
    %17 = arith.index_cast %16 : i32 to index
    %c2 = arith.constant 2 : index
    %c0_14 = arith.constant 0 : index
    %18 = vector.load %arg2[%c0_13, %17, %c2, %c0_14] : memref<1x18x18x8xbf16, #tpu.memory_space<vmem>>, vector<1x16x16x8xbf16>
    %19 = vector.shape_cast %18 : vector<1x16x16x8xbf16> to vector<256x8xbf16>
    %c2_15 = arith.constant 2 : index
    %c0_16 = arith.constant 0 : index
    %c0_17 = arith.constant 0 : index
    %20 = vector.load %arg3[%c2_15, %c0_16, %c0_17] : memref<9x8x128xbf16, #tpu.memory_space<vmem>>, vector<1x8x128xbf16>
    %21 = vector.shape_cast %20 : vector<1x8x128xbf16> to vector<8x128xbf16>
    %cst_18 = arith.constant dense<0.000000e+00> : vector<256x128xf32>
    %22 = tpu.matmul %19, %21, %cst_18 {dimension_numbers = #tpu.dot_dimension_numbers<[1], [0], [0], [1], [0, 0, 1, 1], [], []>} : vector<256x8xbf16>, vector<8x128xbf16>, vector<256x128xf32> -> vector<256x128xf32>
    %23 = arith.addf %15, %22 : vector<256x128xf32>
    %c1_i32 = arith.constant 1 : i32
    %24 = arith.addi %0, %c1_i32 : i32
    %c0_19 = arith.constant 0 : index
    %25 = arith.index_cast %24 : i32 to index
    %c0_20 = arith.constant 0 : index
    %c0_21 = arith.constant 0 : index
    %26 = vector.load %arg2[%c0_19, %25, %c0_20, %c0_21] : memref<1x18x18x8xbf16, #tpu.memory_space<vmem>>, vector<1x16x16x8xbf16>
    %27 = vector.shape_cast %26 : vector<1x16x16x8xbf16> to vector<256x8xbf16>
    %c3 = arith.constant 3 : index
    %c0_22 = arith.constant 0 : index
    %c0_23 = arith.constant 0 : index
    %28 = vector.load %arg3[%c3, %c0_22, %c0_23] : memref<9x8x128xbf16, #tpu.memory_space<vmem>>, vector<1x8x128xbf16>
    %29 = vector.shape_cast %28 : vector<1x8x128xbf16> to vector<8x128xbf16>
    %cst_24 = arith.constant dense<0.000000e+00> : vector<256x128xf32>
    %30 = tpu.matmul %27, %29, %cst_24 {dimension_numbers = #tpu.dot_dimension_numbers<[1], [0], [0], [1], [0, 0, 1, 1], [], []>} : vector<256x8xbf16>, vector<8x128xbf16>, vector<256x128xf32> -> vector<256x128xf32>
    %31 = arith.addf %23, %30 : vector<256x128xf32>
    %c1_i32_25 = arith.constant 1 : i32
    %32 = arith.addi %0, %c1_i32_25 : i32
    %c0_26 = arith.constant 0 : index
    %33 = arith.index_cast %32 : i32 to index
    %c1_27 = arith.constant 1 : index
    %c0_28 = arith.constant 0 : index
    %34 = vector.load %arg2[%c0_26, %33, %c1_27, %c0_28] : memref<1x18x18x8xbf16, #tpu.memory_space<vmem>>, vector<1x16x16x8xbf16>
    %35 = vector.shape_cast %34 : vector<1x16x16x8xbf16> to vector<256x8xbf16>
    %c4 = arith.constant 4 : index
    %c0_29 = arith.constant 0 : index
    %c0_30 = arith.constant 0 : index
    %36 = vector.load %arg3[%c4, %c0_29, %c0_30] : memref<9x8x128xbf16, #tpu.memory_space<vmem>>, vector<1x8x128xbf16>
    %37 = vector.shape_cast %36 : vector<1x8x128xbf16> to vector<8x128xbf16>
    %cst_31 = arith.constant dense<0.000000e+00> : vector<256x128xf32>
    %38 = tpu.matmul %35, %37, %cst_31 {dimension_numbers = #tpu.dot_dimension_numbers<[1], [0], [0], [1], [0, 0, 1, 1], [], []>} : vector<256x8xbf16>, vector<8x128xbf16>, vector<256x128xf32> -> vector<256x128xf32>
    %39 = arith.addf %31, %38 : vector<256x128xf32>
    %c1_i32_32 = arith.constant 1 : i32
    %40 = arith.addi %0, %c1_i32_32 : i32
    %c0_33 = arith.constant 0 : index
    %41 = arith.index_cast %40 : i32 to index
    %c2_34 = arith.constant 2 : index
    %c0_35 = arith.constant 0 : index
    %42 = vector.load %arg2[%c0_33, %41, %c2_34, %c0_35] : memref<1x18x18x8xbf16, #tpu.memory_space<vmem>>, vector<1x16x16x8xbf16>
    %43 = vector.shape_cast %42 : vector<1x16x16x8xbf16> to vector<256x8xbf16>
    %c5 = arith.constant 5 : index
    %c0_36 = arith.constant 0 : index
    %c0_37 = arith.constant 0 : index
    %44 = vector.load %arg3[%c5, %c0_36, %c0_37] : memref<9x8x128xbf16, #tpu.memory_space<vmem>>, vector<1x8x128xbf16>
    %45 = vector.shape_cast %44 : vector<1x8x128xbf16> to vector<8x128xbf16>
    %cst_38 = arith.constant dense<0.000000e+00> : vector<256x128xf32>
    %46 = tpu.matmul %43, %45, %cst_38 {dimension_numbers = #tpu.dot_dimension_numbers<[1], [0], [0], [1], [0, 0, 1, 1], [], []>} : vector<256x8xbf16>, vector<8x128xbf16>, vector<256x128xf32> -> vector<256x128xf32>
    %47 = arith.addf %39, %46 : vector<256x128xf32>
    %c2_i32 = arith.constant 2 : i32
    %48 = arith.addi %0, %c2_i32 : i32
    %c0_39 = arith.constant 0 : index
    %49 = arith.index_cast %48 : i32 to index
    %c0_40 = arith.constant 0 : index
    %c0_41 = arith.constant 0 : index
    %50 = vector.load %arg2[%c0_39, %49, %c0_40, %c0_41] : memref<1x18x18x8xbf16, #tpu.memory_space<vmem>>, vector<1x16x16x8xbf16>
    %51 = vector.shape_cast %50 : vector<1x16x16x8xbf16> to vector<256x8xbf16>
    %c6 = arith.constant 6 : index
    %c0_42 = arith.constant 0 : index
    %c0_43 = arith.constant 0 : index
    %52 = vector.load %arg3[%c6, %c0_42, %c0_43] : memref<9x8x128xbf16, #tpu.memory_space<vmem>>, vector<1x8x128xbf16>
    %53 = vector.shape_cast %52 : vector<1x8x128xbf16> to vector<8x128xbf16>
    %cst_44 = arith.constant dense<0.000000e+00> : vector<256x128xf32>
    %54 = tpu.matmul %51, %53, %cst_44 {dimension_numbers = #tpu.dot_dimension_numbers<[1], [0], [0], [1], [0, 0, 1, 1], [], []>} : vector<256x8xbf16>, vector<8x128xbf16>, vector<256x128xf32> -> vector<256x128xf32>
    %55 = arith.addf %47, %54 : vector<256x128xf32>
    %c2_i32_45 = arith.constant 2 : i32
    %56 = arith.addi %0, %c2_i32_45 : i32
    %c0_46 = arith.constant 0 : index
    %57 = arith.index_cast %56 : i32 to index
    %c1_47 = arith.constant 1 : index
    %c0_48 = arith.constant 0 : index
    %58 = vector.load %arg2[%c0_46, %57, %c1_47, %c0_48] : memref<1x18x18x8xbf16, #tpu.memory_space<vmem>>, vector<1x16x16x8xbf16>
    %59 = vector.shape_cast %58 : vector<1x16x16x8xbf16> to vector<256x8xbf16>
    %c7 = arith.constant 7 : index
    %c0_49 = arith.constant 0 : index
    %c0_50 = arith.constant 0 : index
    %60 = vector.load %arg3[%c7, %c0_49, %c0_50] : memref<9x8x128xbf16, #tpu.memory_space<vmem>>, vector<1x8x128xbf16>
    %61 = vector.shape_cast %60 : vector<1x8x128xbf16> to vector<8x128xbf16>
    %cst_51 = arith.constant dense<0.000000e+00> : vector<256x128xf32>
    %62 = tpu.matmul %59, %61, %cst_51 {dimension_numbers = #tpu.dot_dimension_numbers<[1], [0], [0], [1], [0, 0, 1, 1], [], []>} : vector<256x8xbf16>, vector<8x128xbf16>, vector<256x128xf32> -> vector<256x128xf32>
    %63 = arith.addf %55, %62 : vector<256x128xf32>
    %c2_i32_52 = arith.constant 2 : i32
    %64 = arith.addi %0, %c2_i32_52 : i32
    %c0_53 = arith.constant 0 : index
    %65 = arith.index_cast %64 : i32 to index
    %c2_54 = arith.constant 2 : index
    %c0_55 = arith.constant 0 : index
    %66 = vector.load %arg2[%c0_53, %65, %c2_54, %c0_55] : memref<1x18x18x8xbf16, #tpu.memory_space<vmem>>, vector<1x16x16x8xbf16>
    %67 = vector.shape_cast %66 : vector<1x16x16x8xbf16> to vector<256x8xbf16>
    %c8 = arith.constant 8 : index
    %c0_56 = arith.constant 0 : index
    %c0_57 = arith.constant 0 : index
    %68 = vector.load %arg3[%c8, %c0_56, %c0_57] : memref<9x8x128xbf16, #tpu.memory_space<vmem>>, vector<1x8x128xbf16>
    %69 = vector.shape_cast %68 : vector<1x8x128xbf16> to vector<8x128xbf16>
    %cst_58 = arith.constant dense<0.000000e+00> : vector<256x128xf32>
    %70 = tpu.matmul %67, %69, %cst_58 {dimension_numbers = #tpu.dot_dimension_numbers<[1], [0], [0], [1], [0, 0, 1, 1], [], []>} : vector<256x8xbf16>, vector<8x128xbf16>, vector<256x128xf32> -> vector<256x128xf32>
    %71 = arith.addf %63, %70 : vector<256x128xf32>
    %c0_59 = arith.constant 0 : index
    %c0_60 = arith.constant 0 : index
    %72 = vector.load %arg4[%c0_59, %c0_60] : memref<1x128xf32, #tpu.memory_space<vmem>>, vector<1x128xf32>
    %73 = vector.broadcast %72 : vector<1x128xf32> to vector<256x128xf32>
    %74 = arith.mulf %71, %73 : vector<256x128xf32>
    %c0_61 = arith.constant 0 : index
    %c0_62 = arith.constant 0 : index
    %75 = vector.load %arg5[%c0_61, %c0_62] : memref<1x128xf32, #tpu.memory_space<vmem>>, vector<1x128xf32>
    %76 = vector.broadcast %75 : vector<1x128xf32> to vector<256x128xf32>
    %77 = arith.addf %74, %76 : vector<256x128xf32>
    %cst_63 = arith.constant 0.000000e+00 : f32
    %78 = vector.broadcast %cst_63 : f32 to vector<256x128xf32>
    %79 = arith.maximumf %77, %78 : vector<256x128xf32>
    %80 = vector.shape_cast %79 : vector<256x128xf32> to vector<1x16x16x128xf32>
    %c0_64 = arith.constant 0 : index
    %c0_65 = arith.constant 0 : index
    %c0_66 = arith.constant 0 : index
    %c0_67 = arith.constant 0 : index
    %81 = vector.load %arg6[%c0_64, %c0_65, %c0_66, %c0_67] : memref<1x16x16x128xf32, #tpu.memory_space<vmem>>, vector<1x16x16x128xf32>
    tpu.vector_store %arg6[%c0_64, %c0_65, %c0_66, %c0_67], %80 {strides = array<i32>} : memref<1x16x16x128xf32, #tpu.memory_space<vmem>>, vector<1x16x16x128xf32>,
    return
  }
  func.func @transform_0(%arg0: i32, %arg1: i32) -> (i32, i32, i32, i32) {
    %c0_i32 = arith.constant 0 : i32
    %c0_i32_0 = arith.constant 0 : i32
    %c0_i32_1 = arith.constant 0 : i32
    %c0_i32_2 = arith.constant 0 : i32
    return %arg0, %c0_i32, %c0_i32_0, %c0_i32_1 : i32, i32, i32, i32
  }
  func.func @transform_1(%arg0: i32, %arg1: i32) -> (i32, i32, i32) {
    %c0_i32 = arith.constant 0 : i32
    %c0_i32_0 = arith.constant 0 : i32
    %c0_i32_1 = arith.constant 0 : i32
    %c0_i32_2 = arith.constant 0 : i32
    return %c0_i32, %c0_i32_0, %c0_i32_1 : i32, i32, i32
  }
  func.func @transform_2(%arg0: i32, %arg1: i32) -> (i32, i32) {
    %c0_i32 = arith.constant 0 : i32
    %c0_i32_0 = arith.constant 0 : i32
    %c0_i32_1 = arith.constant 0 : i32
    return %c0_i32, %c0_i32_0 : i32, i32
  }
  func.func @transform_3(%arg0: i32, %arg1: i32) -> (i32, i32) {
    %c0_i32 = arith.constant 0 : i32
    %c0_i32_0 = arith.constant 0 : i32
    %c0_i32_1 = arith.constant 0 : i32
    return %c0_i32, %c0_i32_0 : i32, i32
  }
  func.func @transform_4(%arg0: i32, %arg1: i32) -> (i32, i32, i32, i32) {
    %c0_i32 = arith.constant 0 : i32
    %c0_i32_0 = arith.constant 0 : i32
    %c0_i32_1 = arith.constant 0 : i32
    return %arg0, %arg1, %c0_i32, %c0_i32_0 : i32, i32, i32, i32
  }
}

</mosaic_0001>

<bundles_post_ra>
// kernel: conv_bn_relu.1
= control target key start
LH: loop header
LB: loop body
LE: loop exit
PB: predicated region body
PF: predicated region fallthrough
CT: control target
= control target key end

     0   :  { %s6487_s15 = smov 0   ;;  %s6489_s16 = smov 0   ;;  %s8347_s0 = inlined_call_operand.vmem [shape: bf16[2,18,18,8], index: 0, kind: input, shape index: {}]   ;;  %s8348_s1 = inlined_call_operand.vmem [shape: bf16[9,8,128], index: 1, kind: input, shape index: {}]   ;;  %s8349_s2 = inlined_call_operand.vmem [shape: f32[1,128], index: 2, kind: input, shape index: {}]   ;;  %s8350_s3 = inlined_call_operand.vmem [shape: f32[1,128], index: 3, kind: input, shape index: {}]   ;;  %s8351_s4 = inlined_call_operand.vmem [shape: f32[2,16,16,128], index: 4, kind: output, shape index: {}]  }
   0x1   :  { %s6491_s17 = smov 0  }
   0x2 LB: > { %s26_s18 = sadd.s32 1, %s6456_s16  ;;  %p5036_p0 = scmp.ge.s32.totalorder %s6460_s17, 1  ;;  %s6460_s17 = sphi %s6491_s17, %s14_s17   ;;  %s6456_s16 = sphi %s6489_s16, %s8420_s16   ;;  %s6452_s15 = sphi %s6487_s15, %s8419_s15  }
   0x3   : > { %p28_p1 = scmp.ge.s32.totalorder %s26_s18, 2  ;;  %p176_p2 = scmp.lt.s32.totalorder %s6460_s17, 3 }
   0x5   : > { %s8422_s18 = smov (%p28_p1, %s26_s18), 0  ;;  %p177_p3 = pnand %p5036_p0, %p176_p2 }
   0x7   : > { %180 = sbr.rel (%p177_p3) target bundleno = 590 (0x24e), region = 36 }
   0xe   : > { %v5040_v0 = vld [vmem:[%s8348_s1 + $0x4] sm:$0xf]  ;;  %vm763_vm0 = vcmask 1043456   ;;  %v5267_v1 = vld [vmem:[%s8348_s1 + $0x10] sm:$0xf]  ;;  %p207_p4 = scmp.lt.s32.totalorder %s6452_s15, 1 }
   0xf   : > { %6298 = vmatprep.subr.msk.bf16.mxu1 %vm763_vm0, %v5040_v0  ;;  %6302 = vmatprep.subr.msk.bf16.mxu0 %vm763_vm0, %v5267_v1  ;;  %v765_v2 = vsel %vm763_vm0, %v5040_v0, 0  ;;  %v6515_v3 = vsel %vm763_vm0, %v5267_v1, 0  ;;  %v260_v4 = vld [vmem:[%s8348_s1] sm:$0xf]  ;;  %v5332_v5 = vld [vmem:[%s8348_s1 + $0x14] sm:$0xf] }
  0x10   : > { %8365 = vst [vmem:[#allocation2_spill] sm:$0xff] %v6515_v3  ;;  %5735 = vmatpush3.bf16.msra.mxu1 %v765_v2  ;;  %5871 = vmatpush3.bf16.msra.mxu0 %v6515_v3  ;;  %s8424_s15 = smov (!%p207_p4, %s6452_s15), 1  ;;  %vm277_vm1 = vsmask.f32 3328  ;;  %vm278_vm2 = vsmask.f32 7440 }
  0x11   : > { %6299 = vmatprep.subr.msk.bf16.mxu1 %vm763_vm0, %v260_v4  ;;  %6304 = vmatprep.subr.msk.bf16.mxu0 %vm763_vm0, %v5332_v5  ;;  %s6308_s27 = smul.u32 216, %s8424_s15  ;;  %vm714_vm3 = vcmask 64512   ;;  %v6545_v17 = vsel %vm763_vm0, %v260_v4, 0  ;;  %v6551_v26 = vld [vmem:[%s8348_s1 + $0x18] sm:$0xf]  ;;  %vm6558_vm4 = vmor %vm277_vm1, %vm278_vm2  ;;  %v6564_v37 = vsel %vm763_vm0, %v5332_v5, 0 }
  0x12   : > { %v6568_v41 = vsel %vm763_vm0, %v6551_v26, 0  ;;  %vm1268_vm5 = vcmask 1042432   ;;  %vm1269_vm6 = vcmask 1046532  }
  0x13   : > { %s6532_s30 = scalar_lea.vmem %s8347_s0, %s6308_s27  ;;  %vm6784_vm7 = vmor %vm1268_vm5, %vm1269_vm6  ;;  %s5580_s27 = sshll.u32 %s8424_s15, 8 }
  0x14   : > { %v228_v6 = vld [vmem:[%s6532_s30] sm:$0xf]  ;;  %v229_v7 = vld [vmem:[%s6532_s30 + $0x4] sm:$0xf]  ;;  %v261_v8 = vld [vmem:[%s6532_s30 + $0x8] sm:$0x1] }
  0x15   : > { %v281_v9 = vshrl.u32 %v228_v6, 16  ;;  %v284_v10 = vshll.u32 %v228_v6, 16  ;;  %v290_v11 = vshll.u32 %v229_v7, 16  ;;  %v294_v12 = vshrl.u32 %v229_v7, 16  ;;  %v5219_v13 = vld [vmem:[%s6532_s30 + $0xc] sm:$0xf] }
  0x16   : > { %v300_v14 = vshll.u32 %v261_v8, 16  ;;  %v6539_v15 = vld [vmem:[%s6532_s30 + $0x10] sm:$0xf]  ;;  %v6542_v16 = vld [vmem:[%s6532_s30 + $0x14] sm:$0x1]  ;;  %v2088_v23 = vshrl.u32 %v5219_v13, 16 }
  0x17   : > { %v283_v18 = vrot.slane %v281_v9, 4  ;;  %v286_v19 = vrot.slane %v284_v10, 5  ;;  %v292_v20 = vrot.slane %v290_v11, 5  ;;  %v296_v21 = vrot.slane %v294_v12, 4  ;;  %v230_v31 = vld [vmem:[%s6532_s30 + $0xc] sm:$0xf] }
  0x18   : > { %v302_v22 = vrot.slane %v300_v14, 5  ;;  %v2091_v24 = vshll.u32 %v5219_v13, 16  ;;  %v2097_v25 = vshll.u32 %v6539_v15, 16  ;;  %v2101_v29 = vshrl.u32 %v6539_v15, 16  ;;  %v231_v36 = vld [vmem:[%s6532_s30 + $0x10] sm:$0xf] }
  0x19   : > { %v287_v27 = vor.u32 %v286_v19, %v283_v18  ;;  %v297_v28 = vor.u32 %v296_v21, %v292_v20  ;;  %v2107_v30 = vshll.u32 %v6542_v16, 16  ;;  %v2090_v33 = vrot.slane %v2088_v23, 4  ;;  %v262_v44 = vld [vmem:[%s6532_s30 + $0x14] sm:$0x1]  ;;  %v5222_v55 = vld [vmem:[%s6532_s30 + $0x18] sm:$0xf] }
  0x1a   : > { %v2093_v34 = vrot.slane %v2091_v24, 5  ;;  %v2099_v35 = vrot.slane %v2097_v25, 5  ;;  %v2103_v40 = vrot.slane %v2101_v29, 4  ;;  %v305_v45 = vshrl.u32 %v230_v31, 16  ;;  %v6577_v60 = vld [vmem:[%s6532_s30 + $0x1c] sm:$0xf] }
  0x1b   : > { %v288_v38 = vrot.slane %v287_v27, 4  ;;  %v298_v39 = vrot.slane %v297_v28, 4  ;;  %v2109_v43 = vrot.slane %v2107_v30, 5  ;;  %v308_v46 = vshll.u32 %v230_v31, 16  ;;  %v6585_v1 = vld [vmem:[%s6532_s30 + $0x20] sm:$0x1] }
  0x1c   : > { %v2094_v42 = vor.u32 %v2093_v34, %v2090_v33  ;;  %v2104_v49 = vor.u32 %v2103_v40, %v2099_v35  ;;  %v314_v50 = vshll.u32 %v231_v36, 16  ;;  %v307_v53 = vrot.slane %v305_v45, 4  ;;  %v232_v18 = vld [vmem:[%s6532_s30 + $0x18] sm:$0xf]  ;;  %v233_v23 = vld [vmem:[%s6532_s30 + $0x1c] sm:$0xf] }
  0x1d   : > { %v293_v47 = vsel %vm6558_vm4, %v288_v38, %v292_v20  ;;  %v303_v48 = vsel %vm6558_vm4, %v298_v39, %v302_v22  ;;  %v310_v54 = vrot.slane %v308_v46, 5  ;;  %v318_v58 = vshrl.u32 %v231_v36, 16  ;;  %v263_v31 = vld [vmem:[%s6532_s30 + $0x20] sm:$0x1]  ;;  %v5225_v40 = vld [vmem:[%s6532_s30 + $0x24] sm:$0xf] }
  0x1e   : > { %v5041_v51 = vcombine.low %v293_v47, %v303_v48  ;;  %v2095_v52 = vrot.slane %v2094_v42, 4  ;;  %v2105_v56 = vrot.slane %v2104_v49, 4  ;;  %v316_v57 = vrot.slane %v314_v50, 5  ;;  %v6608_v46 = vld [vmem:[%s6532_s30 + $0x28] sm:$0xf] }
  0x1f   : > { %v324_v59 = vshll.u32 %v262_v44, 16  ;;  %v2831_v62 = vrot.slane %v6539_v15, 5  ;;  %v2834_v63 = vrot.slane %v6542_v16, 5  ;;  %v311_v0 = vor.u32 %v310_v54, %v307_v53  ;;  %v6617_v54 = vld [vmem:[%s6532_s30 + $0x2c] sm:$0x1] }
  0x20   : > { %5736 = vmatprep.mubr.msk.bf16.mxu1 %vm714_vm3, %v5041_v51  ;;  %v2100_v61 = vsel %vm6558_vm4, %v2095_v52, %v2099_v35  ;;  %v2110_v2 = vsel %vm6558_vm4, %v2105_v56, %v2109_v43  ;;  %v320_v4 = vrot.slane %v318_v58, 4  ;;  %v2112_v6 = vshrl.u32 %v5222_v55, 16  ;;  %v5121_v51 = vld [vmem:[%s8348_s1 + $0x8] sm:$0xf]  ;;  %v6817_v16 = vld [vmem:[%s6532_s30 + $0x7c] sm:$0xf] }
  0x21   : > { %v326_v5 = vrot.slane %v324_v59, 5  ;;  %v5268_v7 = vcombine.low %v2100_v61, %v2110_v2  ;;  %v312_v8 = vrot.slane %v311_v0, 4  ;;  %v2115_v9 = vshll.u32 %v5222_v55, 16  ;;  %v234_v0 = vld [vmem:[%s6532_s30 + $0x24] sm:$0xf] }
  0x22   : > { %v2121_v10 = vshll.u32 %v6577_v60, 16  ;;  %v321_v11 = vor.u32 %v320_v4, %v316_v57  ;;  %v2114_v12 = vrot.slane %v2112_v6, 4  ;;  %v2125_v13 = vshrl.u32 %v6577_v60, 16 }
  0x23   : > { %v2131_v14 = vshll.u32 %v6585_v1, 16  ;;  %5872 = vmatprep.mubr.msk.bf16.mxu0 %vm714_vm3, %v5268_v7  ;;  %v317_v19 = vsel %vm6558_vm4, %v312_v8, %v316_v57  ;;  %v2117_v20 = vrot.slane %v2115_v9, 5  ;;  %v2838_v22 = vrot.slane %v6577_v60, 5  ;;  %v235_v7 = vld [vmem:[%s6532_s30 + $0x28] sm:$0xf] }
  0x24   : > { %v2123_v21 = vrot.slane %v2121_v10, 5  ;;  %v322_v24 = vrot.slane %v321_v11, 4  ;;  %v2127_v25 = vrot.slane %v2125_v13, 4  ;;  %v2841_v28 = vrot.slane %v6585_v1, 5  ;;  %v264_v13 = vld [vmem:[%s6532_s30 + $0x2c] sm:$0x1] }
  0x25   : > { %v2133_v27 = vrot.slane %v2131_v14, 5  ;;  %v2118_v29 = vor.u32 %v2117_v20, %v2114_v12  ;;  %v6601_v30 = vrot.slane %v2838_v22, 4  ;;  %v329_v33 = vshrl.u32 %v232_v18, 16 }
  0x26   : > { %v332_v34 = vshll.u32 %v232_v18, 16  ;;  %v327_v35 = vsel %vm6558_vm4, %v322_v24, %v326_v5  ;;  %v2128_v36 = vor.u32 %v2127_v25, %v2123_v21  ;;  %v338_v38 = vshll.u32 %v233_v23, 16  ;;  %v5228_v24 = vld [vmem:[%s6532_s30 + $0x30] sm:$0xf] }
  0x27   : > { %v342_v39 = vshrl.u32 %v233_v23, 16  ;;  %v5042_v42 = vcombine.low %v317_v19, %v327_v35  ;;  %v2119_v43 = vrot.slane %v2118_v29, 4  ;;  %v331_v44 = vrot.slane %v329_v33, 4  ;;  %v6637_v33 = vld [vmem:[%s6532_s30 + $0x34] sm:$0xf] }
  0x28   : > { %v334_v45 = vrot.slane %v332_v34, 5  ;;  %v2129_v47 = vrot.slane %v2128_v36, 4  ;;  %v340_v48 = vrot.slane %v338_v38, 5  ;;  %v348_v50 = vshll.u32 %v263_v31, 16 }
  0x29   : > { %v344_v49 = vrot.slane %v342_v39, 4  ;;  %5737 = vmatmul.mubr.msk.bf16.vlgmr.msra.gmra.mrb[0].mxu1 %vm714_vm3, %v5042_v42  ;;  %v2124_v52 = vsel %vm6558_vm4, %v2119_v43, %v2123_v21  ;;  %v2136_v55 = vshrl.u32 %v5225_v40, 16  ;;  %v2139_v56 = vshll.u32 %v5225_v40, 16  ;;  %v6645_v40 = vld [vmem:[%s6532_s30 + $0x38] sm:$0x1] }
  0x2a   : > { %v335_v53 = vor.u32 %v334_v45, %v331_v44  ;;  %5769 = vmatpush3.bf16.msra.mxu1 %v6545_v17  ;;  %v2134_v57 = vsel %vm6558_vm4, %v2129_v47, %v2133_v27  ;;  %v350_v59 = vrot.slane %v348_v50, 5  ;;  %v2145_v61 = vshll.u32 %v6608_v46, 16 }
  0x2b   : > { %v345_v58 = vor.u32 %v344_v49, %v340_v48  ;;  %v5269_v2 = vcombine.low %v2124_v52, %v2134_v57  ;;  %v2138_v5 = vrot.slane %v2136_v55, 4  ;;  %v2141_v6 = vrot.slane %v2139_v56, 5  ;;  %6300 = vmatprep.subr.msk.bf16.mxu1 %vm763_vm0, %v5121_v51  ;;  %v236_v52 = vld [vmem:[%s6532_s30 + $0x30] sm:$0xf] }
  0x2c   : > { %v336_v4 = vrot.slane %v335_v53, 4  ;;  %v2147_v9 = vrot.slane %v2145_v61, 5  ;;  %v2149_v17 = vshrl.u32 %v6608_v46, 16  ;;  %v2155_v10 = vshll.u32 %v6617_v54, 16 }
  0x2d   : > { %v346_v8 = vrot.slane %v345_v58, 4  ;;  %5873 = vmatmul.mubr.msk.bf16.vlgmr.msra.gmra.mrb[0].mxu0 %vm714_vm3, %v5269_v2  ;;  %v2142_v12 = vor.u32 %v2141_v6, %v2138_v5  ;;  %v353_v14 = vshrl.u32 %v234_v0, 16  ;;  %v356_v18 = vshll.u32 %v234_v0, 16  ;;  %v237_v58 = vld [vmem:[%s6532_s30 + $0x34] sm:$0xf] }
  0x2e   : > { %v341_v11 = vsel %vm6558_vm4, %v336_v4, %v340_v48  ;;  %5905 = vmatpush3.bf16.msra.mxu0 %v6564_v37  ;;  %v2151_v20 = vrot.slane %v2149_v17, 4  ;;  %v2157_v21 = vrot.slane %v2155_v10, 5  ;;  %v362_v23 = vshll.u32 %v235_v7, 16  ;;  %v265_v4 = vld [vmem:[%s6532_s30 + $0x38] sm:$0x1] }
  0x2f   : > { %v351_v19 = vsel %vm6558_vm4, %v346_v8, %v350_v59  ;;  %v2143_v27 = vrot.slane %v2142_v12, 4  ;;  %v355_v29 = vrot.slane %v353_v14, 4  ;;  %v358_v31 = vrot.slane %v356_v18, 5  ;;  %6305 = vmatprep.subr.msk.bf16.mxu0 %vm763_vm0, %v6551_v26  ;;  %v5231_v12 = vld [vmem:[%s6532_s30 + $0x3c] sm:$0xf] }
  0x30   : > { %v5043_v25 = vcombine.low %v341_v11, %v351_v19  ;;  %v2152_v34 = vor.u32 %v2151_v20, %v2147_v9  ;;  %v364_v35 = vrot.slane %v362_v23, 5  ;;  %v366_v37 = vshrl.u32 %v235_v7, 16  ;;  %v6662_v20 = vld [vmem:[%s6532_s30 + $0x40] sm:$0xf] }
  0x31   : > { %v372_v36 = vshll.u32 %v264_v13, 16  ;;  %v2148_v38 = vsel %vm6558_vm4, %v2143_v27, %v2147_v9  ;;  %v359_v39 = vor.u32 %v358_v31, %v355_v29  ;;  %v2160_v42 = vshrl.u32 %v5228_v24, 16 }
  0x32   : > { %5740 = vmatprep.mubr.msk.bf16.mxu1 %vm714_vm3, %v5043_v25  ;;  %v2163_v43 = vshll.u32 %v5228_v24, 16  ;;  %v2153_v44 = vrot.slane %v2152_v34, 4  ;;  %v368_v45 = vrot.slane %v366_v37, 4  ;;  %v2169_v26 = vshll.u32 %v6637_v33, 16  ;;  %v6667_v34 = vld [vmem:[%s6532_s30 + $0x44] sm:$0x1] }
  0x33   : > { %v374_v47 = vrot.slane %v372_v36, 5  ;;  %v360_v48 = vrot.slane %v359_v39, 4  ;;  %v2162_v49 = vrot.slane %v2160_v42, 4  ;;  %v2173_v51 = vshrl.u32 %v6637_v33, 16  ;;  %v238_v42 = vld [vmem:[%s6532_s30 + $0x3c] sm:$0xf] }
  0x34   : > { %v2165_v50 = vrot.slane %v2163_v43, 5  ;;  %v2158_v53 = vsel %vm6558_vm4, %v2153_v44, %v2157_v21  ;;  %v369_v55 = vor.u32 %v368_v45, %v364_v35  ;;  %v2171_v56 = vrot.slane %v2169_v26, 5  ;;  %v239_v26 = vld [vmem:[%s6532_s30 + $0x40] sm:$0xf] }
  0x35   : > { %v2179_v57 = vshll.u32 %v6645_v40, 16  ;;  %v5270_v59 = vcombine.low %v2148_v38, %v2158_v53  ;;  %v365_v61 = vsel %vm6558_vm4, %v360_v48, %v364_v35  ;;  %v2175_v2 = vrot.slane %v2173_v51, 4 }
  0x36   : > { %v2166_v0 = vor.u32 %v2165_v50, %v2162_v49  ;;  %v370_v5 = vrot.slane %v369_v55, 4  ;;  %v377_v7 = vshrl.u32 %v236_v52, 16  ;;  %v380_v8 = vshll.u32 %v236_v52, 16 }
  0x37   : > { %v2181_v6 = vrot.slane %v2179_v57, 5  ;;  %5876 = vmatprep.mubr.msk.bf16.mxu0 %vm714_vm3, %v5270_v59  ;;  %v2176_v17 = vor.u32 %v2175_v2, %v2171_v56  ;;  %v386_v10 = vshll.u32 %v237_v58, 16  ;;  %v390_v11 = vshrl.u32 %v237_v58, 16  ;;  %v5234_v2 = vld [vmem:[%s6532_s30 + $0x48] sm:$0xf] }
  0x38   : > { %v2167_v9 = vrot.slane %v2166_v0, 4  ;;  %v375_v13 = vsel %vm6558_vm4, %v370_v5, %v374_v47  ;;  %v379_v14 = vrot.slane %v377_v7, 4  ;;  %v382_v18 = vrot.slane %v380_v8, 5  ;;  %v6685_v8 = vld [vmem:[%s6532_s30 + $0x4c] sm:$0xf] }
  0x39   : > { %v396_v19 = vshll.u32 %v265_v4, 16  ;;  %v5044_v21 = vcombine.low %v365_v61, %v375_v13  ;;  %v2177_v24 = vrot.slane %v2176_v17, 4  ;;  %v388_v25 = vrot.slane %v386_v10, 5  ;;  %v266_v61 = vld [vmem:[%s6532_s30 + $0x44] sm:$0x1] }
  0x3a   : > { %v2172_v23 = vsel %vm6558_vm4, %v2167_v9, %v2171_v56  ;;  %v383_v27 = vor.u32 %v382_v18, %v379_v14  ;;  %v392_v29 = vrot.slane %v390_v11, 4  ;;  %v2184_v35 = vshrl.u32 %v5231_v12, 16 }
  0x3b   : > { %v398_v31 = vrot.slane %v396_v19, 5  ;;  %5741 = vmatmul.mubr.msk.bf16.gmra.mrb[4].mxu1 %vm714_vm3, %v5044_v21  ;;  %v2182_v37 = vsel %vm6558_vm4, %v2177_v24, %v2181_v6  ;;  %v2187_v36 = vshll.u32 %v5231_v12, 16  ;;  %v2193_v38 = vshll.u32 %v6662_v20, 16 }
  0x3c   : > { %v2197_v39 = vshrl.u32 %v6662_v20, 16  ;;  %v5271_v43 = vcombine.low %v2172_v23, %v2182_v37  ;;  %v384_v44 = vrot.slane %v383_v27, 4  ;;  %v393_v45 = vor.u32 %v392_v29, %v388_v25  ;;  %v6693_v23 = vld [vmem:[%s6532_s30 + $0x50] sm:$0x1]  ;;  %v6697_v27 = vld [vmem:[%s6532_s30 + $0x48] sm:$0xf] }
  0x3d   : > { %v2186_v47 = vrot.slane %v2184_v35, 4  ;;  %v2189_v48 = vrot.slane %v2187_v36, 5  ;;  %v2195_v49 = vrot.slane %v2193_v38, 5  ;;  %v2203_v51 = vshll.u32 %v6667_v34, 16  ;;  %v6700_v36 = vld [vmem:[%s6532_s30 + $0x4c] sm:$0xf] }
  0x3e   : > { %v2199_v50 = vrot.slane %v2197_v39, 4  ;;  %5877 = vmatmul.mubr.msk.bf16.gmra.mrb[4].mxu0 %vm714_vm3, %v5271_v43  ;;  %v389_v52 = vsel %vm6558_vm4, %v384_v44, %v388_v25  ;;  %v394_v53 = vrot.slane %v393_v45, 4  ;;  %v401_v55 = vshrl.u32 %v238_v42, 16 }
  0x3f   : > { %v404_v56 = vshll.u32 %v238_v42, 16  ;;  %v2190_v57 = vor.u32 %v2189_v48, %v2186_v47  ;;  %v2205_v59 = vrot.slane %v2203_v51, 5  ;;  %v410_v0 = vshll.u32 %v239_v26, 16 }
  0x40   : > { %v2200_v58 = vor.u32 %v2199_v50, %v2195_v49  ;;  %v399_v4 = vsel %vm6558_vm4, %v394_v53, %v398_v31  ;;  %v403_v5 = vrot.slane %v401_v55, 4  ;;  %v414_v7 = vshrl.u32 %v239_v26, 16  ;;  %v267_v26 = vld [vmem:[%s6532_s30 + $0x50] sm:$0x1]  ;;  %v5237_v53 = vld [vmem:[%s6532_s30 + $0x54] sm:$0xf] }
  0x41   : > { %v406_v6 = vrot.slane %v404_v56, 5  ;;  %v5045_v9 = vcombine.low %v389_v52, %v399_v4  ;;  %v2191_v17 = vrot.slane %v2190_v57, 4  ;;  %v412_v11 = vrot.slane %v410_v0, 5  ;;  %v6716_v4 = vld [vmem:[%s6532_s30 + $0x58] sm:$0xf] }
  0x42   : > { %v2201_v10 = vrot.slane %v2200_v58, 4  ;;  %v416_v13 = vrot.slane %v414_v7, 4  ;;  %v420_v14 = vshll.u32 %v266_v61, 16  ;;  %v2208_v18 = vshrl.u32 %v5234_v2, 16 }
  0x43   : > { %v407_v12 = vor.u32 %v406_v6, %v403_v5  ;;  %5744 = vmatprep.mubr.msk.bf16.mxu1 %vm714_vm3, %v5045_v9  ;;  %v2196_v19 = vsel %vm6558_vm4, %v2191_v17, %v2195_v49  ;;  %v2211_v24 = vshll.u32 %v5234_v2, 16  ;;  %v2217_v25 = vshll.u32 %v6685_v8, 16 }
  0x44   : > { %v2206_v21 = vsel %vm6558_vm4, %v2201_v10, %v2205_v59  ;;  %v417_v35 = vor.u32 %v416_v13, %v412_v11  ;;  %v422_v37 = vrot.slane %v420_v14, 5  ;;  %v2210_v38 = vrot.slane %v2208_v18, 4 }
  0x45   : > { %v5272_v29 = vcombine.low %v2196_v19, %v2206_v21  ;;  %v408_v31 = vrot.slane %v407_v12, 4  ;;  %v2213_v39 = vrot.slane %v2211_v24, 5  ;;  %v2219_v42 = vrot.slane %v2217_v25, 5  ;;  %v6722_v12 = vld [vmem:[%s6532_s30 + $0x5c] sm:$0x1] }
  0x46   : > { %v2221_v43 = vshrl.u32 %v6685_v8, 16  ;;  %v418_v45 = vrot.slane %v417_v35, 4  ;;  %v2227_v47 = vshll.u32 %v6693_v23, 16  ;;  %v425_v48 = vshrl.u32 %v6697_v27, 16  ;;  %v6726_v24 = vld [vmem:[%s6532_s30 + $0x54] sm:$0xf] }
  0x47   : > { %5880 = vmatprep.mubr.msk.bf16.mxu0 %vm714_vm3, %v5272_v29  ;;  %v413_v44 = vsel %vm6558_vm4, %v408_v31, %v412_v11  ;;  %v2214_v49 = vor.u32 %v2213_v39, %v2210_v38  ;;  %v428_v51 = vshll.u32 %v6697_v27, 16  ;;  %v434_v52 = vshll.u32 %v6700_v36, 16 }
  0x48   : > { %v2223_v50 = vrot.slane %v2221_v43, 4  ;;  %v423_v55 = vsel %vm6558_vm4, %v418_v45, %v422_v37  ;;  %v2229_v56 = vrot.slane %v2227_v47, 5  ;;  %v427_v57 = vrot.slane %v425_v48, 4  ;;  %v6732_v37 = vld [vmem:[%s6532_s30 + $0x58] sm:$0xf] }
  0x49   : > { %v438_v58 = vshrl.u32 %v6700_v36, 16  ;;  %v5046_v59 = vcombine.low %v413_v44, %v423_v55  ;;  %v2215_v61 = vrot.slane %v2214_v49, 4  ;;  %v430_v2 = vrot.slane %v428_v51, 5 }
  0x4a   : > { %v2224_v0 = vor.u32 %v2223_v50, %v2219_v42  ;;  %v436_v5 = vrot.slane %v434_v52, 5  ;;  %v444_v7 = vshll.u32 %v267_v26, 16  ;;  %v2232_v9 = vshrl.u32 %v5237_v53, 16  ;;  %v268_v26 = vld [vmem:[%s6532_s30 + $0x5c] sm:$0x1] }
  0x4b   : > { %v440_v6 = vrot.slane %v438_v58, 4  ;;  %5745 = vmatmul.mubr.msk.bf16.gmra.mrb[8].mxu1 %vm714_vm3, %v5046_v59  ;;  %v2220_v17 = vsel %vm6558_vm4, %v2215_v61, %v2219_v42  ;;  %v431_v11 = vor.u32 %v430_v2, %v427_v57  ;;  %v2235_v13 = vshll.u32 %v5237_v53, 16  ;;  %v5240_v53 = vld [vmem:[%s6532_s30 + $0x60] sm:$0xf]  ;;  %v6746_v59 = vld [vmem:[%s6532_s30 + $0x64] sm:$0xf] }
  0x4c   : > { %v2225_v10 = vrot.slane %v2224_v0, 4  ;;  %v446_v18 = vrot.slane %v444_v7, 5  ;;  %v2234_v19 = vrot.slane %v2232_v9, 4  ;;  %v2241_v21 = vshll.u32 %v6716_v4, 16  ;;  %v6753_v9 = vld [vmem:[%s6532_s30 + $0x68] sm:$0x1] }
  0x4d   : > { %v441_v14 = vor.u32 %v440_v6, %v436_v5  ;;  %v432_v29 = vrot.slane %v431_v11, 4  ;;  %v2237_v31 = vrot.slane %v2235_v13, 5  ;;  %v2245_v35 = vshrl.u32 %v6716_v4, 16 }
  0x4e   : > { %v2230_v25 = vsel %vm6558_vm4, %v2225_v10, %v2229_v56  ;;  %v2243_v42 = vrot.slane %v2241_v21, 5  ;;  %v2251_v43 = vshll.u32 %v6722_v12, 16  ;;  %v449_v48 = vshrl.u32 %v6726_v24, 16 }
  0x4f   : > { %v5273_v38 = vcombine.low %v2220_v17, %v2230_v25  ;;  %v442_v39 = vrot.slane %v441_v14, 4  ;;  %v437_v44 = vsel %vm6558_vm4, %v432_v29, %v436_v5  ;;  %v2238_v45 = vor.u32 %v2237_v31, %v2234_v19  ;;  %v6757_v19 = vld [vmem:[%s6532_s30 + $0x60] sm:$0xf] }
  0x50   : > { %v2247_v47 = vrot.slane %v2245_v35, 4  ;;  %v2253_v50 = vrot.slane %v2251_v43, 5  ;;  %v452_v51 = vshll.u32 %v6726_v24, 16  ;;  %v458_v52 = vshll.u32 %v6732_v37, 16  ;;  %v6763_v35 = vld [vmem:[%s6532_s30 + $0x64] sm:$0xf] }
  0x51   : > { %5881 = vmatmul.mubr.msk.bf16.gmra.mrb[8].mxu0 %vm714_vm3, %v5273_v38  ;;  %v447_v49 = vsel %vm6558_vm4, %v442_v39, %v446_v18  ;;  %v2239_v56 = vrot.slane %v2238_v45, 4  ;;  %v451_v58 = vrot.slane %v449_v48, 4  ;;  %v462_v2 = vshrl.u32 %v6732_v37, 16 }
  0x52   : > { %v5047_v55 = vcombine.low %v437_v44, %v447_v49  ;;  %v2248_v57 = vor.u32 %v2247_v47, %v2243_v42  ;;  %v454_v61 = vrot.slane %v452_v51, 5  ;;  %v460_v0 = vrot.slane %v458_v52, 5 }
  0x53   : > { %v468_v5 = vshll.u32 %v268_v26, 16  ;;  %v2244_v6 = vsel %vm6558_vm4, %v2239_v56, %v2243_v42  ;;  %v2256_v17 = vshrl.u32 %v5240_v53, 16  ;;  %v2259_v10 = vshll.u32 %v5240_v53, 16 }
  0x54   : > { %5748 = vmatprep.mubr.msk.bf16.mxu1 %vm714_vm3, %v5047_v55  ;;  %v2249_v7 = vrot.slane %v2248_v57, 4  ;;  %v455_v11 = vor.u32 %v454_v61, %v451_v58  ;;  %v464_v13 = vrot.slane %v462_v2, 4  ;;  %v2265_v18 = vshll.u32 %v6746_v59, 16  ;;  %v5300_v58 = vld [vmem:[%s6532_s30 + $0xc] sm:$0xe] }
  0x55   : > { %v470_v14 = vrot.slane %v468_v5, 5  ;;  %v2258_v25 = vrot.slane %v2256_v17, 4  ;;  %v2261_v29 = vrot.slane %v2259_v10, 5  ;;  %v2269_v31 = vshrl.u32 %v6746_v59, 16 }
  0x56   : > { %v2254_v21 = vsel %vm6558_vm4, %v2249_v7, %v2253_v50  ;;  %v456_v39 = vrot.slane %v455_v11, 4  ;;  %v465_v42 = vor.u32 %v464_v13, %v460_v0  ;;  %v2267_v43 = vrot.slane %v2265_v18, 5  ;;  %v269_v50 = vld [vmem:[%s6532_s30 + $0x68] sm:$0x1] }
  0x57   : > { %v5274_v38 = vcombine.low %v2244_v6, %v2254_v21  ;;  %v2262_v44 = vor.u32 %v2261_v29, %v2258_v25  ;;  %v2271_v45 = vrot.slane %v2269_v31, 4  ;;  %v2275_v47 = vshll.u32 %v6753_v9, 16  ;;  %v6791_v29 = vld [vmem:[%s6532_s30 + $0x70] sm:$0xf] }
  0x58   : > { %v473_v26 = vshrl.u32 %v6757_v19, 16  ;;  %v461_v48 = vsel %vm6558_vm4, %v456_v39, %v460_v0  ;;  %v466_v49 = vrot.slane %v465_v42, 4  ;;  %v476_v51 = vshll.u32 %v6757_v19, 16  ;;  %v6778_v0 = vld [vmem:[%s6532_s30 + $0x6c] sm:$0xf] }
  0x59   : > { %5884 = vmatprep.mubr.msk.bf16.mxu0 %vm714_vm3, %v5274_v38  ;;  %v482_v52 = vshll.u32 %v6763_v35, 16  ;;  %v2263_v53 = vrot.slane %v2262_v44, 4  ;;  %v2272_v55 = vor.u32 %v2271_v45, %v2267_v43  ;;  %v2277_v56 = vrot.slane %v2275_v47, 5 }
  0x5a   : > { %v475_v57 = vrot.slane %v473_v26, 4  ;;  %v471_v61 = vsel %vm6558_vm4, %v466_v49, %v470_v14  ;;  %v478_v2 = vrot.slane %v476_v51, 5  ;;  %v486_v6 = vshrl.u32 %v6763_v35, 16  ;;  %v270_v26 = vld [vmem:[%s6532_s30 + $0x74] sm:$0x1] }
  0x5b   : > { %v484_v5 = vrot.slane %v482_v52, 5  ;;  %v5048_v7 = vcombine.low %v461_v48, %v471_v61  ;;  %v2268_v17 = vsel %vm6558_vm4, %v2263_v53, %v2267_v43  ;;  %v2273_v10 = vrot.slane %v2272_v55, 4  ;;  %v5301_v48 = vld [vmem:[%s6532_s30 + $0x18] sm:$0xe] }
  0x5c   : > { %v492_v11 = vshll.u32 %v269_v50, 16  ;;  %v479_v14 = vor.u32 %v478_v2, %v475_v57  ;;  %v488_v18 = vrot.slane %v486_v6, 4  ;;  %v5316_v21 = vrot.slane %v5300_v58, 9  ;;  %v6810_v53 = vld [vmem:[%s6532_s30 + $0x78] sm:$0xf] }
  0x5d   : > { %v2833_v25 = vrot.slane %v2831_v62, 4  ;;  %5749 = vmatmul.mubr.msk.bf16.gmra.mrb[12].mxu1 %vm714_vm3, %v5048_v7  ;;  %v2278_v31 = vsel %vm6558_vm4, %v2273_v10, %v2277_v56  ;;  %v497_v39 = vshrl.u32 %v6778_v0, 16  ;;  %v500_v42 = vshll.u32 %v6778_v0, 16  ;;  %v271_v57 = vld [vmem:[%s6532_s30 + $0x80] sm:$0x1] }
  0x5e   : > { %v494_v38 = vrot.slane %v492_v11, 5  ;;  %v5275_v43 = vcombine.low %v2268_v17, %v2278_v31  ;;  %v480_v44 = vrot.slane %v479_v14, 4  ;;  %v489_v45 = vor.u32 %v488_v18, %v484_v5  ;;  %v5302_v10 = vld [vmem:[%s6532_s30 + $0x24] sm:$0xe] }
  0x5f   : > { %v2832_v47 = vsel %vm6784_vm7, %v5316_v21, %v2831_v62  ;;  %v2835_v49 = vsel %vm6784_vm7, %v2833_v25, %v2834_v63  ;;  %v499_v50 = vrot.slane %v497_v39, 4  ;;  %v502_v51 = vrot.slane %v500_v42, 5  ;;  %v6836_v39 = vld [vmem:[%s6532_s30 + $0x84] sm:$0xf] }
  0x60   : > { %v506_v52 = vshll.u32 %v6791_v29, 16  ;;  %5885 = vmatmul.mubr.msk.bf16.gmra.mrb[12].mxu0 %vm714_vm3, %v5275_v43  ;;  %v485_v15 = vsel %vm6558_vm4, %v480_v44, %v484_v5  ;;  %v490_v62 = vrot.slane %v489_v45, 4  ;;  %v5333_v55 = vcombine.low %v2832_v47, %v2835_v49  ;;  %v6844_v43 = vld [vmem:[%s6532_s30 + $0x88] sm:$0xf] }
  0x61   : > { %v510_v56 = vshrl.u32 %v6791_v29, 16  ;;  %v503_v63 = vor.u32 %v502_v51, %v499_v50  ;;  %v516_v61 = vshll.u32 %v270_v26, 16  ;;  %v5317_v2 = vrot.slane %v5301_v48, 9 }
  0x62   : > { %v508_v58 = vrot.slane %v506_v52, 5  ;;  %v495_v6 = vsel %vm6558_vm4, %v490_v62, %v494_v38  ;;  %5906 = vmatprep.mubr.msk.bf16.mxu0 %vm714_vm3, %v5333_v55  ;;  %v2842_v5 = vsel %vm6784_vm7, %v6601_v30, %v2841_v28  ;;  %v521_v17 = vshrl.u32 %v6810_v53, 16  ;;  %v272_v52 = vld [vmem:[%s6532_s30 + $0x8c] sm:$0x1] }
  0x63   : > { %v512_v7 = vrot.slane %v510_v56, 4  ;;  %v5049_v11 = vcombine.low %v485_v15, %v495_v6  ;;  %v504_v14 = vrot.slane %v503_v63, 4  ;;  %v518_v18 = vrot.slane %v516_v61, 5 }
  0x64   : > { %v2839_v21 = vsel %vm6784_vm7, %v5317_v2, %v2838_v22  ;;  %v523_v38 = vrot.slane %v521_v17, 4  ;;  %v524_v1 = vshll.u32 %v6810_v53, 16  ;;  %v530_v30 = vshll.u32 %v6817_v16, 16  ;;  %v6849_v22 = vld [vmem:[%s8348_s1 + $0x1c] sm:$0xf] }
  0x65   : > { %v513_v25 = vor.u32 %v512_v7, %v508_v58  ;;  %v5334_v31 = vcombine.low %v2839_v21, %v2842_v5  ;;  %5752 = vmatprep.mubr.msk.bf16.mxu1 %vm714_vm3, %v5049_v11  ;;  %v509_v28 = vsel %vm6558_vm4, %v504_v14, %v508_v58  ;;  %v534_v60 = vshrl.u32 %v6817_v16, 16  ;;  %v6868_v5 = vld [vmem:[%s6532_s30 + $0x90] sm:$0xf] }
  0x66   : > { %v540_v42 = vshll.u32 %v271_v57, 16  ;;  %v526_v45 = vrot.slane %v524_v1, 5  ;;  %v5318_v47 = vrot.slane %v5302_v10, 9  ;;  %v2845_v26 = vrot.slane %v6608_v46, 5  ;;  %v5303_v57 = vld [vmem:[%s6532_s30 + $0x30] sm:$0xe] }
  0x67   : > { %v514_v44 = vrot.slane %v513_v25, 4  ;;  %v532_v48 = vrot.slane %v530_v30, 5  ;;  %v536_v49 = vrot.slane %v534_v60, 4  ;;  %v2848_v51 = vrot.slane %v6617_v54, 5  ;;  %v6880_v30 = vld [vmem:[%s6532_s30 + $0x94] sm:$0xf] }
  0x68   : > { %v542_v50 = vrot.slane %v540_v42, 5  ;;  %5907 = vmatmul.mubr.msk.bf16.vlgmr.msra.gmra.mrb[0].mxu0 %vm714_vm3, %v5334_v31  ;;  %v527_v62 = vor.u32 %v526_v45, %v523_v38  ;;  %v2846_v55 = vsel %vm6784_vm7, %v5318_v47, %v2845_v26  ;;  %v2847_v56 = vrot.slane %v2845_v26, 4  ;;  %v273_v60 = vld [vmem:[%s6532_s30 + $0x98] sm:$0x1]  ;;  %v5304_v26 = vld [vmem:[%s6532_s30 + $0x3c] sm:$0xe] }
  0x69   : > { %v519_v15 = vsel %vm6558_vm4, %v514_v44, %v518_v18  ;;  %5939 = vmatpush3.bf16.msra.mxu0 %v6568_v41  ;;  %v537_v46 = vor.u32 %v536_v49, %v532_v48  ;;  %v545_v58 = vshrl.u32 %v6836_v39, 16  ;;  %v548_v54 = vshll.u32 %v6836_v39, 16 }
  0x6a   : > { %v5050_v63 = vcombine.low %v509_v28, %v519_v15  ;;  %v528_v61 = vrot.slane %v527_v62, 4  ;;  %v2849_v2 = vsel %vm6784_vm7, %v2847_v56, %v2848_v51  ;;  %v554_v6 = vshll.u32 %v6844_v43, 16  ;;  %6306 = vmatprep.subr.msk.bf16.mxu0 %vm763_vm0, %v6849_v22 }
  0x6b   : > { %v558_v7 = vshrl.u32 %v6844_v43, 16  ;;  %v538_v41 = vrot.slane %v537_v46, 4  ;;  %v5335_v17 = vcombine.low %v2846_v55, %v2849_v2  ;;  %v547_v10 = vrot.slane %v545_v58, 4  ;;  %v6900_v46 = vld [vmem:[%s6532_s30 + $0xa0] sm:$0xf] }
  0x6c   : > { %5753 = vmatmul.mubr.msk.bf16.gmra.mrb[16].mxu1 %vm714_vm3, %v5050_v63  ;;  %v550_v11 = vrot.slane %v548_v54, 5  ;;  %v533_v14 = vsel %vm6558_vm4, %v528_v61, %v532_v48  ;;  %v556_v18 = vrot.slane %v554_v6, 5  ;;  %v564_v25 = vshll.u32 %v272_v52, 16  ;;  %v6889_v52 = vld [vmem:[%s6532_s30 + $0x9c] sm:$0xf] }
  0x6d   : > { %v560_v21 = vrot.slane %v558_v7, 4  ;;  %v543_v31 = vsel %vm6558_vm4, %v538_v41, %v542_v50  ;;  %5910 = vmatprep.mubr.msk.bf16.mxu0 %vm714_vm3, %v5335_v17  ;;  %v5319_v1 = vrot.slane %v5303_v57, 9  ;;  %v2852_v28 = vrot.slane %v6637_v33, 5 }
  0x6e   : > { %v551_v38 = vor.u32 %v550_v11, %v547_v10  ;;  %v5051_v42 = vcombine.low %v533_v14, %v543_v31  ;;  %v566_v45 = vrot.slane %v564_v25, 5  ;;  %v2855_v47 = vrot.slane %v6645_v40, 5  ;;  %v274_v10 = vld [vmem:[%s6532_s30 + $0xa4] sm:$0x1]  ;;  %v5305_v11 = vld [vmem:[%s6532_s30 + $0x48] sm:$0xe] }
  0x6f   : > { %v561_v44 = vor.u32 %v560_v21, %v556_v18  ;;  %v2853_v49 = vsel %vm6784_vm7, %v5319_v1, %v2852_v28  ;;  %v2854_v50 = vrot.slane %v2852_v28, 4  ;;  %v569_v51 = vshrl.u32 %v6868_v5, 16 }
  0x70   : > { %v552_v48 = vrot.slane %v551_v38, 4  ;;  %5756 = vmatprep.mubr.msk.bf16.mxu1 %vm714_vm3, %v5051_v42  ;;  %v572_v15 = vshll.u32 %v6868_v5, 16  ;;  %v578_v62 = vshll.u32 %v6880_v30, 16  ;;  %v582_v40 = vshrl.u32 %v6880_v30, 16 }
  0x71   : > { %v562_v33 = vrot.slane %v561_v44, 4  ;;  %v2856_v56 = vsel %vm6784_vm7, %v2854_v50, %v2855_v47  ;;  %v571_v57 = vrot.slane %v569_v51, 4  ;;  %v588_v63 = vshll.u32 %v273_v60, 16 }
  0x72   : > { %v557_v55 = vsel %vm6558_vm4, %v552_v48, %v556_v18  ;;  %v5336_v54 = vcombine.low %v2853_v49, %v2856_v56  ;;  %v574_v61 = vrot.slane %v572_v15, 5  ;;  %v580_v2 = vrot.slane %v578_v62, 5  ;;  %v6926_v56 = vld [vmem:[%s6532_s30 + $0xac] sm:$0xf] }
  0x73   : > { %v567_v58 = vsel %vm6558_vm4, %v562_v33, %v566_v45  ;;  %v584_v7 = vrot.slane %v582_v40, 4  ;;  %v590_v41 = vrot.slane %v588_v63, 5  ;;  %v5320_v17 = vrot.slane %v5304_v26, 9  ;;  %v6921_v33 = vld [vmem:[%s6532_s30 + $0xa8] sm:$0xf] }
  0x74   : > { %v5052_v6 = vcombine.low %v557_v55, %v567_v58  ;;  %5911 = vmatmul.mubr.msk.bf16.gmra.mrb[4].mxu0 %vm714_vm3, %v5336_v54  ;;  %v575_v14 = vor.u32 %v574_v61, %v571_v57  ;;  %v2859_v18 = vrot.slane %v6662_v20, 5  ;;  %v2862_v21 = vrot.slane %v6667_v34, 5  ;;  %v275_v61 = vld [vmem:[%s6532_s30 + $0xb0] sm:$0x1] }
  0x75   : > { %v593_v25 = vshrl.u32 %v6889_v52, 16  ;;  %v585_v31 = vor.u32 %v584_v7, %v580_v2  ;;  %v596_v38 = vshll.u32 %v6889_v52, 16  ;;  %v602_v1 = vshll.u32 %v6900_v46, 16 }
  0x76   : > { %5757 = vmatmul.mubr.msk.bf16.gmra.mrb[20].mxu1 %vm714_vm3, %v5052_v6  ;;  %v606_v28 = vshrl.u32 %v6900_v46, 16  ;;  %v576_v60 = vrot.slane %v575_v14, 4  ;;  %v2860_v42 = vsel %vm6784_vm7, %v5320_v17, %v2859_v18  ;;  %v2861_v20 = vrot.slane %v2859_v18, 4  ;;  %v6941_v14 = vld [vmem:[%s6532_s30 + $0xb4] sm:$0xf] }
  0x77   : > { %v595_v44 = vrot.slane %v593_v25, 4  ;;  %v586_v34 = vrot.slane %v585_v31, 4  ;;  %v598_v45 = vrot.slane %v596_v38, 5  ;;  %v604_v47 = vrot.slane %v602_v1, 5 }
  0x78   : > { %v608_v26 = vrot.slane %v606_v28, 4  ;;  %v581_v48 = vsel %vm6558_vm4, %v576_v60, %v580_v2  ;;  %v2863_v49 = vsel %vm6784_vm7, %v2861_v20, %v2862_v21  ;;  %v612_v50 = vshll.u32 %v274_v10, 16  ;;  %v5306_v2 = vld [vmem:[%s6532_s30 + $0x54] sm:$0xe] }
  0x79   : > { %v5321_v51 = vrot.slane %v5305_v11, 9  ;;  %v591_v15 = vsel %vm6558_vm4, %v586_v34, %v590_v41  ;;  %v5337_v62 = vcombine.low %v2860_v42, %v2863_v49  ;;  %v599_v40 = vor.u32 %v598_v45, %v595_v44  ;;  %v6950_v42 = vld [vmem:[%s6532_s30 + $0xb8] sm:$0xf]  ;;  %v276_v49 = vld [vmem:[%s6532_s30 + $0xbc] sm:$0x1] }
  0x7a   : > { %v609_v55 = vor.u32 %v608_v26, %v604_v47  ;;  %v5053_v57 = vcombine.low %v581_v48, %v591_v15  ;;  %v614_v63 = vrot.slane %v612_v50, 5  ;;  %v2866_v58 = vrot.slane %v6685_v8, 5 }
  0x7b   : > { %v2869_v54 = vrot.slane %v6693_v23, 5  ;;  %5914 = vmatprep.mubr.msk.bf16.mxu0 %vm714_vm3, %v5337_v62  ;;  %v600_v6 = vrot.slane %v599_v40, 4  ;;  %v617_v41 = vshrl.u32 %v6921_v33, 16  ;;  %v620_v17 = vshll.u32 %v6921_v33, 16 }
  0x7c   : > { %v610_v7 = vrot.slane %v609_v55, 4  ;;  %5760 = vmatprep.mubr.msk.bf16.mxu1 %vm714_vm3, %v5053_v57  ;;  %v2867_v10 = vsel %vm6784_vm7, %v5321_v51, %v2866_v58  ;;  %v2868_v11 = vrot.slane %v2866_v58, 4  ;;  %v626_v8 = vshll.u32 %v6926_v56, 16  ;;  %v5307_v55 = vld [vmem:[%s6532_s30 + $0x60] sm:$0xe] }
  0x7d   : > { %v630_v23 = vshrl.u32 %v6926_v56, 16  ;;  %v605_v18 = vsel %vm6558_vm4, %v600_v6, %v604_v47  ;;  %v619_v25 = vrot.slane %v617_v41, 4  ;;  %v622_v31 = vrot.slane %v620_v17, 5  ;;  %v5308_v6 = vld [vmem:[%s6532_s30 + $0x6c] sm:$0xe] }
  0x7e   : > { %v615_v21 = vsel %vm6558_vm4, %v610_v7, %v614_v63  ;;  %v2870_v1 = vsel %vm6784_vm7, %v2868_v11, %v2869_v54  ;;  %v628_v28 = vrot.slane %v626_v8, 5  ;;  %v636_v34 = vshll.u32 %v275_v61, 16  ;;  %v5244_v11 = vld [vmem:[%s6532_s30 + $0x70] sm:$0xf]  ;;  %v5245_v8 = vld [vmem:[%s6532_s30 + $0x74] sm:$0x1] }
  0x7f   : > { %v5054_v38 = vcombine.low %v605_v18, %v615_v21  ;;  %v632_v60 = vrot.slane %v630_v23, 4  ;;  %v5338_v20 = vcombine.low %v2867_v10, %v2870_v1  ;;  %v623_v44 = vor.u32 %v622_v31, %v619_v25 }
  0x80   : > { %v5322_v45 = vrot.slane %v5306_v2, 9  ;;  %v2873_v26 = vrot.slane %v6716_v4, 5  ;;  %v2876_v48 = vrot.slane %v6722_v12, 5  ;;  %v641_v50 = vshrl.u32 %v6941_v14, 16 }
  0x81   : > { %5761 = vmatmul.mubr.msk.bf16.gmra.mrb[24].mxu1 %vm714_vm3, %v5054_v38  ;;  %v633_v47 = vor.u32 %v632_v60, %v628_v28  ;;  %5915 = vmatmul.mubr.msk.bf16.gmra.mrb[8].mxu0 %vm714_vm3, %v5338_v20  ;;  %v624_v51 = vrot.slane %v623_v44, 4  ;;  %v638_v15 = vrot.slane %v636_v34, 5  ;;  %v644_v62 = vshll.u32 %v6941_v14, 16 }
  0x82   : > { %v650_v40 = vshll.u32 %v6950_v42, 16  ;;  %v2874_v4 = vsel %vm6784_vm7, %v5322_v45, %v2873_v26  ;;  %v2875_v12 = vrot.slane %v2873_v26, 4  ;;  %v643_v63 = vrot.slane %v641_v50, 4 }
  0x83   : > { %v634_v57 = vrot.slane %v633_v47, 4  ;;  %v629_v58 = vsel %vm6558_vm4, %v624_v51, %v628_v28  ;;  %v646_v54 = vrot.slane %v644_v62, 5  ;;  %v654_v2 = vshrl.u32 %v6950_v42, 16  ;;  %v5309_v47 = vld [vmem:[%s6532_s30 + $0x78] sm:$0xe] }
  0x84   : > { %v652_v61 = vrot.slane %v650_v40, 5  ;;  %v2877_v41 = vsel %vm6784_vm7, %v2875_v12, %v2876_v48  ;;  %v660_v17 = vshll.u32 %v276_v49, 16  ;;  %v5323_v10 = vrot.slane %v5307_v55, 9  ;;  %v6381_v51 = vld [vmem:[%s6532_s30] sm:$0xf] }
  0x85   : > { %v639_v7 = vsel %vm6558_vm4, %v634_v57, %v638_v15  ;;  %v5339_v18 = vcombine.low %v2874_v4, %v2877_v41  ;;  %v647_v21 = vor.u32 %v646_v54, %v643_v63  ;;  %v656_v25 = vrot.slane %v654_v2, 4  ;;  %v6988_v15 = vld [vmem:[%s6532_s30 + $0x4] sm:$0xf]  ;;  %v6992_v40 = vld [vmem:[%s6532_s30 + $0x7c] sm:$0xf] }
  0x86   : > { %v5055_v23 = vcombine.low %v629_v58, %v639_v7  ;;  %v662_v31 = vrot.slane %v660_v17, 5  ;;  %v2880_v38 = vrot.slane %v6746_v59, 5  ;;  %v2883_v1 = vrot.slane %v6753_v9, 5  ;;  %v6995_v55 = vld [vmem:[%s6532_s30 + $0x80] sm:$0x1] }
  0x87   : > { %v5324_v28 = vrot.slane %v5308_v6, 9  ;;  %5918 = vmatprep.mubr.msk.bf16.mxu0 %vm714_vm3, %v5339_v18  ;;  %v648_v60 = vrot.slane %v647_v21, 4  ;;  %v657_v20 = vor.u32 %v656_v25, %v652_v61  ;;  %v2887_v44 = vrot.slane %v5244_v11, 5  ;;  %v5250_v57 = vld [vmem:[%s6532_s30 + $0x88] sm:$0xf] }
  0x88   : > { %5764 = vmatprep.mubr.msk.bf16.mxu1 %vm714_vm3, %v5055_v23  ;;  %v2890_v34 = vrot.slane %v5245_v8, 5  ;;  %v2881_v45 = vsel %vm6784_vm7, %v5323_v10, %v2880_v38  ;;  %v2882_v59 = vrot.slane %v2880_v38, 4  ;;  %v5073_v62 = vcombine.low %v6381_v51, %v6988_v15  ;;  %v5251_v54 = vld [vmem:[%s6532_s30 + $0x8c] sm:$0x1]  ;;  %v5253_v17 = vld [vmem:[%s6532_s30 + $0x94] sm:$0xf] }
  0x89   : > { %v653_v9 = vsel %vm6558_vm4, %v648_v60, %v652_v61  ;;  %v658_v26 = vrot.slane %v657_v20, 4  ;;  %v2888_v48 = vsel %vm6784_vm7, %v5324_v28, %v2887_v44  ;;  %v2889_v49 = vrot.slane %v2887_v44, 4  ;;  %v5310_v61 = vld [vmem:[%s6532_s30 + $0x84] sm:$0xe]  ;;  %v5311_v23 = vld [vmem:[%s6532_s30 + $0x90] sm:$0xe] }
  0x8a   : > { %v2884_v50 = vsel %vm6784_vm7, %v2882_v59, %v2883_v1  ;;  %v5325_v58 = vrot.slane %v5309_v47, 9  ;;  %v2894_v7 = vrot.slane %v6992_v40, 5  ;;  %v2897_v41 = vrot.slane %v6995_v55, 5  ;;  %v5254_v25 = vld [vmem:[%s6532_s30 + $0x98] sm:$0x1] }
  0x8b   : > { %v663_v4 = vsel %vm6558_vm4, %v658_v26, %v662_v31  ;;  %v5340_v12 = vcombine.low %v2881_v45, %v2884_v50  ;;  %v2891_v63 = vsel %vm6784_vm7, %v2889_v49, %v2890_v34  ;;  %v5326_v10 = vrot.slane %v5310_v61, 9  ;;  %v5256_v31 = vld [vmem:[%s6532_s30 + $0xa0] sm:$0xf]  ;;  %v5257_v60 = vld [vmem:[%s6532_s30 + $0xa4] sm:$0x1] }
  0x8c   : > { %v5056_v2 = vcombine.low %v653_v9, %v663_v4  ;;  %v5341_v6 = vcombine.low %v2888_v48, %v2891_v63  ;;  %v2901_v11 = vrot.slane %v5250_v57, 5  ;;  %v2904_v8 = vrot.slane %v5251_v54, 5  ;;  %v5312_v20 = vld [vmem:[%s6532_s30 + $0x9c] sm:$0xe]  ;;  %v6383_v44 = vld [vmem:[%s6532_s30 + $0xc] sm:$0xf] }
  0x8d   : > { %5919 = vmatmul.mubr.msk.bf16.gmra.mrb[12].mxu0 %vm714_vm3, %v5340_v12  ;;  %v2895_v18 = vsel %vm6784_vm7, %v5325_v58, %v2894_v7  ;;  %v2896_v21 = vrot.slane %v2894_v7, 4  ;;  %v2908_v28 = vrot.slane %v5253_v17, 5  ;;  %v7022_v34 = vld [vmem:[%s6532_s30 + $0x10] sm:$0xf]  ;;  %v6385_v47 = vld [vmem:[%s6532_s30 + $0x18] sm:$0xf] }
  0x8e   : > { %5765 = vmatmul.mubr.msk.bf16.gmra.mrb[28].mxu1 %vm714_vm3, %v5056_v2  ;;  %5922 = vmatprep.mubr.msk.bf16.mxu0 %vm714_vm3, %v5341_v6  ;;  %v2902_v38 = vsel %vm6784_vm7, %v5326_v10, %v2901_v11  ;;  %v2903_v1 = vrot.slane %v2901_v11, 4  ;;  %v5074_v45 = vcombine.low %v6383_v44, %v7022_v34  ;;  %v7029_v9 = vld [vmem:[%s6532_s30 + $0x1c] sm:$0xf]  ;;  %v5327_v48 = vrot.slane %v5311_v23, 9  ;;  %v5259_v57 = vld [vmem:[%s6532_s30 + $0xac] sm:$0xf] }
  0x8f   : > { %5770 = vmatprep.mubr.msk.bf16.mxu1 %vm714_vm3, %v5073_v62  ;;  %v2898_v59 = vsel %vm6784_vm7, %v2896_v21, %v2897_v41  ;;  %v5075_v26 = vcombine.low %v6385_v47, %v7029_v9  ;;  %v2910_v51 = vrot.slane %v2908_v28, 4  ;;  %v2911_v62 = vrot.slane %v5254_v25, 5  ;;  %v6387_v54 = vld [vmem:[%s8348_s1 + $0x8] sm:$0xf]  ;;  %v5262_v2 = vld [vmem:[%s6532_s30 + $0xb8] sm:$0xf] }
  0x90   : > { %v5342_v49 = vcombine.low %v2895_v18, %v2898_v59  ;;  %v2905_v50 = vsel %vm6784_vm7, %v2903_v1, %v2904_v8  ;;  %v5328_v12 = vrot.slane %v5312_v20, 9  ;;  %v2915_v63 = vrot.slane %v5256_v31, 5  ;;  %v7044_v7 = vld [vmem:[%s8348_s1 + $0xc] sm:$0xf]  ;;  %v5260_v10 = vld [vmem:[%s6532_s30 + $0xb0] sm:$0x1] }
  0x91   : > { %v5343_v4 = vcombine.low %v2902_v38, %v2905_v50  ;;  %v2918_v58 = vrot.slane %v5257_v60, 5  ;;  %v1482_v61 = vsel %vm763_vm0, %v6387_v54, 0  ;;  %v2909_v41 = vsel %vm6784_vm7, %v5327_v48, %v2908_v28  ;;  %v5313_v11 = vld [vmem:[%s6532_s30 + $0xa8] sm:$0xe]  ;;  %v5263_v25 = vld [vmem:[%s6532_s30 + $0xbc] sm:$0x1] }
  0x92   : > { %v2917_v6 = vrot.slane %v2915_v63, 4  ;;  %v2912_v17 = vsel %vm6784_vm7, %v2910_v51, %v2911_v62  ;;  %v2922_v8 = vrot.slane %v5259_v57, 5  ;;  %v2916_v23 = vsel %vm6784_vm7, %v5328_v12, %v2915_v63  ;;  %v5314_v31 = vld [vmem:[%s6532_s30 + $0xb4] sm:$0xe]  ;;  %v6388_v38 = vld [vmem:[%s6532_s30 + $0x24] sm:$0xf] }
  0x93   : > { %v2929_v21 = vrot.slane %v5262_v2, 5  ;;  %v7065_v1 = vld [vmem:[%s6532_s30 + $0x28] sm:$0xf]  ;;  %v5344_v60 = vcombine.low %v2909_v41, %v2912_v17  ;;  %v5329_v44 = vrot.slane %v5313_v11, 9  ;;  %v2925_v59 = vrot.slane %v5260_v10, 5 }
  0x94   : > { %v2919_v18 = vsel %vm6784_vm7, %v2917_v6, %v2918_v58  ;;  %v5076_v28 = vcombine.low %v6388_v38, %v7065_v1  ;;  %v6390_v47 = vld [vmem:[%s6532_s30 + $0x30] sm:$0xf]  ;;  %v2932_v51 = vrot.slane %v5263_v25, 5  ;;  %v5265_v62 = vld [vmem:[%s6532_s30 + $0xc4] sm:$0xf]  ;;  %v2317_v25 = vshrl.u32 %v6992_v40, 16 }
  0x95   : > { %5923 = vmatmul.mubr.msk.bf16.gmra.mrb[16].mxu0 %vm714_vm3, %v5342_v49  ;;  %v5345_v20 = vcombine.low %v2916_v23, %v2919_v18  ;;  %v5330_v49 = vrot.slane %v5314_v31, 9  ;;  %v2931_v50 = vrot.slane %v2929_v21, 4  ;;  %v2923_v57 = vsel %vm6784_vm7, %v5329_v44, %v2922_v8  ;;  %v5315_v12 = vld [vmem:[%s6532_s30 + $0xc0] sm:$0xe]  ;;  %v6392_v41 = vld [vmem:[%s6532_s30 + $0x3c] sm:$0xf] }
  0x96   : > { %5771 = vmatmul.mubr.msk.bf16.vlgmr.msra.gmra.mrb[0].mxu1 %vm714_vm3, %v5074_v45  ;;  %5926 = vmatprep.mubr.msk.bf16.mxu0 %vm714_vm3, %v5343_v4  ;;  %v2924_v45 = vrot.slane %v2922_v8, 4  ;;  %v2936_v63 = vrot.slane %v5265_v62, 5  ;;  %v5331_v6 = vrot.slane %v5315_v12, 9  ;;  %v7090_v17 = vld [vmem:[%s6532_s30 + $0x40] sm:$0xf]  ;;  %v5079_v18 = vcombine.low %v6697_v27, %v6700_v36  ;;  %v6344_v62 = vld [vmem:[%s6532_s30 + $0x24] sm:$0xff]  }
  0x97   : > { %5803 = vmatpush3.bf16.msra.mxu1 %v1482_v61  ;;  %5774 = vmatprep.mubr.msk.bf16.mxu1 %vm714_vm3, %v5075_v26  ;;  %v7070_v26 = vld [vmem:[%s6532_s30 + $0x34] sm:$0xf]  ;;  %v2930_v58 = vsel %vm6784_vm7, %v5330_v49, %v2929_v21  ;;  %v2933_v54 = vsel %vm6784_vm7, %v2931_v50, %v2932_v51  ;;  %v5266_v61 = vld [vmem:[%s6532_s30 + $0xc8] sm:$0x1]  ;;  %v5078_v10 = vcombine.low %v6392_v41, %v7090_v17  ;;  %v2313_v21 = vshll.u32 %v6992_v40, 16 }
  0x98   : > { %6301 = vmatprep.subr.msk.bf16.mxu1 %vm763_vm0, %v7044_v7  ;;  %v5077_v48 = vcombine.low %v6390_v47, %v7070_v26  ;;  %v2926_v4 = vsel %vm6784_vm7, %v2924_v45, %v2925_v59  ;;  %v5347_v11 = vcombine.low %v2930_v58, %v2933_v54  ;;  %v2938_v8 = vrot.slane %v2936_v63, 4  ;;  %v1220_v45 = vld [vmem:[%s6532_s30] sm:$0xe]  ;;  %v1221_v59 = vld [vmem:[%s6532_s30 + $0xc] sm:$0xe] }
  0x99   : > { %v5346_v2 = vcombine.low %v2923_v57, %v2926_v4  ;;  %v2939_v23 = vrot.slane %v5266_v61, 5  ;;  %v2937_v31 = vsel %vm6784_vm7, %v5331_v6, %v2936_v63  ;;  %v7105_v27 = vrot.slane %v2313_v21, 5  ;;  %v1224_v41 = vld [vmem:[%s6532_s30 + $0x30] sm:$0xe] }
  0x9a   : > { %v2319_v36 = vrot.slane %v2317_v25, 4  ;;  %v5081_v44 = vcombine.low %v6757_v19, %v6763_v35  ;;  %v2323_v47 = vshll.u32 %v6995_v55, 16  ;;  %v5105_v19 = vrot.slane %v1220_v45, 9 }
  0x9b   : > { %v2940_v38 = vsel %vm6784_vm7, %v2938_v8, %v2939_v23  ;;  %8370 = vst [vmem:[#allocation3_spill] sm:$0xff] %v7105_v27  ;;  %v5106_v35 = vrot.slane %v1221_v59, 9  ;;  %v1287_v4 = vrot.slane %v7029_v9, 5  ;;  %v1294_v12 = vrot.slane %v7065_v1, 5  ;;  %v1225_v8 = vld [vmem:[%s6532_s30 + $0x3c] sm:$0xe] }
  0x9c   : > { %v5348_v40 = vcombine.low %v2937_v31, %v2940_v38  ;;  %v2320_v49 = vor.u32 %v2319_v36, %v7105_v27  ;;  %v7125_v51 = vrot.slane %v2323_v47, 5  ;;  %v5082_v58 = vcombine.low %v6778_v0, %v6791_v29  ;;  %v1226_v31 = vld [vmem:[%s6532_s30 + $0x48] sm:$0xe]  ;;  %v6398_v59 = vld [vmem:[%s6532_s30 + $0x38] sm:$0x1] }
  0x9d   : > { %5927 = vmatmul.mubr.msk.bf16.gmra.mrb[20].mxu0 %vm714_vm3, %v5344_v60  ;;  %v5080_v60 = vcombine.low %v6726_v24, %v6732_v37  ;;  %v6395_v24 = vld [vmem:[%s6532_s30 + $0x14] sm:$0x1]  ;;  %v4128_v54 = vsel %vm763_vm0, %v6849_v22, 0  ;;  %v5083_v61 = vcombine.low %v6810_v53, %v6817_v16  ;;  %v5084_v6 = vcombine.low %v6836_v39, %v6844_v43  ;;  %v6396_v16 = vld [vmem:[%s6532_s30 + $0x20] sm:$0x1] }
  0x9e   : > { %5775 = vmatmul.mubr.msk.bf16.gmra.mrb[4].mxu1 %vm714_vm3, %v5076_v28  ;;  %5930 = vmatprep.mubr.msk.bf16.mxu0 %vm714_vm3, %v5345_v20  ;;  %v1280_v28 = vrot.slane %v7022_v34, 5  ;;  %v6342_v20 = vld [vmem:[%s6532_s30 + $0x18] sm:$0xff]   ;;  %v6394_v34 = vld [vmem:[%s6532_s30 + $0x8] sm:$0x1]  ;;  %v1283_v37 = vrot.slane %v6395_v24, 5  ;;  %8371 = vst [vmem:[#allocation4_spill] sm:$0xff] %v7125_v51  ;;  %v5085_v9 = vcombine.low %v6868_v5, %v6880_v30 }
  0x9f   : > { %5778 = vmatprep.mubr.msk.bf16.mxu1 %vm714_vm3, %v5077_v48  ;;  %v1273_v48 = vrot.slane %v6988_v15, 5  ;;  %v1276_v50 = vrot.slane %v6394_v34, 5  ;;  %v1222_v15 = vld [vmem:[%s6532_s30 + $0x18] sm:$0xe]  ;;  %v7130_v63 = vrot.slane %v2320_v49, 4  ;;  %v1290_v22 = vrot.slane %v6396_v16, 5 }
  0xa0   : > { %v1282_v55 = vrot.slane %v1280_v28, 4  ;;  %v5107_v1 = vrot.slane %v1222_v15, 9  ;;  %v7152_v29 = vsel %vm6784_vm7, %v5106_v35, %v1280_v28  ;;  %v1296_v25 = vrot.slane %v1294_v12, 4  ;;  %v5430_v24 = vld [vmem:[%s6532_s30 + $0x18] sm:$0xf] }
  0xa1   : > { %v1275_v57 = vrot.slane %v1273_v48, 4  ;;  %8372 = vst [vmem:[#allocation5_spill] sm:$0xff] %v7130_v63  ;;  %v7148_v0 = vsel %vm6784_vm7, %v5105_v19, %v1273_v48  ;;  %v1304_v47 = vrot.slane %v6398_v59, 5  ;;  %v7189_v49 = vsel %vm763_vm0, %v7044_v7, 0  ;;  %v5431_v7 = vld [vmem:[%s6532_s30 + $0x1c] sm:$0xf] }
  0xa2   : > { %v7156_v53 = vsel %vm6784_vm7, %v1282_v55, %v1283_v37  ;;  %v7193_v34 = vsel %vm6784_vm7, %v5107_v1, %v1287_v4  ;;  %v6348_v37 = vld [vmem:[%s6532_s30 + $0x3c] sm:$0xff]   ;;  %v5110_v35 = vrot.slane %v1225_v8, 9  ;;  %v6399_v55 = vld [vmem:[%s6532_s30 + $0x44] sm:$0x1]  ;;  %v3649_v8 = vshll.u32 %v5430_v24, 16 }
  0xa3   : > { %v7167_v23 = vsel %vm6784_vm7, %v1275_v57, %v1276_v50  ;;  %v1227_v50 = vld [vmem:[%s6532_s30 + $0x54] sm:$0xe]  ;;  %v1311_v15 = vrot.slane %v6399_v55, 5  ;;  %v5434_v39 = vld [vmem:[%s6532_s30 + $0x28] sm:$0xf] }
  0xa4   : > { %v6406_v5 = vld [vmem:[%s6532_s30 + $0x70] sm:$0xf] }
  0xa5   : > { %5931 = vmatmul.mubr.msk.bf16.gmra.mrb[24].mxu0 %vm714_vm3, %v5346_v2  ;;  %v1223_v2 = vld [vmem:[%s6532_s30 + $0x24] sm:$0xe]  ;;  %v1336_v30 = vrot.slane %v6406_v5, 5 }
  0xa6   : > { %5779 = vmatmul.mubr.msk.bf16.gmra.mrb[8].mxu1 %vm714_vm3, %v5078_v10  ;;  %5934 = vmatprep.mubr.msk.bf16.mxu0 %vm714_vm3, %v5347_v11  ;;  %v1301_v10 = vrot.slane %v7070_v26, 5  ;;  %v6346_v11 = vld [vmem:[%s6532_s30 + $0x30] sm:$0xff]   ;;  %v7163_v26 = vld [vmem:[%s8348_s1 + $0x20] sm:$0xf]  ;;  %v5108_v21 = vrot.slane %v1223_v2, 9 }
  0xa7   : > { %5782 = vmatprep.mubr.msk.bf16.mxu1 %vm714_vm3, %v5079_v18  ;;  %v1289_v18 = vrot.slane %v1287_v4, 4  ;;  %v1338_v48 = vrot.slane %v1336_v30, 4 }
  0xa8   : > { %v1303_v45 = vrot.slane %v1301_v10, 4  ;;  %v7200_v19 = vsel %vm6784_vm7, %v5108_v21, %v1294_v12  ;;  %v3659_v21 = vshrl.u32 %v5431_v7, 16 }
  0xa9   : > { %v7209_v4 = vsel %vm6784_vm7, %v1289_v18, %v1290_v22  ;;  %v3646_v22 = vshrl.u32 %v5430_v24, 16  ;;  %v3655_v18 = vshll.u32 %v5431_v7, 16  ;;  %v5433_v24 = vld [vmem:[%s6532_s30 + $0x24] sm:$0xf] }
  0xaa   : > { %v7222_v1 = vsel %vm6784_vm7, %v1303_v45, %v1304_v47 }
  0xab   : > { %v3648_v43 = vrot.slane %v3646_v22, 4  ;;  %v7264_v7 = vrot.slane %v3655_v18, 5  ;;  %v3673_v22 = vshll.u32 %v5433_v24, 16  ;;  %v3683_v18 = vshrl.u32 %v5434_v39, 16 }
  0xad   : > { %5935 = vmatmul.mubr.msk.bf16.gmra.mrb[28].mxu0 %vm714_vm3, %v5348_v40  ;;  %v6397_v40 = vld [vmem:[%s6532_s30 + $0x2c] sm:$0x1]  ;;  %v3675_v27 = vrot.slane %v3673_v22, 5 }
  0xae   : > { %5783 = vmatmul.mubr.msk.bf16.gmra.mrb[12].mxu1 %vm714_vm3, %v5080_v60  ;;  %5940 = vmatprep.mubr.msk.bf16.mxu0 %vm714_vm3, %v6342_v20  ;;  %v1297_v28 = vrot.slane %v6397_v40, 5  ;;  %v1308_v60 = vrot.slane %v7090_v17, 5  ;;  %v6402_v40 = vld [vmem:[%s6532_s30 + $0x50] sm:$0x1]  ;;  %v6407_v17 = vld [vmem:[%s6532_s30 + $0x74] sm:$0x1] }
  0xaf   : > { %5786 = vmatprep.mubr.msk.bf16.mxu1 %vm714_vm3, %v5081_v44  ;;  %v5109_v44 = vrot.slane %v1224_v41, 9  ;;  %v5112_v41 = vrot.slane %v1227_v50, 9  ;;  %v1228_v50 = vld [vmem:[%s6532_s30 + $0x60] sm:$0xe]  ;;  %v5435_v20 = vld [vmem:[%s6532_s30 + $0x2c] sm:$0x1] }
  0xb0   : > { %v1310_v12 = vrot.slane %v1308_v60, 4  ;;  %v7235_v45 = vsel %vm6784_vm7, %v5110_v35, %v1308_v60  ;;  %v6403_v35 = vld [vmem:[%s6532_s30 + $0x5c] sm:$0x1] }
  0xb1   : > { %v7218_v2 = vsel %vm6784_vm7, %v5109_v44, %v1301_v10  ;;  %v1325_v55 = vrot.slane %v6403_v35, 5  ;;  %v1229_v35 = vld [vmem:[%s6532_s30 + $0x6c] sm:$0xe] }
  0xb2   : > { %v7239_v59 = vsel %vm6784_vm7, %v1310_v12, %v1311_v15  ;;  %v6404_v15 = vld [vmem:[%s6532_s30 + $0x64] sm:$0xf]  ;;  %v3661_v12 = vrot.slane %v3659_v21, 4  ;;  %v5114_v5 = vrot.slane %v1229_v35, 9 }
  0xb3   : > { %v6354_v21 = vld [vmem:[%s6532_s30 + $0x60] sm:$0xff]  }
  0xb5   : > { %5941 = vmatmul.mubr.msk.bf16.vlgmr.msra.gmra.mrb[0].mxu0 %vm714_vm3, %v6344_v62  ;;  %v6400_v62 = vld [vmem:[%s6532_s30 + $0x4c] sm:$0xf] }
  0xb6   : > { %5787 = vmatmul.mubr.msk.bf16.gmra.mrb[16].mxu1 %vm714_vm3, %v5082_v58  ;;  %5973 = vmatpush3.bf16.msra.mxu0 %v4128_v54  ;;  %v1315_v57 = vrot.slane %v6400_v62, 5  ;;  %v7213_v58 = vsel %vm6784_vm7, %v1296_v25, %v1297_v28  ;;  %v5111_v54 = vrot.slane %v1226_v31, 9  ;;  %v1318_v28 = vrot.slane %v6402_v40, 5 }
  0xb7   : > { %5790 = vmatprep.mubr.msk.bf16.mxu1 %vm714_vm3, %v5083_v61  ;;  %5944 = vmatprep.mubr.msk.bf16.mxu0 %vm714_vm3, %v6346_v11  ;;  %v6350_v61 = vld [vmem:[%s6532_s30 + $0x48] sm:$0xff]   ;;  %v6401_v11 = vld [vmem:[%s6532_s30 + $0x58] sm:$0xf]  ;;  %v1329_v62 = vrot.slane %v6404_v15, 5  ;;  %v5437_v15 = vld [vmem:[%s6532_s30 + $0x34] sm:$0xf] }
  0xb8   : > { %6307 = vmatprep.subr.msk.bf16.mxu0 %vm763_vm0, %v7163_v26  ;;  %v1322_v16 = vrot.slane %v6401_v11, 5  ;;  %v1317_v31 = vrot.slane %v1315_v57, 4  ;;  %v7243_v47 = vsel %vm6784_vm7, %v5111_v54, %v1315_v57  ;;  %v5432_v57 = vld [vmem:[%s6532_s30 + $0x20] sm:$0x1]  ;;  %v5436_v54 = vld [vmem:[%s6532_s30 + $0x30] sm:$0xf] }
  0xb9   : > { %v5113_v11 = vrot.slane %v1228_v50, 9  ;;  %v3697_v50 = vshll.u32 %v5436_v54, 16  ;;  %v3665_v25 = vshll.u32 %v5432_v57, 16  ;;  %v3703_v36 = vshll.u32 %v5437_v15, 16 }
  0xba   : > { %v7254_v60 = vsel %vm6784_vm7, %v5112_v41, %v1322_v16  ;;  %v7270_v41 = vsel %vm6784_vm7, %v1317_v31, %v1318_v28  ;;  %v1331_v31 = vrot.slane %v1329_v62, 4  ;;  %v3694_v28 = vshrl.u32 %v5436_v54, 16 }
  0xbb   : > { %v7312_v35 = vrot.slane %v3703_v36, 5 }
  0xbd   : > { %5945 = vmatmul.mubr.msk.bf16.gmra.mrb[4].mxu0 %vm714_vm3, %v6348_v37  ;;  %v1324_v37 = vrot.slane %v1322_v16, 4  ;;  %v6405_v16 = vld [vmem:[%s6532_s30 + $0x68] sm:$0x1] }
  0xbe   : > { %5791 = vmatmul.mubr.msk.bf16.gmra.mrb[20].mxu1 %vm714_vm3, %v5084_v6  ;;  %5948 = vmatprep.mubr.msk.bf16.mxu0 %vm714_vm3, %v6350_v61  ;;  %v3651_v6 = vrot.slane %v3649_v8, 5  ;;  %v6352_v61 = vld [vmem:[%s6532_s30 + $0x54] sm:$0xff]   ;;  %v1332_v40 = vrot.slane %v6405_v16, 5  ;;  %v3679_v8 = vshll.u32 %v5434_v39, 16  ;;  %v3662_v16 = vor.u32 %v3661_v12, %v7264_v7 }
  0xbf   : > { %5794 = vmatprep.mubr.msk.bf16.mxu1 %vm714_vm3, %v5085_v9  ;;  %v3670_v9 = vshrl.u32 %v5433_v24, 16  ;;  %v7279_v44 = vsel %vm6784_vm7, %v1324_v37, %v1325_v55  ;;  %v1339_v24 = vrot.slane %v6407_v17, 5  ;;  %v3707_v39 = vshrl.u32 %v5437_v15, 16 }
  0xc0   : > { %v3652_v10 = vor.u32 %v3651_v6, %v3648_v43  ;;  %v7285_v37 = vrot.slane %v3679_v8, 5  ;;  %v3685_v55 = vrot.slane %v3683_v18, 4  ;;  %v8373_v43 = vcombine.low %v6889_v52, %v6900_v46  ;;  %v6408_v8 = vld [vmem:[%s6532_s30 + $0x7c] sm:$0xf]  ;;  %v7321_v18 = vld [vmem:[%s6532_s30 + $0x38] sm:$0x1] }
  0xc1   : > { %v3672_v38 = vrot.slane %v3670_v9, 4  ;;  %v7294_v17 = vsel %vm6784_vm7, %v5113_v11, %v1329_v62  ;;  %v7298_v57 = vsel %vm6784_vm7, %v1331_v31, %v1332_v40  ;;  %v3696_v6 = vrot.slane %v3694_v28, 4  ;;  %8375 = vst [vmem:[#allocation6_spill] sm:$0xff] %v7321_v18 }
  0xc2   : > { %v3699_v12 = vrot.slane %v3697_v50, 5  ;;  %v8374_v52 = vcombine.low %v6921_v33, %v6926_v56  ;;  %v3653_v46 = vrot.slane %v3652_v10, 4  ;;  %v3663_v54 = vrot.slane %v3662_v16, 4  ;;  %v6356_v33 = vld [vmem:[%s6532_s30 + $0x6c] sm:$0xff]   ;;  %v1231_v16 = vld [vmem:[%s6532_s30 + $0x84] sm:$0xe] }
  0xc3   : > { %v3689_v62 = vshll.u32 %v5435_v20, 16  ;;  %v7306_v11 = vsel %vm6784_vm7, %v5114_v5, %v1336_v30  ;;  %v7310_v40 = vsel %vm6784_vm7, %v1338_v48, %v1339_v24  ;;  %v3709_v9 = vrot.slane %v3707_v39, 4  ;;  %v6357_v48 = vld [vmem:[%s6532_s30 + $0x78] sm:$0xff]  }
  0xc4   : > { %v3676_v10 = vor.u32 %v3675_v27, %v3672_v38  ;;  %v3686_v20 = vor.u32 %v3685_v55, %v7285_v37  ;;  %v1343_v30 = vrot.slane %v6408_v8, 5  ;;  %v3700_v38 = vor.u32 %v3699_v12, %v3696_v6  ;;  %v5439_v5 = vld [vmem:[%s6532_s30 + $0x3c] sm:$0xf] }
  0xc5   : > { %5949 = vmatmul.mubr.msk.bf16.gmra.mrb[8].mxu0 %vm714_vm3, %v6352_v61  ;;  %v3667_v61 = vrot.slane %v3665_v25, 5  ;;  %v1230_v25 = vld [vmem:[%s6532_s30 + $0x78] sm:$0xe]  ;;  %v7337_v50 = vrot.slane %v3689_v62, 5  ;;  %v3710_v39 = vor.u32 %v3709_v9, %v7312_v35  ;;  %v3713_v55 = vshll.u32 %v7321_v18, 16 }
  0xc6   : > { %5795 = vmatmul.mubr.msk.bf16.gmra.mrb[24].mxu1 %vm714_vm3, %v8373_v43  ;;  %5952 = vmatprep.mubr.msk.bf16.mxu0 %vm714_vm3, %v6354_v21  ;;  %v3658_v21 = vsel %vm6558_vm4, %v3653_v46, %v7264_v7  ;;  %v5115_v24 = vrot.slane %v1230_v25, 9  ;;  %v6409_v43 = vld [vmem:[%s6532_s30 + $0x88] sm:$0xf]  ;;  %v7345_v7 = vld [vmem:[%s6532_s30 + $0x40] sm:$0xf]  ;;  %v3677_v12 = vrot.slane %v3676_v10, 4  ;;  %v8377_v62 = vcombine.low %v6941_v14, %v6950_v42 }
  0xc7   : > { %5798 = vmatprep.mubr.msk.bf16.mxu1 %vm714_vm3, %v8374_v52  ;;  %v3668_v31 = vsel %vm6558_vm4, %v3663_v54, %v3667_v61  ;;  %v1350_v6 = vrot.slane %v6409_v43, 5  ;;  %8376 = vst [vmem:[#allocation7_spill] sm:$0xff] %v7345_v7  ;;  %v3687_v52 = vrot.slane %v3686_v20, 4  ;;  %v1345_v46 = vrot.slane %v1343_v30, 4  ;;  %v6410_v54 = vld [vmem:[%s6532_s30 + $0x80] sm:$0x1] }
  0xc8   : > { %v1346_v61 = vrot.slane %v6410_v54, 5  ;;  %v3701_v9 = vrot.slane %v3700_v38, 4  ;;  %v5116_v25 = vrot.slane %v1231_v16, 9  ;;  %v3718_v8 = vshrl.u32 %v5439_v5, 16  ;;  %v6358_v10 = vld [vmem:[%s6532_s30 + $0x84] sm:$0xff]  }
  0xc9   : > { %v3721_v43 = vshll.u32 %v5439_v5, 16  ;;  %v7359_v20 = vcombine.low %v3658_v21, %v3668_v31  ;;  %v7363_v14 = vsel %vm763_vm0, %v7163_v26, 0  ;;  %v3731_v38 = vshrl.u32 %v7345_v7, 16  ;;  %v6359_v21 = vld [vmem:[%s6532_s30 + $0x90] sm:$0xff]   ;;  %v6415_v18 = vld [vmem:[%s6532_s30 + $0xa0] sm:$0xf] }
  0xca   : > { %v3711_v16 = vrot.slane %v3710_v39, 4  ;;  %v3715_v5 = vrot.slane %v3713_v55, 5  ;;  %v1352_v54 = vrot.slane %v1350_v6, 4  ;;  %v3682_v31 = vsel %vm6558_vm4, %v3677_v12, %v7285_v37 }
  0xcb   : > { %v3692_v26 = vsel %vm6558_vm4, %v3687_v52, %v7337_v50  ;;  %v7378_v39 = vsel %vm6784_vm7, %v5115_v24, %v1343_v30  ;;  %v7382_v55 = vsel %vm6784_vm7, %v1345_v46, %v1346_v61  ;;  %v3706_v37 = vsel %vm6558_vm4, %v3701_v9, %v7312_v35  ;;  %v5445_v30 = vld [vmem:[%s6532_s30 + $0x54] sm:$0xf]  ;;  %v7399_v24 = vld [vmem:[%s6532_s30 + $0x58] sm:$0xf]  ;;  %v7404_v61 = vld [vmem:[%s6532_s30 + $0x90] sm:$0xe] }
  0xcc   : > { %v7395_v12 = vsel %vm6784_vm7, %v5116_v25, %v1350_v6  ;;  %v3720_v50 = vrot.slane %v3718_v8, 4  ;;  %v3723_v52 = vrot.slane %v3721_v43, 5  ;;  %v3733_v46 = vrot.slane %v3731_v38, 4 }
  0xcd   : > { %5953 = vmatmul.mubr.msk.bf16.gmra.mrb[12].mxu0 %vm714_vm3, %v6356_v33  ;;  %v8378_v33 = vcombine.low %v7148_v0, %v7167_v23  ;;  %v6411_v0 = vld [vmem:[%s6532_s30 + $0x8c] sm:$0x1]  ;;  %v3716_v36 = vsel %vm6558_vm4, %v3711_v16, %v3715_v5  ;;  %v3766_v25 = vshrl.u32 %v5445_v30, 16  ;;  %v3769_v8 = vshll.u32 %v5445_v30, 16 }
  0xce   : > { %5799 = vmatmul.mubr.msk.bf16.gmra.mrb[28].mxu1 %vm714_vm3, %v8377_v62  ;;  %5956 = vmatprep.mubr.msk.bf16.mxu0 %vm714_vm3, %v6357_v48  ;;  %v3727_v48 = vshll.u32 %v7345_v7, 16  ;;  %v1353_v23 = vrot.slane %v6411_v0, 5  ;;  %v5442_v62 = vld [vmem:[%s6532_s30 + $0x48] sm:$0xf]  ;;  %v7388_v0 = vld [vmem:[%s6532_s30 + $0x4c] sm:$0xf]  ;;  %v8380_v38 = vcombine.low %v7152_v29, %v7156_v53  ;;  %v7422_v16 = vcombine.low %v3682_v31, %v3692_v26 }
  0xcf   : > { %5804 = vmatprep.mubr.msk.bf16.mxu1 %vm714_vm3, %v8378_v33  ;;  %v7385_v33 = vld [vmem:[%s6532_s30 + $0x44] sm:$0x1]  ;;  %v3742_v27 = vshrl.u32 %v5442_v62, 16  ;;  %v3745_v15 = vshll.u32 %v5442_v62, 16  ;;  %v3751_v6 = vshll.u32 %v7388_v0, 16  ;;  %v3755_v9 = vshrl.u32 %v7388_v0, 16 }
  0xd0   : > { %8379 = vst [vmem:[#allocation8_spill] sm:$0xff] %v7385_v33  ;;  %v7401_v28 = vrot.slane %v3727_v48, 5  ;;  %v7410_v35 = vsel %vm6784_vm7, %v1352_v54, %v1353_v23  ;;  %v3775_v43 = vshll.u32 %v7399_v24, 16  ;;  %v3779_v48 = vshrl.u32 %v7399_v24, 16  ;;  %v5448_v31 = vld [vmem:[%s6532_s30 + $0x60] sm:$0xf] }
  0xd1   : > { %v3737_v5 = vshll.u32 %v7385_v33, 16  ;;  %v5117_v54 = vrot.slane %v7404_v61, 9  ;;  %v8381_v23 = vcombine.low %v7193_v34, %v7209_v4  ;;  %v7433_v29 = vcombine.low %v3706_v37, %v3716_v36  ;;  %v6360_v26 = vld [vmem:[%s6532_s30 + $0x9c] sm:$0xff]   ;;  %v6361_v30 = vld [vmem:[%s6532_s30 + $0xa8] sm:$0xff]   ;;  %v6412_v36 = vld [vmem:[%s8348_s1 + $0x10] sm:$0xf] }
  0xd2   : > { %v3724_v53 = vor.u32 %v3723_v52, %v3720_v50  ;;  %v3744_v62 = vrot.slane %v3742_v27, 4  ;;  %v7444_v34 = vrot.slane %v3751_v6, 5  ;;  %v3757_v4 = vrot.slane %v3755_v9, 4  ;;  %v6413_v6 = vld [vmem:[%s6532_s30 + $0x94] sm:$0xf] }
  0xd3   : > { %v3768_v27 = vrot.slane %v3766_v25, 4  ;;  %v3771_v37 = vrot.slane %v3769_v8, 5  ;;  %v7453_v50 = vrot.slane %v3775_v43, 5  ;;  %v3781_v52 = vrot.slane %v3779_v48, 4  ;;  %v7459_v9 = vld [vmem:[%s6532_s30 + $0x64] sm:$0xf] }
  0xd4   : > { %8382 = vst [vmem:[#allocation9_spill] sm:$0xff] %v7459_v9  ;;  %v3790_v61 = vshrl.u32 %v5448_v31, 16  ;;  %v7461_v22 = vrot.slane %v3724_v53, 4  ;;  %v1364_v25 = vrot.slane %v6415_v18, 5  ;;  %v3758_v43 = vor.u32 %v3757_v4, %v7444_v34 }
  0xd5   : > { %5957 = vmatmul.mubr.msk.bf16.gmra.mrb[16].mxu0 %vm714_vm3, %v6358_v10  ;;  %v3793_v10 = vshll.u32 %v5448_v31, 16  ;;  %v3772_v31 = vor.u32 %v3771_v37, %v3768_v27  ;;  %v3782_v53 = vor.u32 %v3781_v52, %v7453_v50  ;;  %v8383_v18 = vcombine.low %v7200_v19, %v7213_v58  ;;  %v6362_v37 = vld [vmem:[%s6532_s30 + $0xb4] sm:$0xff]  }
  0xd6   : > { %5805 = vmatmul.mubr.msk.bf16.vlgmr.msra.gmra.mrb[0].mxu1 %vm714_vm3, %v8380_v38  ;;  %5960 = vmatprep.mubr.msk.bf16.mxu0 %vm714_vm3, %v6359_v21  ;;  %v3747_v21 = vrot.slane %v3745_v15, 5  ;;  %v7442_v38 = vld [vmem:[%s6532_s30 + $0x50] sm:$0x1]  ;;  %v7451_v15 = vld [vmem:[%s6532_s30 + $0x5c] sm:$0x1]  ;;  %v8384_v27 = vcombine.low %v7218_v2, %v7222_v1  ;;  %v1366_v52 = vrot.slane %v1364_v25, 4 }
  0xd7   : > { %5837 = vmatpush3.bf16.msra.mxu1 %v7189_v49  ;;  %5808 = vmatprep.mubr.msk.bf16.mxu1 %vm714_vm3, %v8381_v23  ;;  %v3734_v49 = vor.u32 %v3733_v46, %v7401_v28  ;;  %v7455_v46 = vrot.slane %v3737_v5, 5  ;;  %v1357_v23 = vrot.slane %v6413_v6, 5  ;;  %v3761_v48 = vshll.u32 %v7442_v38, 16  ;;  %v1233_v5 = vld [vmem:[%s6532_s30 + $0x9c] sm:$0xe] }
  0xd8   : > { %6303 = vmatprep.subr.msk.bf16.mxu1 %vm763_vm0, %v6412_v36  ;;  %v6414_v36 = vld [vmem:[%s6532_s30 + $0x98] sm:$0x1]  ;;  %v3748_v7 = vor.u32 %v3747_v21, %v3744_v62  ;;  %v3785_v6 = vshll.u32 %v7451_v15, 16  ;;  %v3803_v62 = vshrl.u32 %v7459_v9, 16  ;;  %v3795_v4 = vrot.slane %v3793_v10, 5 }
  0xd9   : > { %v1360_v33 = vrot.slane %v6414_v36, 5  ;;  %v3735_v8 = vrot.slane %v3734_v49, 4  ;;  %v3799_v36 = vshll.u32 %v7459_v9, 16  ;;  %v7480_v21 = vsel %vm6784_vm7, %v5117_v54, %v1357_v23  ;;  %v7491_v2 = vld [vmem:[%s6532_s30 + $0x68] sm:$0x1] }
  0xda   : > { %v3792_v49 = vrot.slane %v3790_v61, 4  ;;  %v3749_v19 = vrot.slane %v3748_v7, 4  ;;  %v5118_v58 = vrot.slane %v1233_v5, 9  ;;  %v3759_v3 = vrot.slane %v3758_v43, 4  ;;  %8385 = vst [vmem:[#allocation10_spill] sm:$0xff] %v7491_v2  ;;  %v6363_v5 = vld [vmem:[%s6532_s30 + $0xc0] sm:$0xff]  }
  0xdb   : > { %v3763_v54 = vrot.slane %v3761_v48, 5  ;;  %v3787_v63 = vrot.slane %v3785_v6, 5  ;;  %v1371_v61 = vrot.slane %v6926_v56, 5  ;;  %v3773_v10 = vrot.slane %v3772_v31, 4  ;;  %v1235_v31 = vld [vmem:[%s6532_s30 + $0xb4] sm:$0xe] }
  0xdc   : > { %v3783_v51 = vrot.slane %v3782_v53, 4  ;;  %v7493_v1 = vrot.slane %v3799_v36, 5  ;;  %v3805_v7 = vrot.slane %v3803_v62, 4  ;;  %v3730_v43 = vsel %vm6558_vm4, %v7461_v22, %v7401_v28  ;;  %v6417_v62 = vld [vmem:[%s6532_s30 + $0xb0] sm:$0x1] }
  0xdd   : > { %5961 = vmatmul.mubr.msk.bf16.gmra.mrb[20].mxu0 %vm714_vm3, %v6360_v26  ;;  %v1359_v26 = vrot.slane %v1357_v23, 4  ;;  %v1234_v23 = vld [vmem:[%s6532_s30 + $0xa8] sm:$0xe]  ;;  %v3740_v48 = vsel %vm6558_vm4, %v3735_v8, %v7455_v46  ;;  %v3796_v6 = vor.u32 %v3795_v4, %v3792_v49  ;;  %v3754_v53 = vsel %vm6558_vm4, %v3749_v19, %v7444_v34  ;;  %v5451_v46 = vld [vmem:[%s6532_s30 + $0x6c] sm:$0xf] }
  0xde   : > { %5809 = vmatmul.mubr.msk.bf16.gmra.mrb[4].mxu1 %vm714_vm3, %v8383_v18  ;;  %5964 = vmatprep.mubr.msk.bf16.mxu0 %vm714_vm3, %v6361_v30  ;;  %v6416_v18 = vld [vmem:[%s6532_s30 + $0xa4] sm:$0x1]  ;;  %v7513_v36 = vsel %vm6784_vm7, %v5118_v58, %v1364_v25  ;;  %v5119_v28 = vrot.slane %v1234_v23, 9  ;;  %v1373_v8 = vrot.slane %v1371_v61, 4  ;;  %v3809_v49 = vshll.u32 %v7491_v2, 16 }
  0xdf   : > { %5812 = vmatprep.mubr.msk.bf16.mxu1 %vm714_vm3, %v8384_v27  ;;  %v1367_v30 = vrot.slane %v6416_v18, 5  ;;  %v7505_v56 = vsel %vm6784_vm7, %v1359_v26, %v1360_v33  ;;  %v3764_v33 = vsel %vm6558_vm4, %v3759_v3, %v3763_v54  ;;  %v1374_v26 = vrot.slane %v6417_v62, 5  ;;  %v5454_v18 = vld [vmem:[%s6532_s30 + $0x78] sm:$0xf]  ;;  %v7568_v54 = vld [vmem:[%s6532_s30 + $0xbc] sm:$0x1] }
  0xe0   : > { %v3778_v34 = vsel %vm6558_vm4, %v3773_v10, %v7453_v50  ;;  %v3788_v25 = vsel %vm6558_vm4, %v3783_v51, %v3787_v63  ;;  %v3806_v4 = vor.u32 %v3805_v7, %v7493_v1  ;;  %v5120_v27 = vrot.slane %v1235_v31, 9  ;;  %v7542_v51 = vld [vmem:[%s6532_s30 + $0x70] sm:$0xf]  ;;  %v7572_v10 = vld [vmem:[%s6532_s30 + $0x7c] sm:$0xf] }
  0xe1   : > { %v7517_v22 = vsel %vm6784_vm7, %v1366_v52, %v1367_v30  ;;  %v8387_v3 = vcombine.low %v7235_v45, %v7239_v59  ;;  %v7538_v19 = vrot.slane %v3796_v6, 4  ;;  %v1378_v50 = vrot.slane %v6950_v42, 5  ;;  %8388 = vst [vmem:[#allocation12_spill] sm:$0xff] %v7542_v51  ;;  %8390 = vst [vmem:[#allocation13_spill] sm:$0xff] %v7572_v10  ;;  %v5457_v7 = vld [vmem:[%s6532_s30 + $0x84] sm:$0xf] }
  0xe2   : > { %8386 = vst [vmem:[#allocation11_spill] sm:$0xff] %v7517_v22  ;;  %v3814_v63 = vshrl.u32 %v5451_v46, 16  ;;  %v8389_v45 = vcombine.low %v7243_v47, %v7270_v41  ;;  %v7550_v58 = vcombine.low %v3754_v53, %v3764_v33  ;;  %v7556_v42 = vsel %vm6784_vm7, %v5119_v28, %v1371_v61  ;;  %v6364_v61 = vld [vmem:[%s6532_s30 + $0xcc] sm:$0xff]   ;;  %v7584_v31 = vld [vmem:[%s6532_s30 + $0x88] sm:$0xf] }
  0xe3   : > { %v7559_v30 = vcombine.low %v3778_v34, %v3788_v25  ;;  %v7563_v47 = vsel %vm6784_vm7, %v1373_v8, %v1374_v26  ;;  %v7565_v41 = vrot.slane %v3809_v49, 5  ;;  %v3823_v6 = vshll.u32 %v7542_v51, 16  ;;  %8391 = vst [vmem:[#allocation14_spill] sm:$0xff] %v7584_v31  ;;  %v5460_v62 = vld [vmem:[%s6532_s30 + $0x90] sm:$0xf] }
  0xe4   : > { %v7590_v28 = vrot.slane %v1378_v50, 4  ;;  %v7592_v33 = vrot.slane %v3814_v63, 4  ;;  %v3827_v8 = vshrl.u32 %v7542_v51, 16  ;;  %v3838_v26 = vshrl.u32 %v5454_v18, 16  ;;  %v7599_v25 = vld [vmem:[%s6532_s30 + $0x94] sm:$0xf] }
  0xe5   : > { %5965 = vmatmul.mubr.msk.bf16.gmra.mrb[24].mxu0 %vm714_vm3, %v6362_v37  ;;  %v7536_v37 = vcombine.low %v3730_v43, %v3740_v48  ;;  %v7580_v43 = vsel %vm6784_vm7, %v5120_v27, %v1378_v50  ;;  %v3817_v48 = vshll.u32 %v5451_v46, 16  ;;  %v3841_v49 = vshll.u32 %v5454_v18, 16  ;;  %8392 = vst [vmem:[#allocation15_spill] sm:$0xff] %v7599_v25  ;;  %v7637_v2 = vld [vmem:[%s6532_s30 + $0x8c] sm:$0x1] }
  0xe6   : > { %5813 = vmatmul.mubr.msk.bf16.gmra.mrb[8].mxu1 %vm714_vm3, %v8387_v3  ;;  %5968 = vmatprep.mubr.msk.bf16.mxu0 %vm714_vm3, %v6363_v5  ;;  %v7576_v5 = vrot.slane %v3806_v4, 4  ;;  %v3847_v46 = vshll.u32 %v7572_v10, 16  ;;  %v3851_v34 = vshrl.u32 %v7572_v10, 16  ;;  %v3862_v4 = vshrl.u32 %v5457_v7, 16 }
  0xe7   : > { %5816 = vmatprep.mubr.msk.bf16.mxu1 %vm714_vm3, %v8389_v45  ;;  %v3865_v27 = vshll.u32 %v5457_v7, 16  ;;  %v3871_v3 = vshll.u32 %v7584_v31, 16  ;;  %v3875_v50 = vshrl.u32 %v7584_v31, 16  ;;  %v7609_v45 = vld [vmem:[%s6532_s30 + $0x74] sm:$0x1]  ;;  %v3819_v18 = vrot.slane %v3817_v48, 5 }
  0xe8   : > { %v3886_v52 = vshrl.u32 %v5460_v62, 16  ;;  %v3889_v53 = vshll.u32 %v5460_v62, 16  ;;  %v8393_v7 = vcombine.low %v7254_v60, %v7279_v44  ;;  %v3829_v59 = vrot.slane %v3827_v8, 4  ;;  %v5463_v48 = vld [vmem:[%s6532_s30 + $0x9c] sm:$0xf] }
  0xe9   : > { %v3895_v63 = vshll.u32 %v7599_v25, 16  ;;  %v3899_v23 = vshrl.u32 %v7599_v25, 16  ;;  %v8394_v62 = vcombine.low %v7294_v17, %v7298_v57  ;;  %v7627_v44 = vld [vmem:[%s6532_s30 + $0x80] sm:$0x1]  ;;  %v3840_v60 = vrot.slane %v3838_v26, 4 }
  0xea   : > { %8395 = vst [vmem:[#allocation16_spill] sm:$0xff] %v7627_v44  ;;  %v3864_v31 = vrot.slane %v3862_v4, 4  ;;  %v3867_v8 = vrot.slane %v3865_v27, 5  ;;  %v7631_v10 = vrot.slane %v3871_v3, 5  ;;  %v3877_v51 = vrot.slane %v3875_v50, 4 }
  0xeb   : > { %v7634_v25 = vld [vmem:[%s6532_s30 + $0xa0] sm:$0xf]  ;;  %v3888_v17 = vrot.slane %v3886_v52, 4  ;;  %v3891_v57 = vrot.slane %v3889_v53, 5  ;;  %v3913_v9 = vshll.u32 %v5463_v48, 16  ;;  %v3820_v26 = vor.u32 %v3819_v18, %v7592_v33 }
  0xec   : > { %v3857_v27 = vshll.u32 %v7627_v44, 16  ;;  %v7646_v3 = vld [vmem:[%s6532_s30 + $0x98] sm:$0x1]  ;;  %v3919_v50 = vshll.u32 %v7634_v25, 16  ;;  %v3923_v52 = vshrl.u32 %v7634_v25, 16  ;;  %v3868_v22 = vor.u32 %v3867_v8, %v3864_v31 }
  0xed   : > { %5969 = vmatmul.mubr.msk.bf16.gmra.mrb[28].mxu0 %vm714_vm3, %v6364_v61  ;;  %v7617_v61 = vrot.slane %v3823_v6, 5  ;;  %v3853_v6 = vrot.slane %v3851_v34, 4  ;;  %v3901_v34 = vrot.slane %v3899_v23, 4  ;;  %v3881_v33 = vshll.u32 %v7637_v2, 16 }
  0xee   : > { %5817 = vmatmul.mubr.msk.bf16.gmra.mrb[12].mxu1 %vm714_vm3, %v8393_v7  ;;  %5974 = vmatprep.mubr.msk.bf16.mxu0 %vm714_vm3, %v7359_v20  ;;  %v3843_v7 = vrot.slane %v3841_v49, 5  ;;  %v7629_v20 = vrot.slane %v3847_v46, 5  ;;  %v3833_v49 = vshll.u32 %v7609_v45, 16  ;;  %v7641_v46 = vrot.slane %v3895_v63, 5 }
  0xef   : > { %5820 = vmatprep.mubr.msk.bf16.mxu1 %vm714_vm3, %v8394_v62  ;;  %v3910_v62 = vshrl.u32 %v5463_v48, 16  ;;  %v3830_v4 = vor.u32 %v3829_v59, %v7617_v61  ;;  %v3878_v23 = vor.u32 %v3877_v51, %v7631_v10  ;;  %v3892_v59 = vor.u32 %v3891_v57, %v3888_v17  ;;  %v7679_v57 = vld [vmem:[%s6532_s30 + $0xa4] sm:$0x1] }
  0xf0   : > { %v3844_v53 = vor.u32 %v3843_v7, %v3840_v60  ;;  %v3854_v48 = vor.u32 %v3853_v6, %v7629_v20  ;;  %v3915_v18 = vrot.slane %v3913_v9, 5  ;;  %v8396_v44 = vcombine.low %v7306_v11, %v7310_v40 }
  0xf1   : > { %v3912_v63 = vrot.slane %v3910_v62, 4  ;;  %v8397_v31 = vrot.slane %v7568_v54, 5  ;;  %v3835_v51 = vrot.slane %v3833_v49, 5  ;;  %v3902_v60 = vor.u32 %v3901_v34, %v7641_v46  ;;  %v7682_v34 = vld [vmem:[%s6532_s30 + $0xac] sm:$0xf] }
  0xf2   : > { %v3905_v9 = vshll.u32 %v7646_v3, 16  ;;  %v8398_v11 = vcombine.low %v7378_v39, %v7382_v55  ;;  %v3821_v40 = vrot.slane %v3820_v26, 4  ;;  %v7675_v54 = vrot.slane %v3919_v50, 5 }
  0xf3   : > { %v3845_v7 = vrot.slane %v3844_v53, 4  ;;  %v3855_v6 = vrot.slane %v3854_v48, 4  ;;  %v3859_v8 = vrot.slane %v3857_v27, 5  ;;  %v3883_v17 = vrot.slane %v3881_v33, 5  ;;  %v7692_v48 = vld [vmem:[%s6532_s30 + $0xb0] sm:$0x1] }
  0xf4   : > { %v3869_v39 = vrot.slane %v3868_v22, 4  ;;  %v3879_v55 = vrot.slane %v3878_v23, 4  ;;  %v3893_v62 = vrot.slane %v3892_v59, 4  ;;  %v3916_v49 = vor.u32 %v3915_v18, %v3912_v63 }
  0xf5   : > { %5975 = vmatmul.mubr.msk.bf16.vlgmr.msra.gmra.mrb[0].mxu0 %vm714_vm3, %v7422_v16  ;;  %v7665_v16 = vsel %vm6784_vm7, %v7590_v28, %v8397_v31  ;;  %v3925_v28 = vrot.slane %v3923_v52, 4  ;;  %v3907_v26 = vrot.slane %v3905_v9, 5  ;;  %v3826_v52 = vsel %vm6558_vm4, %v3821_v40, %v7617_v61 }
  0xf6   : > { %5821 = vmatmul.mubr.msk.bf16.gmra.mrb[16].mxu1 %vm714_vm3, %v8396_v44  ;;  %6007 = vmatpush3.bf16.msra.mxu0 %v7363_v14  ;;  %v3831_v14 = vrot.slane %v3830_v4, 4  ;;  %v5466_v44 = vld [vmem:[%s6532_s30 + $0xa8] sm:$0xf]  ;;  %v3929_v22 = vshll.u32 %v7679_v57, 16  ;;  %v3850_v33 = vsel %vm6558_vm4, %v3845_v7, %v7629_v20  ;;  %v3860_v23 = vsel %vm6558_vm4, %v3855_v6, %v3859_v8 }
  0xf7   : > { %5824 = vmatprep.mubr.msk.bf16.mxu1 %vm714_vm3, %v8398_v11  ;;  %5978 = vmatprep.mubr.msk.bf16.mxu0 %vm714_vm3, %v7433_v29  ;;  %v3903_v29 = vrot.slane %v3902_v60, 4  ;;  %v3934_v4 = vshrl.u32 %v5466_v44, 16  ;;  %v3937_v50 = vshll.u32 %v5466_v44, 16  ;;  %v3926_v53 = vor.u32 %v3925_v28, %v7675_v54  ;;  %v5515_v11 = vld [vmem:[%s6532_s30 + $0x48] sm:$0xe] }
  0xf8   : > { %v3836_v27 = vsel %vm6558_vm4, %v3831_v14, %v3835_v51  ;;  %v3943_v59 = vshll.u32 %v7682_v34, 16  ;;  %v3947_v61 = vshrl.u32 %v7682_v34, 16  ;;  %v3874_v63 = vsel %vm6558_vm4, %v3869_v39, %v7631_v10  ;;  %v7757_v39 = vld [vmem:[%s6532_s30 + $0xb8] sm:$0xf] }
  0xf9   : > { %v3884_v18 = vsel %vm6558_vm4, %v3879_v55, %v3883_v17  ;;  %v3898_v20 = vsel %vm6558_vm4, %v3893_v62, %v7641_v46  ;;  %v3917_v31 = vrot.slane %v3916_v49, 4  ;;  %v8399_v51 = vcombine.low %v7395_v12, %v7410_v35 }
  0xfa   : > { %v3936_v10 = vrot.slane %v3934_v4, 4  ;;  %v3939_v60 = vrot.slane %v3937_v50, 5  ;;  %v3953_v9 = vshll.u32 %v7692_v48, 16  ;;  %v8400_v46 = vcombine.low %v7480_v21, %v7505_v56  ;;  %v5469_v21 = vld [vmem:[%s6532_s30 + $0xb4] sm:$0xf] }
  0xfb   : > { %v5136_v12 = vcombine.low %v7556_v42, %v7563_v47  ;;  %v8401_v35 = vsel %vm6558_vm4, %v7576_v5, %v7565_v41  ;;  %v3927_v14 = vrot.slane %v3926_v53, 4  ;;  %v3931_v28 = vrot.slane %v3929_v22, 5  ;;  %v5517_v4 = vld [vmem:[%s6532_s30 + $0x60] sm:$0xe]  ;;  %v5518_v53 = vld [vmem:[%s6532_s30 + $0x6c] sm:$0xe] }
  0xfc   : > { %v5137_v56 = vcombine.low %v7580_v43, %v7665_v16  ;;  %v7740_v44 = vcombine.low %v3826_v52, %v3836_v27  ;;  %v7742_v42 = vrot.slane %v3943_v59, 5  ;;  %v3949_v47 = vrot.slane %v3947_v61, 4  ;;  %v8410_v16 = vld [vmem:[#allocation4_spill] sm:$0xff] }
  0xfd   : > { %5979 = vmatmul.mubr.msk.bf16.gmra.mrb[4].mxu0 %vm714_vm3, %v7536_v37  ;;  %v3908_v37 = vsel %vm6558_vm4, %v3903_v29, %v3907_v26  ;;  %v7744_v41 = vcombine.low %v3850_v33, %v3860_v23  ;;  %v7746_v5 = vcombine.low %v3874_v63, %v3884_v18  ;;  %v3922_v6 = vsel %vm6558_vm4, %v3917_v31, %v7675_v54  ;;  %v8403_v23 = vld [vmem:[#allocation11_spill] sm:$0xff]  ;;  %v5472_v63 = vld [vmem:[%s6532_s30 + $0xc0] sm:$0xf]  ;;  %v8405_v18 = vld [vmem:[#allocation9_spill] sm:$0xff] }
  0xfe   : > { %5825 = vmatmul.mubr.msk.bf16.gmra.mrb[20].mxu1 %vm714_vm3, %v8399_v51  ;;  %5982 = vmatprep.mubr.msk.bf16.mxu0 %vm714_vm3, %v7550_v58  ;;  %v8402_v58 = vsel %vm6558_vm4, %v7538_v19, %v7493_v1  ;;  %v7748_v7 = vcombine.low %v3898_v20, %v3908_v37  ;;  %v5531_v1 = vrot.slane %v5515_v11, 9  ;;  %v5516_v19 = vld [vmem:[%s6532_s30 + $0x54] sm:$0xe]  ;;  %v3940_v8 = vor.u32 %v3939_v60, %v3936_v10  ;;  %v8406_v31 = vld [vmem:[#allocation10_spill] sm:$0xff] }
  0xff   : > { %5828 = vmatprep.mubr.msk.bf16.mxu1 %vm714_vm3, %v8400_v46  ;;  %v5485_v40 = vcombine.low %v8402_v58, %v8401_v35  ;;  %v7754_v17 = vrot.slane %v3953_v9, 5  ;;  %v3958_v55 = vshrl.u32 %v5469_v21, 16  ;;  %v3932_v62 = vsel %vm6558_vm4, %v3927_v14, %v3931_v28  ;;  %v8407_v9 = vld [vmem:[#allocation12_spill] sm:$0xff]  ;;  %v7806_v35 = vld [vmem:[%s6532_s30 + $0xbc] sm:$0x1] }
 0x100   : > { %v3961_v49 = vshll.u32 %v5469_v21, 16  ;;  %v4417_v29 = vrot.slane %v7388_v0, 5  ;;  %v4420_v26 = vrot.slane %v7442_v38, 5  ;;  %v3950_v50 = vor.u32 %v3949_v47, %v7742_v42  ;;  %v7809_v58 = vld [vmem:[%s6532_s30 + $0xc4] sm:$0xf] }
 0x101   : > { %v5532_v52 = vrot.slane %v5516_v19, 9  ;;  %v4424_v54 = vrot.slane %v7399_v24, 5  ;;  %v4427_v27 = vrot.slane %v7451_v15, 5  ;;  %v3967_v22 = vshll.u32 %v7757_v39, 16  ;;  %v5519_v19 = vld [vmem:[%s6532_s30 + $0x78] sm:$0xe] }
 0x102   : > { %v3971_v33 = vshrl.u32 %v7757_v39, 16  ;;  %v7774_v0 = vsel %vm6784_vm7, %v5531_v1, %v4417_v29  ;;  %v4419_v38 = vrot.slane %v4417_v29, 4  ;;  %v8404_v59 = vcombine.low %v7513_v36, %v8403_v23  ;;  %v8408_v23 = vld [vmem:[#allocation13_spill] sm:$0xff] }
 0x103   : > { %v7781_v24 = vcombine.low %v3922_v6, %v3932_v62  ;;  %v7785_v15 = vsel %vm6784_vm7, %v5532_v52, %v4424_v54  ;;  %v5533_v61 = vrot.slane %v5517_v4, 9  ;;  %v4431_v20 = vrot.slane %v8405_v18, 5  ;;  %v6365_v6 = vld [vmem:[%s6532_s30 + $0xc] sm:$0xff]  }
 0x104   : > { %v7791_v36 = vsel %vm6784_vm7, %v4419_v38, %v4420_v26  ;;  %v4434_v51 = vrot.slane %v8406_v31, 5  ;;  %v5534_v37 = vrot.slane %v5518_v53, 9  ;;  %v4438_v11 = vrot.slane %v8407_v9, 5 }
 0x105   : > { %5983 = vmatmul.mubr.msk.bf16.gmra.mrb[8].mxu0 %vm714_vm3, %v7559_v30  ;;  %v4426_v30 = vrot.slane %v4424_v54, 4  ;;  %v5548_v10 = vcombine.low %v7774_v0, %v7791_v36  ;;  %v4441_v46 = vrot.slane %v7609_v45, 5  ;;  %v7815_v14 = vsel %vm6784_vm7, %v5533_v61, %v4431_v20 }
 0x106   : > { %5829 = vmatmul.mubr.msk.bf16.gmra.mrb[24].mxu1 %vm714_vm3, %v8404_v59  ;;  %5986 = vmatprep.mubr.msk.bf16.mxu0 %vm714_vm3, %v5485_v40  ;;  %v4433_v28 = vrot.slane %v4431_v20, 4  ;;  %v7817_v21 = vrot.slane %v3958_v55, 4  ;;  %v3982_v47 = vshrl.u32 %v5472_v63, 16  ;;  %v7821_v45 = vsel %vm6784_vm7, %v5534_v37, %v4438_v11  ;;  %v5246_v55 = vld [vmem:[%s6532_s30 + $0x78] sm:$0xf]  ;;  %v8409_v59 = vld [vmem:[#allocation16_spill] sm:$0xff] }
 0x107   : > { %5832 = vmatprep.mubr.msk.bf16.mxu1 %vm714_vm3, %v5136_v12  ;;  %v7799_v60 = vsel %vm6784_vm7, %v4426_v30, %v4427_v27  ;;  %v7803_v12 = vrot.slane %v3940_v8, 4  ;;  %v4440_v1 = vrot.slane %v4438_v11, 4  ;;  %v7825_v8 = vrot.slane %v3950_v50, 4 }
 0x108   : > { %v5549_v40 = vcombine.low %v7785_v15, %v7799_v60  ;;  %v7827_v62 = vrot.slane %v3961_v49, 5  ;;  %v3985_v29 = vshll.u32 %v5472_v63, 16  ;;  %v7831_v26 = vsel %vm6784_vm7, %v4433_v28, %v4434_v51  ;;  %v8412_v28 = vld [vmem:[#allocation14_spill] sm:$0xff] }
 0x109   : > { %v7834_v4 = vrot.slane %v3967_v22, 5  ;;  %v7836_v52 = vrot.slane %v3971_v33, 4  ;;  %v5550_v54 = vcombine.low %v7815_v14, %v7831_v26  ;;  %v7842_v27 = vsel %vm6784_vm7, %v4440_v1, %v4441_v46  ;;  %v5520_v33 = vld [vmem:[%s6532_s30 + $0x84] sm:$0xe]  ;;  %v6366_v1 = vld [vmem:[%s6532_s30 + $0x18] sm:$0xff]  }
 0x10a   : > { %v3977_v49 = vshll.u32 %v7806_v35, 16  ;;  %v3991_v50 = vshll.u32 %v7809_v58, 16  ;;  %v5551_v53 = vcombine.low %v7821_v45, %v7842_v27  ;;  %v5535_v22 = vrot.slane %v5519_v19, 9  ;;  %v6428_v60 = vld [vmem:[%s6532_s30 + $0xa0] sm:$0xf] }
 0x10b   : > { %v3984_v38 = vrot.slane %v3982_v47, 4  ;;  %v4448_v30 = vrot.slane %v8409_v59, 5  ;;  %v2304_v61 = vshrl.u32 %v5246_v55, 16  ;;  %v3987_v63 = vrot.slane %v3985_v29, 5  ;;  %v5475_v29 = vld [vmem:[%s6532_s30 + $0xcc] sm:$0xf] }
 0x10c   : > { %v3995_v18 = vshrl.u32 %v7809_v58, 16  ;;  %v2307_v43 = vshll.u32 %v5246_v55, 16  ;;  %v5536_v37 = vrot.slane %v5520_v33, 9  ;;  %v3946_v9 = vsel %vm6558_vm4, %v7803_v12, %v7742_v42  ;;  %v7885_v55 = vld [vmem:[%s6532_s30 + $0xd0] sm:$0xf] }
 0x10d   : > { %5987 = vmatmul.mubr.msk.bf16.gmra.mrb[12].mxu0 %vm714_vm3, %v7740_v44  ;;  %v4445_v44 = vrot.slane %v8408_v23, 5  ;;  %v2306_v51 = vrot.slane %v2304_v61, 4  ;;  %v3964_v11 = vor.u32 %v7827_v62, %v7817_v21  ;;  %v4452_v47 = vrot.slane %v8412_v28, 5  ;;  %v6367_v21 = vld [vmem:[%s6532_s30 + $0x24] sm:$0xff]   ;;  %v6432_v27 = vld [vmem:[%s6532_s30 + $0xac] sm:$0xf] }
 0x10e   : > { %5833 = vmatmul.mubr.msk.bf16.gmra.mrb[28].mxu1 %vm714_vm3, %v5137_v56  ;;  %5990 = vmatprep.mubr.msk.bf16.mxu0 %vm714_vm3, %v7744_v41  ;;  %v8411_v56 = vld [vmem:[#allocation5_spill] sm:$0xff]  ;;  %v2309_v46 = vrot.slane %v2307_v43, 5  ;;  %v3956_v19 = vsel %vm6558_vm4, %v7825_v8, %v7754_v17  ;;  %v4455_v12 = vrot.slane %v7637_v2, 5  ;;  %v7893_v62 = vrot.slane %v3991_v50, 5  ;;  %v5521_v8 = vld [vmem:[%s6532_s30 + $0x90] sm:$0xe] }
 0x10f   : > { %5838 = vmatprep.mubr.msk.bf16.mxu1 %vm714_vm3, %v6365_v6  ;;  %v2326_v41 = vsel %vm6558_vm4, %v8411_v56, %v8410_v16  ;;  %v7867_v20 = vsel %vm6784_vm7, %v5535_v22, %v4445_v44  ;;  %v4447_v31 = vrot.slane %v4445_v44, 4  ;;  %v3974_v6 = vor.u32 %v7836_v52, %v7834_v4  ;;  %v7899_v52 = vld [vmem:[%s6532_s30 + $0xc8] sm:$0x1]  ;;  %v8414_v16 = vld [vmem:[#allocation2_spill] sm:$0xff] }
 0x110   : > { %v3997_v22 = vrot.slane %v3995_v18, 4  ;;  %v2310_v17 = vor.u32 %v2309_v46, %v2306_v51  ;;  %v3979_v23 = vrot.slane %v3977_v49, 5  ;;  %v3988_v44 = vor.u32 %v3987_v63, %v3984_v38  ;;  %v8415_v51 = vld [vmem:[#allocation3_spill] sm:$0xff] }
 0x111   : > { %v7889_v42 = vsel %vm6784_vm7, %v4447_v31, %v4448_v30  ;;  %v7903_v59 = vsel %vm6784_vm7, %v5536_v37, %v4452_v47  ;;  %v4454_v30 = vrot.slane %v4452_v47, 4  ;;  %v4006_v2 = vshrl.u32 %v5475_v29, 16 }
 0x112   : > { %v5552_v33 = vcombine.low %v7867_v20, %v7889_v42  ;;  %v4009_v50 = vshll.u32 %v5475_v29, 16  ;;  %v4015_v61 = vshll.u32 %v7885_v55, 16  ;;  %v2311_v18 = vrot.slane %v2310_v17, 4  ;;  %v6368_v29 = vld [vmem:[%s6532_s30 + $0x30] sm:$0xff]  }
 0x113   : > { %v4019_v49 = vshrl.u32 %v7885_v55, 16  ;;  %v7914_v38 = vsel %vm6784_vm7, %v4454_v30, %v4455_v12  ;;  %v5537_v63 = vrot.slane %v5521_v8, 9  ;;  %v3998_v56 = vor.u32 %v3997_v22, %v7893_v62 }
 0x114   : > { %v4001_v31 = vshll.u32 %v7899_v52, 16  ;;  %v5553_v37 = vcombine.low %v7903_v59, %v7914_v38  ;;  %v5491_v46 = vcombine.low %v3946_v9, %v3956_v19  ;;  %v3965_v28 = vrot.slane %v3964_v11, 4  ;;  %v5522_v11 = vld [vmem:[%s6532_s30 + $0x9c] sm:$0xe] }
 0x115   : > { %5991 = vmatmul.mubr.msk.bf16.gmra.mrb[16].mxu0 %vm714_vm3, %v7746_v5  ;;  %v8413_v5 = vld [vmem:[#allocation15_spill] sm:$0xff]  ;;  %v3975_v47 = vrot.slane %v3974_v6, 4  ;;  %v3989_v12 = vrot.slane %v3988_v44, 4  ;;  %v4462_v8 = vrot.slane %v7646_v3, 5  ;;  %v4008_v30 = vrot.slane %v4006_v2, 4  ;;  %v6369_v19 = vld [vmem:[%s6532_s30 + $0x3c] sm:$0xff]  }
 0x116   : > { %5839 = vmatmul.mubr.msk.bf16.vlgmr.msra.gmra.mrb[0].mxu1 %vm714_vm3, %v6366_v1  ;;  %5994 = vmatprep.mubr.msk.bf16.mxu0 %vm714_vm3, %v7748_v7  ;;  %v4459_v43 = vrot.slane %v8413_v5, 5  ;;  %v2316_v7 = vsel %vm6558_vm4, %v2311_v18, %v8415_v51  ;;  %v4011_v18 = vrot.slane %v4009_v50, 5  ;;  %v7937_v5 = vrot.slane %v4015_v61, 5 }
 0x117   : > { %6041 = vmatpush3.bf16.msra.mxu1 %v8414_v16  ;;  %5842 = vmatprep.mubr.msk.bf16.mxu1 %vm714_vm3, %v6367_v21  ;;  %v7926_v1 = vcombine.low %v2316_v7, %v2326_v41  ;;  %v7930_v21 = vld [vmem:[%s6532_s30 + $0xd4] sm:$0x1]  ;;  %v4021_v9 = vrot.slane %v4019_v49, 4  ;;  %v3999_v41 = vrot.slane %v3998_v56, 4  ;;  %v4003_v6 = vrot.slane %v4001_v31, 5 }
 0x118   : > { %v7934_v22 = vsel %vm6784_vm7, %v5537_v63, %v4459_v43  ;;  %v4461_v17 = vrot.slane %v4459_v43, 4  ;;  %v3970_v63 = vsel %vm6558_vm4, %v3965_v28, %v7834_v4  ;;  %v3980_v2 = vsel %vm6558_vm4, %v3975_v47, %v3979_v23  ;;  %v6419_v16 = vld [vmem:[%s6532_s30 + $0x1c] sm:$0xf]  ;;  %v5523_v28 = vld [vmem:[%s6532_s30 + $0xa8] sm:$0xe] }
 0x119   : > { %v4025_v50 = vshll.u32 %v7930_v21, 16  ;;  %v5538_v61 = vrot.slane %v5522_v11, 9  ;;  %v4466_v49 = vrot.slane %v7634_v25, 5  ;;  %v3994_v4 = vsel %vm6558_vm4, %v3989_v12, %v7893_v62  ;;  %v5511_v62 = vld [vmem:[%s6532_s30 + $0x18] sm:$0xe]  ;;  %v6370_v47 = vld [vmem:[%s6532_s30 + $0x48] sm:$0xff]  }
 0x11a   : > { %v7943_v44 = vsel %vm6784_vm7, %v4461_v17, %v4462_v8  ;;  %v4022_v43 = vor.u32 %v4021_v9, %v7937_v5  ;;  %v4469_v23 = vrot.slane %v7679_v57, 5  ;;  %v4004_v25 = vsel %vm6558_vm4, %v3999_v41, %v4003_v6  ;;  %v6420_v11 = vld [vmem:[%s6532_s30 + $0x20] sm:$0x1] }
 0x11b   : > { %v5554_v3 = vcombine.low %v7934_v22, %v7943_v44  ;;  %v4389_v56 = vrot.slane %v6419_v16, 5  ;;  %v7969_v31 = vsel %vm6784_vm7, %v5538_v61, %v4466_v49  ;;  %v4468_v51 = vrot.slane %v4466_v49, 4  ;;  %v5524_v49 = vld [vmem:[%s6532_s30 + $0xb4] sm:$0xe] }
 0x11c   : > { %v5492_v7 = vcombine.low %v3970_v63, %v3980_v2  ;;  %v4023_v17 = vrot.slane %v4022_v43, 4  ;;  %v5539_v41 = vrot.slane %v5523_v28, 9  ;;  %v4473_v6 = vrot.slane %v7682_v34, 5  ;;  %v5512_v2 = vld [vmem:[%s6532_s30 + $0x24] sm:$0xe] }
 0x11d   : > { %5995 = vmatmul.mubr.msk.bf16.gmra.mrb[20].mxu0 %vm714_vm3, %v7781_v24  ;;  %v4012_v24 = vor.u32 %v4011_v18, %v4008_v30  ;;  %v7974_v57 = vsel %vm6784_vm7, %v4468_v51, %v4469_v23  ;;  %v6371_v30 = vld [vmem:[%s6532_s30 + $0x54] sm:$0xff]   ;;  %v5527_v18 = vrot.slane %v5511_v62, 9  ;;  %v4391_v9 = vrot.slane %v4389_v56, 4  ;;  %v6423_v28 = vld [vmem:[%s6532_s30 + $0x2c] sm:$0x1] }
 0x11e   : > { %5843 = vmatmul.mubr.msk.bf16.gmra.mrb[4].mxu1 %vm714_vm3, %v6368_v29  ;;  %5998 = vmatprep.mubr.msk.bf16.mxu0 %vm714_vm3, %v5491_v46  ;;  %v4027_v46 = vrot.slane %v4025_v50, 5  ;;  %v5493_v29 = vcombine.low %v3994_v4, %v4004_v25  ;;  %v5555_v8 = vcombine.low %v7969_v31, %v7974_v57  ;;  %v4476_v63 = vrot.slane %v7692_v48, 5  ;;  %v6421_v50 = vld [vmem:[%s6532_s30 + $0x28] sm:$0xf]  ;;  %v5513_v25 = vld [vmem:[%s6532_s30 + $0x30] sm:$0xe] }
 0x11f   : > { %5846 = vmatprep.mubr.msk.bf16.mxu1 %vm714_vm3, %v6369_v19  ;;  %v4013_v12 = vrot.slane %v4012_v24, 4  ;;  %v4392_v19 = vrot.slane %v6420_v11, 5  ;;  %v4396_v61 = vrot.slane %v6421_v50, 5  ;;  %v7997_v48 = vsel %vm6784_vm7, %v5539_v41, %v4473_v6  ;;  %v6373_v11 = vld [vmem:[%s6532_s30 + $0x6c] sm:$0xff]   ;;  %v8416_v41 = vld [vmem:[#allocation6_spill] sm:$0xff] }
 0x120   : > { %v4028_v34 = vsel %vm6558_vm4, %v4023_v17, %v4027_v46  ;;  %v4475_v24 = vrot.slane %v4473_v6, 4  ;;  %v4390_v43 = vsel %vm6784_vm7, %v5527_v18, %v4389_v56  ;;  %v5528_v51 = vrot.slane %v5512_v2, 9  ;;  %v5525_v50 = vld [vmem:[%s6532_s30 + $0xc0] sm:$0xe]  ;;  %v6437_v31 = vld [vmem:[%s6532_s30 + $0xc8] sm:$0x1] }
 0x121   : > { %v4018_v4 = vsel %vm6558_vm4, %v4013_v12, %v7937_v5  ;;  %v4393_v23 = vsel %vm6784_vm7, %v4391_v9, %v4392_v19  ;;  %v6422_v5 = vld [vmem:[%s6532_s30 + $0x34] sm:$0xf]  ;;  %v6372_v12 = vld [vmem:[%s6532_s30 + $0x60] sm:$0xff]   ;;  %v5529_v18 = vrot.slane %v5513_v25, 9  ;;  %v4483_v9 = vrot.slane %v7806_v35, 5 }
 0x122   : > { %v4403_v16 = vrot.slane %v6422_v5, 5  ;;  %v8008_v62 = vsel %vm6784_vm7, %v4475_v24, %v4476_v63  ;;  %v5494_v46 = vcombine.low %v4018_v4, %v4028_v34  ;;  %v5544_v17 = vcombine.low %v4390_v43, %v4393_v23  ;;  %v5514_v24 = vld [vmem:[%s6532_s30 + $0x3c] sm:$0xe] }
 0x123   : > { %v5556_v56 = vcombine.low %v7997_v48, %v8008_v62  ;;  %v4406_v6 = vrot.slane %v8416_v41, 5  ;;  %v4397_v35 = vsel %vm6784_vm7, %v5528_v51, %v4396_v61  ;;  %v5541_v5 = vrot.slane %v5525_v50, 9 }
 0x124   : > { %v4405_v19 = vrot.slane %v4403_v16, 4  ;;  %v4404_v23 = vsel %vm6784_vm7, %v5529_v18, %v4403_v16  ;;  %v4490_v51 = vrot.slane %v7899_v52, 5  ;;  %v2467_v57 = vshll.u32 %v6437_v31, 16 }
 0x125   : > { %5999 = vmatmul.mubr.msk.bf16.gmra.mrb[24].mxu0 %vm714_vm3, %v5492_v7  ;;  %v5540_v7 = vrot.slane %v5524_v49, 9 }
 0x126   : > { %5847 = vmatmul.mubr.msk.bf16.gmra.mrb[8].mxu1 %vm714_vm3, %v6370_v47  ;;  %6002 = vmatprep.mubr.msk.bf16.mxu0 %vm714_vm3, %v5493_v29  ;;  %v4399_v47 = vrot.slane %v6423_v28, 5  ;;  %v4480_v29 = vrot.slane %v7757_v39, 5  ;;  %v8417_v39 = vld [vmem:[#allocation7_spill] sm:$0xff]  ;;  %v4407_v25 = vsel %vm6784_vm7, %v4405_v19, %v4406_v6  ;;  %v5530_v28 = vrot.slane %v5514_v24, 9 }
 0x127   : > { %5850 = vmatprep.mubr.msk.bf16.mxu1 %vm714_vm3, %v6371_v30  ;;  %v4398_v30 = vrot.slane %v4396_v61, 4  ;;  %v4410_v49 = vrot.slane %v8417_v39, 5  ;;  %v4487_v61 = vrot.slane %v7809_v58, 5  ;;  %v6424_v39 = vld [vmem:[%s6532_s30 + $0x70] sm:$0xf]  ;;  %v4494_v24 = vrot.slane %v7885_v55, 5 }
 0x128   : > { %v8020_v63 = vsel %vm6784_vm7, %v5540_v7, %v4480_v29  ;;  %v4482_v2 = vrot.slane %v4480_v29, 4  ;;  %v5243_v7 = vld [vmem:[%s6532_s30 + $0x6c] sm:$0xf]  ;;  %v8418_v29 = vld [vmem:[#allocation8_spill] sm:$0xff] }
 0x129   : > { %v4400_v34 = vsel %vm6784_vm7, %v4398_v30, %v4399_v47  ;;  %v4412_v47 = vrot.slane %v4410_v49, 4  ;;  %v6374_v30 = vld [vmem:[%s6532_s30 + $0x78] sm:$0xff]   ;;  %v8051_v16 = vsel %vm6784_vm7, %v5541_v5, %v4487_v61  ;;  %v4489_v18 = vrot.slane %v4487_v61, 4 }
 0x12a   : > { %v8027_v4 = vsel %vm6784_vm7, %v4482_v2, %v4483_v9  ;;  %v5546_v9 = vcombine.low %v4404_v23, %v4407_v25  ;;  %v2280_v19 = vshrl.u32 %v5243_v7, 16  ;;  %v2283_v41 = vshll.u32 %v5243_v7, 16 }
 0x12b   : > { %v5557_v43 = vcombine.low %v8020_v63, %v8027_v4  ;;  %v8056_v58 = vsel %vm6784_vm7, %v4489_v18, %v4490_v51  ;;  %v4411_v6 = vsel %vm6784_vm7, %v5530_v28, %v4410_v49  ;;  %v4497_v49 = vrot.slane %v7930_v21, 5  ;;  %v6376_v51 = vld [vmem:[%s6532_s30 + $0x90] sm:$0xff]   ;;  %v6377_v21 = vld [vmem:[%s6532_s30 + $0x9c] sm:$0xff]  }
 0x12c   : > { %v5558_v50 = vcombine.low %v8051_v16, %v8056_v58  ;;  %v2282_v23 = vrot.slane %v2280_v19, 4  ;;  %v2285_v25 = vrot.slane %v2283_v41, 5  ;;  %v4496_v7 = vrot.slane %v4494_v24, 4 }
 0x12d   : > { %6003 = vmatmul.mubr.msk.bf16.gmra.mrb[28].mxu0 %vm714_vm3, %v5494_v46  ;;  %v5545_v46 = vcombine.low %v4397_v35, %v4400_v34  ;;  %v2289_v35 = vshll.u32 %v6424_v39, 16  ;;  %v2293_v34 = vshrl.u32 %v6424_v39, 16 }
 0x12e   : > { %5851 = vmatmul.mubr.msk.bf16.gmra.mrb[12].mxu1 %vm714_vm3, %v6372_v12  ;;  %6008 = vmatprep.mubr.msk.bf16.mxu0 %vm714_vm3, %v5544_v17  ;;  %v4413_v12 = vrot.slane %v8418_v29, 5  ;;  %v5526_v17 = vld [vmem:[%s6532_s30 + $0xcc] sm:$0xe]  ;;  %v8078_v55 = vsel %vm6784_vm7, %v4496_v7, %v4497_v49 }
 0x12f   : > { %5854 = vmatprep.mubr.msk.bf16.mxu1 %vm714_vm3, %v6373_v11  ;;  %v6375_v11 = vld [vmem:[%s6532_s30 + $0x84] sm:$0xff]   ;;  %v5542_v52 = vrot.slane %v5526_v17, 9  ;;  %v2295_v28 = vrot.slane %v2293_v34, 4  ;;  %v6425_v17 = vld [vmem:[%s6532_s30 + $0x74] sm:$0x1] }
 0x130   : > { %v4414_v2 = vsel %vm6784_vm7, %v4412_v47, %v4413_v12  ;;  %v5249_v47 = vld [vmem:[%s6532_s30 + $0x84] sm:$0xf]  ;;  %v2286_v12 = vor.u32 %v2285_v25, %v2282_v23  ;;  %v6379_v34 = vld [vmem:[%s6532_s30 + $0xb4] sm:$0xff]  }
 0x131   : > { %v8073_v5 = vsel %vm6784_vm7, %v5542_v52, %v4494_v24  ;;  %v5547_v61 = vcombine.low %v4411_v6, %v4414_v2  ;;  %v2331_v18 = vshll.u32 %v5249_v47, 16  ;;  %v5252_v6 = vld [vmem:[%s6532_s30 + $0x90] sm:$0xf]  ;;  %v6378_v2 = vld [vmem:[%s6532_s30 + $0xa8] sm:$0xff]  }
 0x132   : > { %v5559_v29 = vcombine.low %v8073_v5, %v8078_v55  ;;  %v2287_v52 = vrot.slane %v2286_v12, 4  ;;  %v2352_v23 = vshrl.u32 %v5252_v6, 16  ;;  %v2355_v25 = vshll.u32 %v5252_v6, 16 }
 0x133   : > { %v2385_v12 = vshll.u32 %v6428_v60, 16 }
 0x134   : > { %v2357_v14 = vrot.slane %v2355_v25, 5  ;;  %v6431_v25 = vld [vmem:[%s6532_s30 + $0xa4] sm:$0x1] }
 0x135   : > { %6009 = vmatmul.mubr.msk.bf16.vlgmr.msra.gmra.mrb[0].mxu0 %vm714_vm3, %v5545_v46  ;;  %v2291_v46 = vrot.slane %v2289_v35, 5  ;;  %v5255_v35 = vld [vmem:[%s6532_s30 + $0x9c] sm:$0xf]  ;;  %v8120_v6 = vrot.slane %v2385_v12, 5 }
 0x136   : > { %5855 = vmatmul.mubr.msk.bf16.gmra.mrb[16].mxu1 %vm714_vm3, %v6374_v30  ;;  %6012 = vmatprep.mubr.msk.bf16.mxu0 %vm714_vm3, %v5546_v9  ;;  %v2299_v30 = vshll.u32 %v6425_v17, 16  ;;  %v2328_v9 = vshrl.u32 %v5249_v47, 16  ;;  %v2379_v47 = vshll.u32 %v5255_v35, 16  ;;  %v6429_v17 = vld [vmem:[%s6532_s30 + $0x8c] sm:$0x1] }
 0x137   : > { %5858 = vmatprep.mubr.msk.bf16.mxu1 %vm714_vm3, %v6375_v11  ;;  %v2296_v13 = vor.u32 %v2295_v28, %v2291_v46  ;;  %v6426_v11 = vld [vmem:[%s6532_s30 + $0x88] sm:$0xf]  ;;  %v2292_v7 = vsel %vm6558_vm4, %v2287_v52, %v2291_v46 }
 0x138   : > { %v2337_v19 = vshll.u32 %v6426_v11, 16  ;;  %v2341_v41 = vshrl.u32 %v6426_v11, 16  ;;  %v2301_v0 = vrot.slane %v2299_v30, 5  ;;  %v2330_v36 = vrot.slane %v2328_v9, 4 }
 0x139   : > { %v2297_v39 = vrot.slane %v2296_v13, 4  ;;  %v2347_v30 = vshll.u32 %v6429_v17, 16  ;;  %v2354_v9 = vrot.slane %v2352_v23, 4  ;;  %v2381_v11 = vrot.slane %v2379_v47, 5 }
 0x13a   : > { %v8097_v24 = vrot.slane %v2337_v19, 5  ;;  %v2343_v49 = vrot.slane %v2341_v41, 4  ;;  %v6380_v19 = vld [vmem:[%s6532_s30 + $0xc0] sm:$0xff]  }
 0x13b   : > { %v2302_v46 = vsel %vm6558_vm4, %v2297_v39, %v2301_v0  ;;  %v5258_v39 = vld [vmem:[%s6532_s30 + $0xa8] sm:$0xf] }
 0x13c   : > { %v2344_v13 = vor.u32 %v2343_v49, %v8097_v24  ;;  %v5276_v41 = vcombine.low %v2292_v7, %v2302_v46  ;;  %v2395_v7 = vshll.u32 %v6431_v25, 16  ;;  %v2403_v45 = vshll.u32 %v5258_v39, 16 }
 0x13d   : > { %6013 = vmatmul.mubr.msk.bf16.gmra.mrb[4].mxu0 %vm714_vm3, %v5547_v61  ;;  %v6427_v61 = vld [vmem:[%s6532_s30 + $0x94] sm:$0xf] }
 0x13e   : > { %5859 = vmatmul.mubr.msk.bf16.gmra.mrb[20].mxu1 %vm714_vm3, %v6376_v51  ;;  %6016 = vmatprep.mubr.msk.bf16.mxu0 %vm714_vm3, %v5548_v10  ;;  %v2333_v10 = vrot.slane %v2331_v18, 5  ;;  %v2361_v51 = vshll.u32 %v6427_v61, 16  ;;  %v2365_v28 = vshrl.u32 %v6427_v61, 16  ;;  %v2345_v0 = vrot.slane %v2344_v13, 4 }
 0x13f   : > { %5862 = vmatprep.mubr.msk.bf16.mxu1 %vm714_vm3, %v6377_v21  ;;  %v2376_v21 = vshrl.u32 %v5255_v35, 16  ;;  %v6430_v35 = vld [vmem:[%s6532_s30 + $0x98] sm:$0x1]  ;;  %v2400_v61 = vshrl.u32 %v5258_v39, 16  ;;  %v5264_v39 = vld [vmem:[%s6532_s30 + $0xc0] sm:$0xf] }
 0x140   : > { %v2334_v15 = vor.u32 %v2333_v10, %v2330_v36  ;;  %v8117_v26 = vrot.slane %v2361_v51, 5  ;;  %v2349_v36 = vrot.slane %v2347_v30, 5  ;;  %v2358_v10 = vor.u32 %v2357_v14, %v2354_v9  ;;  %v5261_v51 = vld [vmem:[%s6532_s30 + $0xb4] sm:$0xf] }
 0x141   : > { %v2378_v18 = vrot.slane %v2376_v21, 4  ;;  %v2413_v21 = vshrl.u32 %v6432_v27, 16  ;;  %v2424_v20 = vshrl.u32 %v5261_v51, 16  ;;  %v2427_v42 = vshll.u32 %v5261_v51, 16 }
 0x142   : > { %v2335_v52 = vrot.slane %v2334_v15, 4  ;;  %v2350_v46 = vsel %vm6558_vm4, %v2345_v0, %v2349_v36  ;;  %v2359_v15 = vrot.slane %v2358_v10, 4  ;;  %v2397_v30 = vrot.slane %v2395_v7, 5 }
 0x143   : > { %v2382_v23 = vor.u32 %v2381_v11, %v2378_v18  ;;  %v2402_v9 = vrot.slane %v2400_v61, 4  ;;  %v2415_v11 = vrot.slane %v2413_v21, 4  ;;  %v6436_v61 = vld [vmem:[%s6532_s30 + $0xbc] sm:$0x1] }
 0x144   : > { %v2340_v47 = vsel %vm6558_vm4, %v2335_v52, %v8097_v24  ;;  %v2364_v0 = vsel %vm6558_vm4, %v2359_v15, %v8117_v26  ;;  %v2443_v22 = vshll.u32 %v6436_v61, 16 }
 0x145   : > { %6017 = vmatmul.mubr.msk.bf16.gmra.mrb[8].mxu0 %vm714_vm3, %v5549_v40  ;;  %v2389_v40 = vshrl.u32 %v6428_v60, 16  ;;  %v2383_v17 = vrot.slane %v2382_v23, 4  ;;  %v5278_v24 = vcombine.low %v2340_v47, %v2350_v46 }
 0x146   : > { %5863 = vmatmul.mubr.msk.bf16.gmra.mrb[24].mxu1 %vm714_vm3, %v6378_v2  ;;  %6020 = vmatprep.mubr.msk.bf16.mxu0 %vm714_vm3, %v5550_v54  ;;  %v2367_v54 = vrot.slane %v2365_v28, 4 }
 0x147   : > { %5866 = vmatprep.mubr.msk.bf16.mxu1 %vm714_vm3, %v6379_v34  ;;  %v2391_v2 = vrot.slane %v2389_v40, 4  ;;  %v2371_v34 = vshll.u32 %v6430_v35, 16  ;;  %v2388_v10 = vsel %vm6558_vm4, %v2383_v17, %v8120_v6  ;;  %v2469_v17 = vrot.slane %v2467_v57, 5 }
 0x148   : > { %v2368_v49 = vor.u32 %v2367_v54, %v8117_v26  ;;  %v2405_v54 = vrot.slane %v2403_v45, 5  ;;  %v6434_v26 = vld [vmem:[%s6532_s30 + $0xb0] sm:$0x1] }
 0x149   : > { %v2392_v28 = vor.u32 %v2391_v2, %v8120_v6  ;;  %v2373_v60 = vrot.slane %v2371_v34, 5  ;;  %v2419_v35 = vshll.u32 %v6434_v26, 16  ;;  %v2448_v34 = vshrl.u32 %v5264_v39, 16 }
 0x14a   : > { %v2369_v13 = vrot.slane %v2368_v49, 4  ;;  %v2406_v38 = vor.u32 %v2405_v54, %v2402_v9  ;;  %v2451_v6 = vshll.u32 %v5264_v39, 16  ;;  %v6435_v49 = vld [vmem:[%s6532_s30 + $0xc4] sm:$0xf] }
 0x14b   : > { %v2393_v14 = vrot.slane %v2392_v28, 4  ;;  %v2457_v23 = vshll.u32 %v6435_v49, 16  ;;  %v2461_v25 = vshrl.u32 %v6435_v49, 16  ;;  %v2421_v45 = vrot.slane %v2419_v35, 5 }
 0x14c   : > { %v2374_v36 = vsel %vm6558_vm4, %v2369_v13, %v2373_v60  ;;  %v2407_v51 = vrot.slane %v2406_v38, 4  ;;  %v2445_v60 = vrot.slane %v2443_v22, 5 }
 0x14d   : > { %6021 = vmatmul.mubr.msk.bf16.gmra.mrb[12].mxu0 %vm714_vm3, %v5551_v53  ;;  %v2409_v53 = vshll.u32 %v6432_v27, 16  ;;  %v2398_v59 = vsel %vm6558_vm4, %v2393_v14, %v2397_v30  ;;  %v5279_v44 = vcombine.low %v2364_v0, %v2374_v36  ;;  %v2450_v27 = vrot.slane %v2448_v34, 4  ;;  %v8228_v36 = vld [vmem:[%s8350_s3] ss:$0 sm:$0xff] }
 0x14e   : > { %5867 = vmatmul.mubr.msk.bf16.gmra.mrb[28].mxu1 %vm714_vm3, %v6380_v19  ;;  %6024 = vmatprep.mubr.msk.bf16.mxu0 %vm714_vm3, %v5552_v33  ;;  %v6433_v33 = vld [vmem:[%s6532_s30 + $0xb8] sm:$0xf]  ;;  %v2426_v19 = vrot.slane %v2424_v20, 4  ;;  %v2459_v21 = vrot.slane %v2457_v23, 5  ;;  %v2463_v47 = vrot.slane %v2461_v25, 4  ;;  %s8238_s30 = scalar_lea.vmem %s8351_s4, %s5580_s27 }
 0x14f   : > { %5888 = vmatprep.mubr.msk.bf16.mxu1 %vm714_vm3, %v5276_v41  ;;  %v2433_v12 = vshll.u32 %v6433_v33, 16  ;;  %v2437_v40 = vshrl.u32 %v6433_v33, 16  ;;  %v2411_v18 = vrot.slane %v2409_v53, 5  ;;  %v2429_v41 = vrot.slane %v2427_v42, 5 }
 0x150   : > { %v2453_v53 = vrot.slane %v2451_v6, 5 }
 0x151   : > { %v2435_v52 = vrot.slane %v2433_v12, 5  ;;  %v2439_v2 = vrot.slane %v2437_v40, 4  ;;  %v2412_v20 = vsel %vm6558_vm4, %v2407_v51, %v2411_v18  ;;  %v2464_v12 = vor.u32 %v2463_v47, %v2459_v21 }
 0x152   : > { %v2454_v33 = vor.u32 %v2453_v53, %v2450_v27 }
 0x153   : > { %v2440_v7 = vor.u32 %v2439_v2, %v2435_v52  ;;  %v2465_v13 = vrot.slane %v2464_v12, 4  ;;  %v8223_v2 = vld [vmem:[%s8349_s2] ss:$0 sm:$0xff] }
 0x154   : > { %v2455_v40 = vrot.slane %v2454_v33, 4 }
 0x155   : > { %6025 = vmatmul.mubr.msk.bf16.gmra.mrb[16].mxu0 %vm714_vm3, %v5553_v37  ;;  %v2416_v37 = vor.u32 %v2415_v11, %v2411_v18  ;;  %v2441_v15 = vrot.slane %v2440_v7, 4  ;;  %v2470_v9 = vsel %vm6558_vm4, %v2465_v13, %v2469_v17 }
 0x156   : > { %5889 = vmatmul.mubr.msk.bf16.vlgmr.msra.gmra.mrb[16].mxu1 %vm714_vm3, %v7926_v1  ;;  %6028 = vmatprep.mubr.msk.bf16.mxu0 %vm714_vm3, %v5554_v3  ;;  %v2430_v1 = vor.u32 %v2429_v41, %v2426_v19  ;;  %v5280_v3 = vcombine.low %v2388_v10, %v2398_v59  ;;  %v2460_v30 = vsel %vm6558_vm4, %v2455_v40, %v2459_v21 }
 0x157   : > { %5892 = vmatprep.mubr.msk.bf16.mxu1 %vm714_vm3, %v5278_v24  ;;  %v2417_v28 = vrot.slane %v2416_v37, 4  ;;  %v2446_v48 = vsel %vm6558_vm4, %v2441_v15, %v2445_v60  ;;  %v5283_v14 = vcombine.low %v2460_v30, %v2470_v9 }
 0x158   : > { %v2431_v46 = vrot.slane %v2430_v1, 4 }
 0x159   : > { %v2422_v42 = vsel %vm6558_vm4, %v2417_v28, %v2421_v45 }
 0x15a   : > { %v5281_v62 = vcombine.low %v2412_v20, %v2422_v42 }
 0x15d   : > { %6029 = vmatmul.mubr.msk.bf16.gmra.mrb[20].mxu0 %vm714_vm3, %v5555_v8  ;;  %v2436_v8 = vsel %vm6558_vm4, %v2431_v46, %v2435_v52 }
 0x15e   : > { %5893 = vmatmul.mubr.msk.bf16.gmra.mrb[20].mxu1 %vm714_vm3, %v5279_v44  ;;  %6032 = vmatprep.mubr.msk.bf16.mxu0 %vm714_vm3, %v5556_v56  ;;  %v5282_v56 = vcombine.low %v2436_v8, %v2446_v48 }
 0x15f   : > { %5896 = vmatprep.mubr.msk.bf16.mxu1 %vm714_vm3, %v5280_v3 }
 0x165   : > { %6033 = vmatmul.mubr.msk.bf16.gmra.mrb[24].mxu0 %vm714_vm3, %v5557_v43 }
 0x166   : > { %5897 = vmatmul.mubr.msk.bf16.gmra.mrb[24].mxu1 %vm714_vm3, %v5281_v62  ;;  %6036 = vmatprep.mubr.msk.bf16.mxu0 %vm714_vm3, %v5558_v50 }
 0x167   : > { %5900 = vmatprep.mubr.msk.bf16.mxu1 %vm714_vm3, %v5282_v56 }
 0x16d   : > { %6037 = vmatmul.mubr.msk.bf16.gmra.mrb[28].mxu0 %vm714_vm3, %v5559_v29 }
 0x16e   : > { %5901 = vmatmul.mubr.msk.bf16.gmra.mrb[28].mxu1 %vm714_vm3, %v5283_v14 }
 0x1e9   : > { %v5840_v63 = vpop.f32.mrb[0].mxu1 }
 0x1ea   : > { %v1880_v4 = vpop.f32.mrb[1].mxu1 }
 0x1eb   : > { %v5841_v43 = vpop.f32.mrb[2].mxu1 }
 0x1ec   : > { %v1883_v16 = vpop.f32.mrb[3].mxu1 }
 0x1f1   : > { %v5844_v58 = vpop.f32.mrb[4].mxu1 }
 0x1f2   : > { %v1896_v50 = vpop.f32.mrb[5].mxu1 }
 0x1f3   : > { %v5845_v54 = vpop.f32.mrb[6].mxu1 }
 0x1f4   : > { %v1899_v18 = vpop.f32.mrb[7].mxu1 }
 0x1f9   : > { %v5848_v11 = vpop.f32.mrb[8].mxu1 }
 0x1fa   : > { %v1912_v32 = vpop.f32.mrb[9].mxu1 }
 0x1fb   : > { %v8208_v24 = vpop.f32.mrb[10].mxu1 }
 0x1fc   : > { %v8210_v19 = vpop.f32.mrb[11].mxu1 }
 0x201   : > { %v8212_v5 = vpop.f32.mrb[12].mxu1 }
 0x202   : > { %v8214_v55 = vpop.f32.mrb[13].mxu1 }
 0x203   : > { %v8216_v29 = vpop.f32.mrb[14].mxu1 }
 0x204   : > { %v8218_v41 = vpop.f32.mrb[15].mxu1 }
 0x208   : > { %v6010_v52 = vpop.f32.mrb[0].mxu0 }
 0x209   : > { %v6042_v39 = vadd.f32 %v6010_v52, %v5840_v63  ;;  %v4634_v0 = vpop.f32.mrb[1].mxu0 }
 0x20a   : > { %v6043_v10 = vadd.f32 %v4634_v0, %v1880_v4  ;;  %v6011_v59 = vpop.f32.mrb[2].mxu0 }
 0x20b   : > { %v4802_v38 = vmul.f32 %v6042_v39, %v8223_v2  ;;  %v6044_v37 = vadd.f32 %v6011_v59, %v5841_v43  ;;  %v4637_v26 = vpop.f32.mrb[3].mxu0 }
 0x20c   : > { %v4800_v35 = vmul.f32 %v6043_v10, %v8223_v2  ;;  %v6045_v34 = vadd.f32 %v4637_v26, %v1883_v16 }
 0x20d   : > { %v4841_v6 = vadd.f32 %v8228_v36, %v4802_v38  ;;  %v4803_v49 = vmul.f32 %v6044_v37, %v8223_v2 }
 0x20e   : > { %v4839_v23 = vadd.f32 %v8228_v36, %v4800_v35  ;;  %v4801_v25 = vmul.f32 %v6045_v34, %v8223_v2 }
 0x20f   : > { %v4873_v1 = vmax.f32 %v4841_v6, 0.0  ;;  %v4842_v7 = vadd.f32 %v8228_v36, %v4803_v49 }
 0x210   : > { %v4871_v61 = vmax.f32 %v4839_v23, 0.0  ;;  %v4840_v22 = vadd.f32 %v8228_v36, %v4801_v25  ;;  %v6014_v44 = vpop.f32.mrb[4].mxu0 }
 0x211   : > { %4905 = vst [vmem:[%s8238_s30 + $0x10] sm:$0xff] %v4873_v1  ;;  %v4874_v3 = vmax.f32 %v4842_v7, 0.0  ;;  %v6046_v51 = vadd.f32 %v6014_v44, %v5844_v58  ;;  %v4650_v28 = vpop.f32.mrb[5].mxu0 }
 0x212   : > { %4903 = vst [vmem:[%s8238_s30] sm:$0xff] %v4871_v61  ;;  %v4872_v45 = vmax.f32 %v4840_v22, 0.0  ;;  %v6047_v27 = vadd.f32 %v4650_v28, %v1896_v50  ;;  %v6015_v53 = vpop.f32.mrb[6].mxu0 }
 0x213   : > { %4906 = vst [vmem:[%s8238_s30 + $0x18] sm:$0xff] %v4874_v3  ;;  %v4806_v21 = vmul.f32 %v6046_v51, %v8223_v2  ;;  %v6048_v47 = vadd.f32 %v6015_v53, %v5845_v54  ;;  %v4653_v46 = vpop.f32.mrb[7].mxu0 }
 0x214   : > { %4904 = vst [vmem:[%s8238_s30 + $0x8] sm:$0xff] %v4872_v45  ;;  %v4804_v15 = vmul.f32 %v6047_v27, %v8223_v2  ;;  %v6049_v60 = vadd.f32 %v4653_v46, %v1899_v18 }
 0x215   : > { %v4845_v20 = vadd.f32 %v8228_v36, %v4806_v21  ;;  %v4807_v42 = vmul.f32 %v6048_v47, %v8223_v2 }
 0x216   : > { %v4843_v33 = vadd.f32 %v8228_v36, %v4804_v15  ;;  %v4805_v12 = vmul.f32 %v6049_v60, %v8223_v2 }
 0x217   : > { %v4877_v31 = vmax.f32 %v4845_v20, 0.0  ;;  %v4846_v57 = vadd.f32 %v8228_v36, %v4807_v42 }
 0x218   : > { %v4875_v8 = vmax.f32 %v4843_v33, 0.0  ;;  %v4844_v48 = vadd.f32 %v8228_v36, %v4805_v12  ;;  %v6018_v62 = vpop.f32.mrb[8].mxu0 }
 0x219   : > { %4909 = vst [vmem:[%s8238_s30 + $0x30] sm:$0xff] %v4877_v31  ;;  %v4878_v56 = vmax.f32 %v4846_v57, 0.0  ;;  %v6050_v40 = vadd.f32 %v6018_v62, %v5848_v11  ;;  %v4666_v13 = vpop.f32.mrb[9].mxu0 }
 0x21a   : > { %4907 = vst [vmem:[%s8238_s30 + $0x20] sm:$0xff] %v4875_v8  ;;  %v4876_v17 = vmax.f32 %v4844_v48, 0.0  ;;  %v6051_v30 = vadd.f32 %v4666_v13, %v1912_v32  ;;  %v6019_v9 = vpop.f32.mrb[10].mxu0 }
 0x21b   : > { %4910 = vst [vmem:[%s8238_s30 + $0x38] sm:$0xff] %v4878_v56  ;;  %v4810_v14 = vmul.f32 %v6050_v40, %v8223_v2  ;;  %v6052_v63 = vadd.f32 %v6019_v9, %v8208_v24  ;;  %v4669_v4 = vpop.f32.mrb[11].mxu0 }
 0x21c   : > { %4908 = vst [vmem:[%s8238_s30 + $0x28] sm:$0xff] %v4876_v17  ;;  %v4808_v43 = vmul.f32 %v6051_v30, %v8223_v2  ;;  %v6053_v16 = vadd.f32 %v4669_v4, %v8210_v19 }
 0x21d   : > { %v4849_v58 = vadd.f32 %v8228_v36, %v4810_v14  ;;  %v4811_v50 = vmul.f32 %v6052_v63, %v8223_v2 }
 0x21e   : > { %v4847_v54 = vadd.f32 %v8228_v36, %v4808_v43  ;;  %v4809_v18 = vmul.f32 %v6053_v16, %v8223_v2 }
 0x21f   : > { %v4881_v11 = vmax.f32 %v4849_v58, 0.0  ;;  %v4850_v32 = vadd.f32 %v8228_v36, %v4811_v50 }
 0x220   : > { %v4879_v24 = vmax.f32 %v4847_v54, 0.0  ;;  %v4848_v52 = vadd.f32 %v8228_v36, %v4809_v18  ;;  %v6022_v39 = vpop.f32.mrb[12].mxu0 }
 0x221   : > { %4913 = vst [vmem:[%s8238_s30 + $0x50] sm:$0xff] %v4881_v11  ;;  %v4882_v0 = vmax.f32 %v4850_v32, 0.0  ;;  %v6054_v19 = vadd.f32 %v6022_v39, %v8212_v5  ;;  %v4682_v10 = vpop.f32.mrb[13].mxu0 }
 0x222   : > { %4911 = vst [vmem:[%s8238_s30 + $0x40] sm:$0xff] %v4879_v24  ;;  %v4880_v59 = vmax.f32 %v4848_v52, 0.0  ;;  %v6055_v38 = vadd.f32 %v4682_v10, %v8214_v55  ;;  %v6023_v37 = vpop.f32.mrb[14].mxu0 }
 0x223   : > { %4914 = vst [vmem:[%s8238_s30 + $0x58] sm:$0xff] %v4882_v0  ;;  %v4814_v26 = vmul.f32 %v6054_v19, %v8223_v2  ;;  %v6056_v35 = vadd.f32 %v6023_v37, %v8216_v29  ;;  %v4685_v34 = vpop.f32.mrb[15].mxu0 }
 0x224   : > { %4912 = vst [vmem:[%s8238_s30 + $0x48] sm:$0xff] %v4880_v59  ;;  %v4812_v6 = vmul.f32 %v6055_v38, %v8223_v2  ;;  %v6057_v49 = vadd.f32 %v4685_v34, %v8218_v41 }
 0x225   : > { %v4853_v5 = vadd.f32 %v8228_v36, %v4814_v26  ;;  %v4815_v23 = vmul.f32 %v6056_v35, %v8223_v2 }
 0x226   : > { %v4851_v55 = vadd.f32 %v8228_v36, %v4812_v6  ;;  %v4813_v25 = vmul.f32 %v6057_v49, %v8223_v2 }
 0x227   : > { %v4885_v1 = vmax.f32 %v4853_v5, 0.0  ;;  %v4854_v7 = vadd.f32 %v8228_v36, %v4815_v23 }
 0x228   : > { %v4883_v29 = vmax.f32 %v4851_v55, 0.0  ;;  %v4852_v61 = vadd.f32 %v8228_v36, %v4813_v25  ;;  %v6026_v22 = vpop.f32.mrb[16].mxu0 }
 0x229   : > { %4917 = vst [vmem:[%s8238_s30 + $0x70] sm:$0xff] %v4885_v1  ;;  %v4886_v44 = vmax.f32 %v4854_v7, 0.0  ;;  %v5890_v41 = vpop.f32.mrb[16].mxu1  ;;  %v4698_v3 = vpop.f32.mrb[17].mxu0 }
 0x22a   : > { %4915 = vst [vmem:[%s8238_s30 + $0x60] sm:$0xff] %v4883_v29  ;;  %v4884_v51 = vmax.f32 %v4852_v61, 0.0  ;;  %v6058_v28 = vadd.f32 %v6026_v22, %v5890_v41  ;;  %v2670_v45 = vpop.f32.mrb[17].mxu1  ;;  %v6027_v27 = vpop.f32.mrb[18].mxu0 }
 0x22b   : > { %4918 = vst [vmem:[%s8238_s30 + $0x78] sm:$0xff] %v4886_v44  ;;  %v6059_v53 = vadd.f32 %v4698_v3, %v2670_v45  ;;  %v5891_v21 = vpop.f32.mrb[18].mxu1  ;;  %v4701_v47 = vpop.f32.mrb[19].mxu0 }
 0x22c   : > { %4916 = vst [vmem:[%s8238_s30 + $0x68] sm:$0xff] %v4884_v51  ;;  %v4818_v46 = vmul.f32 %v6058_v28, %v8223_v2  ;;  %v6060_v15 = vadd.f32 %v6027_v27, %v5891_v21  ;;  %v2673_v60 = vpop.f32.mrb[19].mxu1 }
 0x22d   : > { %v4816_v20 = vmul.f32 %v6059_v53, %v8223_v2  ;;  %v6061_v42 = vadd.f32 %v4701_v47, %v2673_v60 }
 0x22e   : > { %v4857_v33 = vadd.f32 %v8228_v36, %v4818_v46  ;;  %v4819_v12 = vmul.f32 %v6060_v15, %v8223_v2 }
 0x22f   : > { %v4855_v31 = vadd.f32 %v8228_v36, %v4816_v20  ;;  %v4817_v57 = vmul.f32 %v6061_v42, %v8223_v2 }
 0x230   : > { %v4889_v8 = vmax.f32 %v4857_v33, 0.0  ;;  %v4858_v48 = vadd.f32 %v8228_v36, %v4819_v12  ;;  %v6030_v62 = vpop.f32.mrb[20].mxu0 }
 0x231   : > { %v4887_v56 = vmax.f32 %v4855_v31, 0.0  ;;  %v4856_v40 = vadd.f32 %v8228_v36, %v4817_v57  ;;  %v5894_v13 = vpop.f32.mrb[20].mxu1  ;;  %v4714_v17 = vpop.f32.mrb[21].mxu0 }
 0x232   : > { %4921 = vst [vmem:[%s8238_s30 + $0x90] sm:$0xff] %v4889_v8  ;;  %v4890_v30 = vmax.f32 %v4858_v48, 0.0  ;;  %v6062_v9 = vadd.f32 %v6030_v62, %v5894_v13  ;;  %v2686_v14 = vpop.f32.mrb[21].mxu1  ;;  %v6031_v63 = vpop.f32.mrb[22].mxu0 }
 0x233   : > { %4919 = vst [vmem:[%s8238_s30 + $0x80] sm:$0xff] %v4887_v56  ;;  %v4888_v4 = vmax.f32 %v4856_v40, 0.0  ;;  %v6063_v43 = vadd.f32 %v4714_v17, %v2686_v14  ;;  %v5895_v16 = vpop.f32.mrb[22].mxu1  ;;  %v4717_v58 = vpop.f32.mrb[23].mxu0 }
 0x234   : > { %4922 = vst [vmem:[%s8238_s30 + $0x98] sm:$0xff] %v4890_v30  ;;  %v4822_v50 = vmul.f32 %v6062_v9, %v8223_v2  ;;  %v6064_v54 = vadd.f32 %v6031_v63, %v5895_v16  ;;  %v2689_v18 = vpop.f32.mrb[23].mxu1 }
 0x235   : > { %4920 = vst [vmem:[%s8238_s30 + $0x88] sm:$0xff] %v4888_v4  ;;  %v4820_v11 = vmul.f32 %v6063_v43, %v8223_v2  ;;  %v6065_v32 = vadd.f32 %v4717_v58, %v2689_v18 }
 0x236   : > { %v4861_v24 = vadd.f32 %v8228_v36, %v4822_v50  ;;  %v4823_v52 = vmul.f32 %v6064_v54, %v8223_v2 }
 0x237   : > { %v4859_v39 = vadd.f32 %v8228_v36, %v4820_v11  ;;  %v4821_v0 = vmul.f32 %v6065_v32, %v8223_v2 }
 0x238   : > { %v4893_v19 = vmax.f32 %v4861_v24, 0.0  ;;  %v4862_v10 = vadd.f32 %v8228_v36, %v4823_v52  ;;  %v6034_v59 = vpop.f32.mrb[24].mxu0 }
 0x239   : > { %v4891_v38 = vmax.f32 %v4859_v39, 0.0  ;;  %v4860_v37 = vadd.f32 %v8228_v36, %v4821_v0  ;;  %v5898_v26 = vpop.f32.mrb[24].mxu1  ;;  %v4730_v35 = vpop.f32.mrb[25].mxu0 }
 0x23a   : > { %4925 = vst [vmem:[%s8238_s30 + $0xb0] sm:$0xff] %v4893_v19  ;;  %v4894_v34 = vmax.f32 %v4862_v10, 0.0  ;;  %v6066_v6 = vadd.f32 %v6034_v59, %v5898_v26  ;;  %v2702_v49 = vpop.f32.mrb[25].mxu1  ;;  %v6035_v5 = vpop.f32.mrb[26].mxu0 }
 0x23b   : > { %4923 = vst [vmem:[%s8238_s30 + $0xa0] sm:$0xff] %v4891_v38  ;;  %v4892_v23 = vmax.f32 %v4860_v37, 0.0  ;;  %v6067_v55 = vadd.f32 %v4730_v35, %v2702_v49  ;;  %v5899_v25 = vpop.f32.mrb[26].mxu1  ;;  %v4733_v1 = vpop.f32.mrb[27].mxu0 }
 0x23c   : > { %4926 = vst [vmem:[%s8238_s30 + $0xb8] sm:$0xff] %v4894_v34  ;;  %v4826_v7 = vmul.f32 %v6066_v6, %v8223_v2  ;;  %v6068_v29 = vadd.f32 %v6035_v5, %v5899_v25  ;;  %v2705_v61 = vpop.f32.mrb[27].mxu1 }
 0x23d   : > { %4924 = vst [vmem:[%s8238_s30 + $0xa8] sm:$0xff] %v4892_v23  ;;  %v4824_v22 = vmul.f32 %v6067_v55, %v8223_v2  ;;  %v6069_v44 = vadd.f32 %v4733_v1, %v2705_v61 }
 0x23e   : > { %v4865_v41 = vadd.f32 %v8228_v36, %v4826_v7  ;;  %v4827_v3 = vmul.f32 %v6068_v29, %v8223_v2 }
 0x23f   : > { %v4863_v51 = vadd.f32 %v8228_v36, %v4824_v22  ;;  %v4825_v28 = vmul.f32 %v6069_v44, %v8223_v2 }
 0x240   : > { %v4897_v45 = vmax.f32 %v4865_v41, 0.0  ;;  %v4866_v27 = vadd.f32 %v8228_v36, %v4827_v3  ;;  %v6038_v53 = vpop.f32.mrb[28].mxu0 }
 0x241   : > { %v4895_v21 = vmax.f32 %v4863_v51, 0.0  ;;  %v4864_v47 = vadd.f32 %v8228_v36, %v4825_v28  ;;  %v5902_v46 = vpop.f32.mrb[28].mxu1  ;;  %v4746_v15 = vpop.f32.mrb[29].mxu0 }
 0x242   : > { %4929 = vst [vmem:[%s8238_s30 + $0xd0] sm:$0xff] %v4897_v45  ;;  %v4898_v60 = vmax.f32 %v4866_v27, 0.0  ;;  %v6070_v20 = vadd.f32 %v6038_v53, %v5902_v46  ;;  %v2718_v42 = vpop.f32.mrb[29].mxu1  ;;  %v6039_v33 = vpop.f32.mrb[30].mxu0 }
 0x243   : > { %4927 = vst [vmem:[%s8238_s30 + $0xc0] sm:$0xff] %v4895_v21  ;;  %v4896_v12 = vmax.f32 %v4864_v47, 0.0  ;;  %v6071_v31 = vadd.f32 %v4746_v15, %v2718_v42  ;;  %v5903_v57 = vpop.f32.mrb[30].mxu1  ;;  %v4749_v8 = vpop.f32.mrb[31].mxu0 }
 0x244   : > { %4930 = vst [vmem:[%s8238_s30 + $0xd8] sm:$0xff] %v4898_v60  ;;  %v4830_v48 = vmul.f32 %v6070_v20, %v8223_v2  ;;  %v6072_v62 = vadd.f32 %v6039_v33, %v5903_v57  ;;  %v2721_v56 = vpop.f32.mrb[31].mxu1 }
 0x245   : > { %4928 = vst [vmem:[%s8238_s30 + $0xc8] sm:$0xff] %v4896_v12  ;;  %v4828_v40 = vmul.f32 %v6071_v31, %v8223_v2  ;;  %v6073_v13 = vadd.f32 %v4749_v8, %v2721_v56 }
 0x246   : > { %v4869_v17 = vadd.f32 %v8228_v36, %v4830_v48  ;;  %v4831_v30 = vmul.f32 %v6072_v62, %v8223_v2 }
 0x247   : > { %v4867_v9 = vadd.f32 %v8228_v36, %v4828_v40  ;;  %v4829_v14 = vmul.f32 %v6073_v13, %v8223_v2 }
 0x248   : > { %v4901_v63 = vmax.f32 %v4869_v17, 0.0  ;;  %v4870_v4 = vadd.f32 %v8228_v36, %v4831_v30 }
 0x249   : > { %v4899_v43 = vmax.f32 %v4867_v9, 0.0  ;;  %v4868_v16 = vadd.f32 %v8228_v36, %v4829_v14 }
 0x24a   : > { %4933 = vst [vmem:[%s8238_s30 + $0xf0] sm:$0xff] %v4901_v63  ;;  %v4902_v58 = vmax.f32 %v4870_v4, 0.0 }
 0x24b   : > { %4931 = vst [vmem:[%s8238_s30 + $0xe0] sm:$0xff] %v4899_v43  ;;  %v4900_v50 = vmax.f32 %v4868_v16, 0.0 }
 0x24c   : > { %4934 = vst [vmem:[%s8238_s30 + $0xf8] sm:$0xff] %v4902_v58 }
 0x24d   : > { %4932 = vst [vmem:[%s8238_s30 + $0xe8] sm:$0xff] %v4900_v50 }
 0x24e PF: > { %s14_s17 = sadd.s32 1, %s6460_s17   ;;  %s8419_s15 = smov %s6456_s16 }
 0x24f   : > { %p11_p5 = scmp.ge.s32.totalorder %s14_s17, 4   ;;  %s8420_s16 = smov %s8422_s18 }
 0x251   :  { %13 = sbr.rel (!%p11_p5) target bundleno = 2 (0x2), region = 77 }

</bundles_post_ra>
